<compile_context>
chip_gen: v7x
topology: tpu7x:2x2x1
jax: 0.10.0
libtpu: 0.0.40
codegen_flags: <defaults>
</compile_context>

<pallas_src>
import jax
import jax.numpy as jnp
from jax.experimental import pallas as pl
from jax.experimental.pallas import tpu as pltpu


_PARAM_KEYS = ("w1", "b1", "w2", "b2", "w3", "b3", "caw1", "caw2", "saT")
_PARAM_KEYS_DS = _PARAM_KEYS + ("dw", "db")


# ---------------------------------------------------------------------------
# In-kernel bottleneck body: pure function of a VMEM-resident image value.
# ---------------------------------------------------------------------------
def _bottleneck_body(x_img, prm, *, stride, sel_ref=None):
    """One Bottleneck + CBAM block.  x_img: [Hi, Wi, cin] f32 value."""
    w1, b1, w2, b2, w3, b3, caw1, caw2, saT = prm[:9]
    Hi, Wi, cin = x_img.shape
    width = w1.shape[-1]
    planes = w3.shape[-1]
    ho, wo = Hi // stride, Wi // stride

    # ---- conv1 (1x1, BN scale folded into w1) + shift + ReLU -------------
    x_flat = x_img.reshape(Hi * Wi, cin)                 # free (Wi % 8 == 0)
    o1 = jnp.dot(x_flat.astype(jnp.bfloat16), w1[...],
                 preferred_element_type=jnp.float32) + b1[...]
    o1 = jnp.maximum(o1, 0.0)

    # ---- conv2 (3x3, pad=1, BN folded) + ReLU: implicit GEMM -------------
    # In-kernel zero padding; 3 matmuls with K = 3*width (column taps of one
    # row offset concatenated along K).  Stride-2 is handled by computing the
    # stride-1 output and subsampling with an exact selection matmul.
    o1i = o1.astype(jnp.bfloat16).reshape(Hi, Wi, width)
    zrow = jnp.zeros((1, Wi, width), jnp.bfloat16)
    o1p = jnp.concatenate([zrow, o1i, zrow], axis=0)     # [Hi+2, Wi,   width]
    zcol = jnp.zeros((Hi + 2, 1, width), jnp.bfloat16)
    o1p = jnp.concatenate([zcol, o1p, zcol], axis=1)     # [Hi+2, Wi+2, width]
    acc = jnp.zeros((Hi * Wi, width), jnp.float32)
    for di in range(3):
        rows = o1p[di:di + Hi, :, :]                     # [Hi, Wi+2, width]
        cat = jnp.concatenate(
            [rows[:, 0:Wi], rows[:, 1:Wi + 1], rows[:, 2:Wi + 2]], axis=-1)
        acc = acc + jnp.dot(cat.reshape(Hi * Wi, 3 * width), w2[di],
                            preferred_element_type=jnp.float32)
    o2 = jnp.maximum(acc + b2[...], 0.0)                 # [Hi*Wi, width] f32
    if stride == 2:
        # exact 0/1 selection of even (row, col) positions, done on the MXU
        o2 = jnp.dot(sel_ref[...], o2, preferred_element_type=jnp.float32)

    # ---- conv3 (1x1, BN folded) + shift ----------------------------------
    o3 = jnp.dot(o2.astype(jnp.bfloat16), w3[...],
                 preferred_element_type=jnp.float32) + b3[...]   # [hw, planes]

    # ---- channel attention: avg/max pool + shared MLP + sigmoid ----------
    avg = jnp.mean(o3, axis=0, keepdims=True)            # [1, planes]
    mx = jnp.max(o3, axis=0, keepdims=True)

    def _mlp(v):
        h = jnp.dot(v.astype(jnp.bfloat16), caw1[...],
                    preferred_element_type=jnp.float32)
        h = jnp.maximum(h, 0.0)
        return jnp.dot(h.astype(jnp.bfloat16), caw2[...],
                       preferred_element_type=jnp.float32)

    ca = jax.nn.sigmoid(_mlp(avg) + _mlp(mx))            # [1, planes]
    y = o3 * ca                                          # [hw, planes]

    # ---- spatial attention: 7x7 conv on [mean_c, max_c] as ONE matmul ----
    # saT folds the 7x7 weights and the column zero-padding; rows are padded
    # here and the 7 row-shifted windows are concatenated along K.
    y_img = y.reshape(ho, wo, planes)
    mean_m = jnp.mean(y_img, axis=2)                     # [ho, wo] f32
    max_m = jnp.max(y_img, axis=2)
    zpad = jnp.zeros((3, wo), jnp.float32)
    mean_p = jnp.concatenate([zpad, mean_m, zpad], axis=0)   # [ho+6, wo]
    max_p = jnp.concatenate([zpad, max_m, zpad], axis=0)
    stack = jnp.concatenate(
        [mean_p[a:a + ho, :] for a in range(7)]
        + [max_p[a:a + ho, :] for a in range(7)], axis=-1)   # [ho, 14*wo]
    logit = jnp.dot(stack, saT[...], preferred_element_type=jnp.float32)
    sa = jax.nn.sigmoid(logit)                           # [ho, wo]
    y_img = y_img * sa[:, :, None]

    # ---- identity path (+ fused stride-2 downsample), residual, ReLU -----
    if len(prm) == 11:
        dw, db = prm[9], prm[10]
        x_ds = jnp.dot(sel_ref[...], x_flat,
                       preferred_element_type=jnp.float32)   # [hw, cin], exact
        ident = (jnp.dot(x_ds.astype(jnp.bfloat16), dw[...],
                         preferred_element_type=jnp.float32) + db[...])
        ident = ident.reshape(ho, wo, planes)
    else:
        ident = x_img
    return jnp.maximum(y_img + ident, 0.0)               # [ho, wo, planes] f32


def _layer4_kernel(x_ref, sel_ref, *refs):
    out_ref = refs[-1]
    prm = refs[:-1]
    p0, p1, p2 = prm[0:11], prm[11:20], prm[20:29]
    y = _bottleneck_body(x_ref[...], p0, stride=2, sel_ref=sel_ref)
    y = _bottleneck_body(y, p1, stride=1)
    y = _bottleneck_body(y, p2, stride=1)
    out_ref[...] = y


# ---------------------------------------------------------------------------
# Wrapper: one pallas_call for the whole Layer4, grid over the batch.
# ---------------------------------------------------------------------------
def _full_spec(a):
    nd = a.ndim
    return pl.BlockSpec(a.shape, lambda n, _nd=nd: (0,) * _nd)


def layer4_forward(x, params):
    """x: [N, H, W, inplanes] (NHWC).  Returns [N, H//2, W//2, outplanes]."""
    N, H, W, cin = x.shape
    p0, p1, p2 = params
    planes = p0["w3"].shape[-1]
    ho, wo = H // 2, W // 2

    # 0/1 selection matrix picking even (row, col) positions of the HxW grid.
    idx = jnp.arange(ho * wo)
    src = (2 * (idx // wo)) * W + 2 * (idx % wo)
    sel = (src[:, None] == jnp.arange(H * W)[None, :]).astype(jnp.float32)

    flat = ([p0[k] for k in _PARAM_KEYS_DS]
            + [p1[k] for k in _PARAM_KEYS]
            + [p2[k] for k in _PARAM_KEYS])

    return pl.pallas_call(
        _layer4_kernel,
        out_shape=jax.ShapeDtypeStruct((N, ho, wo, planes), jnp.float32),
        grid=(N,),
        in_specs=[pl.BlockSpec((None, H, W, cin), lambda n: (n, 0, 0, 0)),
                  _full_spec(sel)] + [_full_spec(a) for a in flat],
        out_specs=pl.BlockSpec((None, ho, wo, planes), lambda n: (n, 0, 0, 0)),
        compiler_params=pltpu.CompilerParams(
            dimension_semantics=("parallel",)),   # N = 2 keeps both v7x TCs busy
    )(x, sel, *flat)


# ---------------------------------------------------------------------------
# Parameter init (BN folded into eval-mode scale/shift; scales folded into the
# bf16 conv weights; the 7x7 spatial-attention conv folded into a matmul).
# ---------------------------------------------------------------------------
def _init_bn(key, c):
    k1, k2, k3, k4 = jax.random.split(key, 4)
    gamma = 1.0 + 0.1 * jax.random.normal(k1, (c,), jnp.float32)
    beta = 0.1 * jax.random.normal(k2, (c,), jnp.float32)
    mean = 0.1 * jax.random.normal(k3, (c,), jnp.float32)
    var = 0.5 + 0.1 * jnp.abs(jax.random.normal(k4, (c,), jnp.float32))
    scale = gamma / jnp.sqrt(var + 1e-5)
    shift = beta - mean * scale
    return scale, shift


def _sa_matmul_matrix(w_sa, wo):
    """Fold the 7x7 SpatialAttention conv ([mean, max] input channels) and its
    column zero-padding into a [14*wo, wo] matmul matrix."""
    wm, wx = w_sa[0], w_sa[1]                     # each [7, 7]
    c = jnp.arange(wo)[:, None]
    j = jnp.arange(wo)[None, :]
    b = c - j + 3                                 # kernel column index
    valid = (b >= 0) & (b <= 6)
    bc = jnp.clip(b, 0, 6)
    tm = jnp.where(valid[None, :, :], wm[:, bc], 0.0)   # [7, wo, wo]
    tx = jnp.where(valid[None, :, :], wx[:, bc], 0.0)
    return jnp.concatenate([tm.reshape(7 * wo, wo),
                            tx.reshape(7 * wo, wo)], axis=0)   # [14*wo, wo]


def init_bottleneck(key, inplanes, planes, has_downsample, out_hw):
    width = planes                      # int(planes * 64/64) * 1
    hidden = max(planes // 8, 1)        # ChannelAttention ratio = 8
    keys = jax.random.split(key, 11)
    s1, b1 = _init_bn(keys[1], width)
    s2, b2 = _init_bn(keys[3], width)
    s3, b3 = _init_bn(keys[5], planes)
    w1 = 0.1 * jax.random.normal(keys[0], (inplanes, width), jnp.float32)
    w2 = 0.1 * jax.random.normal(keys[2], (3, 3, width, width), jnp.float32)  # HWIO
    w3 = 0.1 * jax.random.normal(keys[4], (width, planes), jnp.float32)
    p = {
        "w1": (w1 * s1[None, :]).astype(jnp.bfloat16),
        "b1": b1.reshape(1, width),
        "w2": (w2 * s2[None, None, None, :]).reshape(3, 3 * width, width
                                                     ).astype(jnp.bfloat16),
        "b2": b2.reshape(1, width),
        "w3": (w3 * s3[None, :]).astype(jnp.bfloat16),
        "b3": b3.reshape(1, planes),
        "caw1": (0.1 * jax.random.normal(keys[6], (planes, hidden), jnp.float32)
                 ).astype(jnp.bfloat16),
        "caw2": (0.1 * jax.random.normal(keys[7], (hidden, planes), jnp.float32)
                 ).astype(jnp.bfloat16),
        "saT": _sa_matmul_matrix(
            0.1 * jax.random.normal(keys[8], (2, 7, 7), jnp.float32), out_hw),
    }
    if has_downsample:
        dw = 0.1 * jax.random.normal(keys[9], (inplanes, planes), jnp.float32)
        dsc, db = _init_bn(keys[10], planes)
        p["dw"] = (dw * dsc[None, :]).astype(jnp.bfloat16)
        p["db"] = db.reshape(1, planes)
    return p


# ---------------------------------------------------------------------------
if __name__ == "__main__":
    INPLANES, OUTPLANES = 8, 16
    N, H, W = 2, 16, 16

    root = jax.random.PRNGKey(0)
    kx, k0, k1, k2 = jax.random.split(root, 4)

    # NHWC input (PyTorch NCHW [N, C, H, W] -> [N, H, W, C])
    x = jax.random.normal(kx, (N, H, W, INPLANES), jnp.float32)

    out_hw = W // 2   # spatial size at which CBAM spatial attention operates
    params = (
        init_bottleneck(k0, INPLANES, OUTPLANES, True, out_hw),
        init_bottleneck(k1, OUTPLANES, OUTPLANES, False, out_hw),
        init_bottleneck(k2, OUTPLANES, OUTPLANES, False, out_hw),
    )

    fwd = jax.jit(layer4_forward)
    y = fwd(x, params)
    jax.block_until_ready(y)

    assert y.shape == (N, H // 2, W // 2, OUTPLANES), y.shape
    assert bool(jnp.all(jnp.isfinite(y)))
    print("KERNEL_OK")
</pallas_src>

<mosaic_0001>
module attributes {stable_mosaic.version = 11 : i64} {
  func.func @_layer4_kernel(%arg0: i32, %arg1: memref<1x16x16x8xf32, #tpu.memory_space<vmem>>, %arg2: memref<64x256xf32, #tpu.memory_space<vmem>>, %arg3: memref<8x16xbf16, #tpu.memory_space<vmem>>, %arg4: memref<1x16xf32, #tpu.memory_space<vmem>>, %arg5: memref<3x48x16xbf16, #tpu.memory_space<vmem>>, %arg6: memref<1x16xf32, #tpu.memory_space<vmem>>, %arg7: memref<16x16xbf16, #tpu.memory_space<vmem>>, %arg8: memref<1x16xf32, #tpu.memory_space<vmem>>, %arg9: memref<16x2xbf16, #tpu.memory_space<vmem>>, %arg10: memref<2x16xbf16, #tpu.memory_space<vmem>>, %arg11: memref<112x8xf32, #tpu.memory_space<vmem>>, %arg12: memref<8x16xbf16, #tpu.memory_space<vmem>>, %arg13: memref<1x16xf32, #tpu.memory_space<vmem>>, %arg14: memref<16x16xbf16, #tpu.memory_space<vmem>>, %arg15: memref<1x16xf32, #tpu.memory_space<vmem>>, %arg16: memref<3x48x16xbf16, #tpu.memory_space<vmem>>, %arg17: memref<1x16xf32, #tpu.memory_space<vmem>>, %arg18: memref<16x16xbf16, #tpu.memory_space<vmem>>, %arg19: memref<1x16xf32, #tpu.memory_space<vmem>>, %arg20: memref<16x2xbf16, #tpu.memory_space<vmem>>, %arg21: memref<2x16xbf16, #tpu.memory_space<vmem>>, %arg22: memref<112x8xf32, #tpu.memory_space<vmem>>, %arg23: memref<16x16xbf16, #tpu.memory_space<vmem>>, %arg24: memref<1x16xf32, #tpu.memory_space<vmem>>, %arg25: memref<3x48x16xbf16, #tpu.memory_space<vmem>>, %arg26: memref<1x16xf32, #tpu.memory_space<vmem>>, %arg27: memref<16x16xbf16, #tpu.memory_space<vmem>>, %arg28: memref<1x16xf32, #tpu.memory_space<vmem>>, %arg29: memref<16x2xbf16, #tpu.memory_space<vmem>>, %arg30: memref<2x16xbf16, #tpu.memory_space<vmem>>, %arg31: memref<112x8xf32, #tpu.memory_space<vmem>>, %arg32: memref<1x8x8x16xf32, #tpu.memory_space<vmem>>) attributes {dimension_semantics = [#tpu.dimension_semantics<parallel>], iteration_bounds = array<i64: 2>, scalar_prefetch = 0 : i64, scratch_operands = 0 : i64, tpu.core_type = #tpu.core_type<tc>, window_params = [{transform_indices = @transform_0, window_bounds = array<i64: 1, 16, 16, 8>}, {pipeline_mode = #tpu.pipeline_mode<synchronous>, transform_indices = @transform_1, window_bounds = array<i64: 64, 256>}, {pipeline_mode = #tpu.pipeline_mode<synchronous>, transform_indices = @transform_2, window_bounds = array<i64: 8, 16>}, {pipeline_mode = #tpu.pipeline_mode<synchronous>, transform_indices = @transform_3, window_bounds = array<i64: 1, 16>}, {pipeline_mode = #tpu.pipeline_mode<synchronous>, transform_indices = @transform_4, window_bounds = array<i64: 3, 48, 16>}, {pipeline_mode = #tpu.pipeline_mode<synchronous>, transform_indices = @transform_5, window_bounds = array<i64: 1, 16>}, {pipeline_mode = #tpu.pipeline_mode<synchronous>, transform_indices = @transform_6, window_bounds = array<i64: 16, 16>}, {pipeline_mode = #tpu.pipeline_mode<synchronous>, transform_indices = @transform_7, window_bounds = array<i64: 1, 16>}, {pipeline_mode = #tpu.pipeline_mode<synchronous>, transform_indices = @transform_8, window_bounds = array<i64: 16, 2>}, {pipeline_mode = #tpu.pipeline_mode<synchronous>, transform_indices = @transform_9, window_bounds = array<i64: 2, 16>}, {pipeline_mode = #tpu.pipeline_mode<synchronous>, transform_indices = @transform_10, window_bounds = array<i64: 112, 8>}, {pipeline_mode = #tpu.pipeline_mode<synchronous>, transform_indices = @transform_11, window_bounds = array<i64: 8, 16>}, {pipeline_mode = #tpu.pipeline_mode<synchronous>, transform_indices = @transform_12, window_bounds = array<i64: 1, 16>}, {pipeline_mode = #tpu.pipeline_mode<synchronous>, transform_indices = @transform_13, window_bounds = array<i64: 16, 16>}, {pipeline_mode = #tpu.pipeline_mode<synchronous>, transform_indices = @transform_14, window_bounds = array<i64: 1, 16>}, {pipeline_mode = #tpu.pipeline_mode<synchronous>, transform_indices = @transform_15, window_bounds = array<i64: 3, 48, 16>}, {pipeline_mode = #tpu.pipeline_mode<synchronous>, transform_indices = @transform_16, window_bounds = array<i64: 1, 16>}, {pipeline_mode = #tpu.pipeline_mode<synchronous>, transform_indices = @transform_17, window_bounds = array<i64: 16, 16>}, {pipeline_mode = #tpu.pipeline_mode<synchronous>, transform_indices = @transform_18, window_bounds = array<i64: 1, 16>}, {pipeline_mode = #tpu.pipeline_mode<synchronous>, transform_indices = @transform_19, window_bounds = array<i64: 16, 2>}, {pipeline_mode = #tpu.pipeline_mode<synchronous>, transform_indices = @transform_20, window_bounds = array<i64: 2, 16>}, {pipeline_mode = #tpu.pipeline_mode<synchronous>, transform_indices = @transform_21, window_bounds = array<i64: 112, 8>}, {pipeline_mode = #tpu.pipeline_mode<synchronous>, transform_indices = @transform_22, window_bounds = array<i64: 16, 16>}, {pipeline_mode = #tpu.pipeline_mode<synchronous>, transform_indices = @transform_23, window_bounds = array<i64: 1, 16>}, {pipeline_mode = #tpu.pipeline_mode<synchronous>, transform_indices = @transform_24, window_bounds = array<i64: 3, 48, 16>}, {pipeline_mode = #tpu.pipeline_mode<synchronous>, transform_indices = @transform_25, window_bounds = array<i64: 1, 16>}, {pipeline_mode = #tpu.pipeline_mode<synchronous>, transform_indices = @transform_26, window_bounds = array<i64: 16, 16>}, {pipeline_mode = #tpu.pipeline_mode<synchronous>, transform_indices = @transform_27, window_bounds = array<i64: 1, 16>}, {pipeline_mode = #tpu.pipeline_mode<synchronous>, transform_indices = @transform_28, window_bounds = array<i64: 16, 2>}, {pipeline_mode = #tpu.pipeline_mode<synchronous>, transform_indices = @transform_29, window_bounds = array<i64: 2, 16>}, {pipeline_mode = #tpu.pipeline_mode<synchronous>, transform_indices = @transform_30, window_bounds = array<i64: 112, 8>}, {transform_indices = @transform_31, window_bounds = array<i64: 1, 8, 8, 16>}]} {
    %c0 = arith.constant 0 : index
    %c0_0 = arith.constant 0 : index
    %c0_1 = arith.constant 0 : index
    %c0_2 = arith.constant 0 : index
    %0 = vector.load %arg1[%c0, %c0_0, %c0_1, %c0_2] : memref<1x16x16x8xf32, #tpu.memory_space<vmem>>, vector<1x16x16x8xf32>
    %1 = vector.shape_cast %0 : vector<1x16x16x8xf32> to vector<16x16x8xf32>
    %2 = vector.shape_cast %1 : vector<16x16x8xf32> to vector<256x8xf32>
    %3 = arith.truncf %2 : vector<256x8xf32> to vector<256x8xbf16>
    %c0_3 = arith.constant 0 : index
    %c0_4 = arith.constant 0 : index
    %4 = vector.load %arg3[%c0_3, %c0_4] : memref<8x16xbf16, #tpu.memory_space<vmem>>, vector<8x16xbf16>
    %cst = arith.constant dense<0.000000e+00> : vector<256x16xf32>
    %5 = tpu.matmul %3, %4, %cst {dimension_numbers = #tpu.dot_dimension_numbers<[1], [0], [0], [1], [0, 0, 1, 1], [], []>} : vector<256x8xbf16>, vector<8x16xbf16>, vector<256x16xf32> -> vector<256x16xf32>
    %c0_5 = arith.constant 0 : index
    %c0_6 = arith.constant 0 : index
    %6 = vector.load %arg4[%c0_5, %c0_6] : memref<1x16xf32, #tpu.memory_space<vmem>>, vector<1x16xf32>
    %7 = vector.broadcast %6 : vector<1x16xf32> to vector<256x16xf32>
    %8 = arith.addf %5, %7 : vector<256x16xf32>
    %cst_7 = arith.constant 0.000000e+00 : f32
    %9 = vector.broadcast %cst_7 : f32 to vector<256x16xf32>
    %10 = arith.maximumf %8, %9 : vector<256x16xf32>
    %11 = arith.truncf %10 : vector<256x16xf32> to vector<256x16xbf16>
    %12 = vector.shape_cast %11 : vector<256x16xbf16> to vector<16x16x16xbf16>
    %cst_8 = arith.constant 0.000000e+00 : bf16
    %13 = vector.broadcast %cst_8 : bf16 to vector<1x16x16xbf16>
    %14 = tpu.concatenate %13, %12, %13 in 0 : vector<1x16x16xbf16>, vector<16x16x16xbf16>, vector<1x16x16xbf16> -> vector<18x16x16xbf16>
    %cst_9 = arith.constant 0.000000e+00 : bf16
    %15 = vector.broadcast %cst_9 : bf16 to vector<18x1x16xbf16>
    %16 = tpu.concatenate %15, %14, %15 in 1 : vector<18x1x16xbf16>, vector<18x16x16xbf16>, vector<18x1x16xbf16> -> vector<18x18x16xbf16>
    %cst_10 = arith.constant 0.000000e+00 : f32
    %17 = vector.broadcast %cst_10 : f32 to vector<256x16xf32>
    %18 = vector.extract_strided_slice %16 {offsets = [0, 0, 0], sizes = [16, 18, 16], strides = [1, 1, 1]} : vector<18x18x16xbf16> to vector<16x18x16xbf16>
    %19 = vector.extract_strided_slice %18 {offsets = [0, 0, 0], sizes = [16, 16, 16], strides = [1, 1, 1]} : vector<16x18x16xbf16> to vector<16x16x16xbf16>
    %20 = vector.extract_strided_slice %18 {offsets = [0, 1, 0], sizes = [16, 16, 16], strides = [1, 1, 1]} : vector<16x18x16xbf16> to vector<16x16x16xbf16>
    %21 = vector.extract_strided_slice %18 {offsets = [0, 2, 0], sizes = [16, 16, 16], strides = [1, 1, 1]} : vector<16x18x16xbf16> to vector<16x16x16xbf16>
    %22 = tpu.concatenate %19, %20, %21 in 2 : vector<16x16x16xbf16>, vector<16x16x16xbf16>, vector<16x16x16xbf16> -> vector<16x16x48xbf16>
    %23 = vector.shape_cast %22 : vector<16x16x48xbf16> to vector<256x48xbf16>
    %c0_11 = arith.constant 0 : index
    %c0_12 = arith.constant 0 : index
    %c0_13 = arith.constant 0 : index
    %24 = vector.load %arg5[%c0_11, %c0_12, %c0_13] : memref<3x48x16xbf16, #tpu.memory_space<vmem>>, vector<1x48x16xbf16>
    %25 = vector.shape_cast %24 : vector<1x48x16xbf16> to vector<48x16xbf16>
    %cst_14 = arith.constant dense<0.000000e+00> : vector<256x16xf32>
    %26 = tpu.matmul %23, %25, %cst_14 {dimension_numbers = #tpu.dot_dimension_numbers<[1], [0], [0], [1], [0, 0, 1, 1], [], []>} : vector<256x48xbf16>, vector<48x16xbf16>, vector<256x16xf32> -> vector<256x16xf32>
    %27 = arith.addf %17, %26 : vector<256x16xf32>
    %28 = vector.extract_strided_slice %16 {offsets = [1, 0, 0], sizes = [16, 18, 16], strides = [1, 1, 1]} : vector<18x18x16xbf16> to vector<16x18x16xbf16>
    %29 = vector.extract_strided_slice %28 {offsets = [0, 0, 0], sizes = [16, 16, 16], strides = [1, 1, 1]} : vector<16x18x16xbf16> to vector<16x16x16xbf16>
    %30 = vector.extract_strided_slice %28 {offsets = [0, 1, 0], sizes = [16, 16, 16], strides = [1, 1, 1]} : vector<16x18x16xbf16> to vector<16x16x16xbf16>
    %31 = vector.extract_strided_slice %28 {offsets = [0, 2, 0], sizes = [16, 16, 16], strides = [1, 1, 1]} : vector<16x18x16xbf16> to vector<16x16x16xbf16>
    %32 = tpu.concatenate %29, %30, %31 in 2 : vector<16x16x16xbf16>, vector<16x16x16xbf16>, vector<16x16x16xbf16> -> vector<16x16x48xbf16>
    %33 = vector.shape_cast %32 : vector<16x16x48xbf16> to vector<256x48xbf16>
    %c1 = arith.constant 1 : index
    %c0_15 = arith.constant 0 : index
    %c0_16 = arith.constant 0 : index
    %34 = vector.load %arg5[%c1, %c0_15, %c0_16] : memref<3x48x16xbf16, #tpu.memory_space<vmem>>, vector<1x48x16xbf16>
    %35 = vector.shape_cast %34 : vector<1x48x16xbf16> to vector<48x16xbf16>
    %cst_17 = arith.constant dense<0.000000e+00> : vector<256x16xf32>
    %36 = tpu.matmul %33, %35, %cst_17 {dimension_numbers = #tpu.dot_dimension_numbers<[1], [0], [0], [1], [0, 0, 1, 1], [], []>} : vector<256x48xbf16>, vector<48x16xbf16>, vector<256x16xf32> -> vector<256x16xf32>
    %37 = arith.addf %27, %36 : vector<256x16xf32>
    %38 = vector.extract_strided_slice %16 {offsets = [2, 0, 0], sizes = [16, 18, 16], strides = [1, 1, 1]} : vector<18x18x16xbf16> to vector<16x18x16xbf16>
    %39 = vector.extract_strided_slice %38 {offsets = [0, 0, 0], sizes = [16, 16, 16], strides = [1, 1, 1]} : vector<16x18x16xbf16> to vector<16x16x16xbf16>
    %40 = vector.extract_strided_slice %38 {offsets = [0, 1, 0], sizes = [16, 16, 16], strides = [1, 1, 1]} : vector<16x18x16xbf16> to vector<16x16x16xbf16>
    %41 = vector.extract_strided_slice %38 {offsets = [0, 2, 0], sizes = [16, 16, 16], strides = [1, 1, 1]} : vector<16x18x16xbf16> to vector<16x16x16xbf16>
    %42 = tpu.concatenate %39, %40, %41 in 2 : vector<16x16x16xbf16>, vector<16x16x16xbf16>, vector<16x16x16xbf16> -> vector<16x16x48xbf16>
    %43 = vector.shape_cast %42 : vector<16x16x48xbf16> to vector<256x48xbf16>
    %c2 = arith.constant 2 : index
    %c0_18 = arith.constant 0 : index
    %c0_19 = arith.constant 0 : index
    %44 = vector.load %arg5[%c2, %c0_18, %c0_19] : memref<3x48x16xbf16, #tpu.memory_space<vmem>>, vector<1x48x16xbf16>
    %45 = vector.shape_cast %44 : vector<1x48x16xbf16> to vector<48x16xbf16>
    %cst_20 = arith.constant dense<0.000000e+00> : vector<256x16xf32>
    %46 = tpu.matmul %43, %45, %cst_20 {dimension_numbers = #tpu.dot_dimension_numbers<[1], [0], [0], [1], [0, 0, 1, 1], [], []>} : vector<256x48xbf16>, vector<48x16xbf16>, vector<256x16xf32> -> vector<256x16xf32>
    %47 = arith.addf %37, %46 : vector<256x16xf32>
    %c0_21 = arith.constant 0 : index
    %c0_22 = arith.constant 0 : index
    %48 = vector.load %arg6[%c0_21, %c0_22] : memref<1x16xf32, #tpu.memory_space<vmem>>, vector<1x16xf32>
    %49 = vector.broadcast %48 : vector<1x16xf32> to vector<256x16xf32>
    %50 = arith.addf %47, %49 : vector<256x16xf32>
    %cst_23 = arith.constant 0.000000e+00 : f32
    %51 = vector.broadcast %cst_23 : f32 to vector<256x16xf32>
    %52 = arith.maximumf %50, %51 : vector<256x16xf32>
    %c0_24 = arith.constant 0 : index
    %c0_25 = arith.constant 0 : index
    %53 = vector.load %arg2[%c0_24, %c0_25] : memref<64x256xf32, #tpu.memory_space<vmem>>, vector<64x256xf32>
    %cst_26 = arith.constant dense<0.000000e+00> : vector<64x16xf32>
    %54 = tpu.matmul %53, %52, %cst_26 {dimension_numbers = #tpu.dot_dimension_numbers<[1], [0], [0], [1], [0, 0, 1, 1], [], []>} : vector<64x256xf32>, vector<256x16xf32>, vector<64x16xf32> -> vector<64x16xf32>
    %55 = arith.truncf %54 : vector<64x16xf32> to vector<64x16xbf16>
    %c0_27 = arith.constant 0 : index
    %c0_28 = arith.constant 0 : index
    %56 = vector.load %arg7[%c0_27, %c0_28] : memref<16x16xbf16, #tpu.memory_space<vmem>>, vector<16x16xbf16>
    %cst_29 = arith.constant dense<0.000000e+00> : vector<64x16xf32>
    %57 = tpu.matmul %55, %56, %cst_29 {dimension_numbers = #tpu.dot_dimension_numbers<[1], [0], [0], [1], [0, 0, 1, 1], [], []>} : vector<64x16xbf16>, vector<16x16xbf16>, vector<64x16xf32> -> vector<64x16xf32>
    %c0_30 = arith.constant 0 : index
    %c0_31 = arith.constant 0 : index
    %58 = vector.load %arg8[%c0_30, %c0_31] : memref<1x16xf32, #tpu.memory_space<vmem>>, vector<1x16xf32>
    %59 = vector.broadcast %58 : vector<1x16xf32> to vector<64x16xf32>
    %60 = arith.addf %57, %59 : vector<64x16xf32>
    %cst_32 = arith.constant dense<0.000000e+00> : vector<16xf32>
    %61 = vector.multi_reduction <add>, %60, %cst_32 [0] : vector<64x16xf32> to vector<16xf32>
    %62 = vector.shape_cast %61 : vector<16xf32> to vector<1x16xf32>
    %cst_33 = arith.constant 6.400000e+01 : f32
    %63 = vector.broadcast %cst_33 : f32 to vector<1x16xf32>
    %64 = arith.divf %62, %63 : vector<1x16xf32>
    %cst_34 = arith.constant dense<0xFF800000> : vector<16xf32>
    %65 = vector.multi_reduction <maximumf>, %60, %cst_34 [0] : vector<64x16xf32> to vector<16xf32>
    %66 = vector.shape_cast %65 : vector<16xf32> to vector<1x16xf32>
    %67 = arith.truncf %64 : vector<1x16xf32> to vector<1x16xbf16>
    %c0_35 = arith.constant 0 : index
    %c0_36 = arith.constant 0 : index
    %68 = vector.load %arg9[%c0_35, %c0_36] : memref<16x2xbf16, #tpu.memory_space<vmem>>, vector<16x2xbf16>
    %cst_37 = arith.constant dense<0.000000e+00> : vector<1x2xf32>
    %69 = tpu.matmul %67, %68, %cst_37 {dimension_numbers = #tpu.dot_dimension_numbers<[1], [0], [0], [1], [0, 0, 1, 1], [], []>} : vector<1x16xbf16>, vector<16x2xbf16>, vector<1x2xf32> -> vector<1x2xf32>
    %cst_38 = arith.constant 0.000000e+00 : f32
    %70 = vector.broadcast %cst_38 : f32 to vector<1x2xf32>
    %71 = arith.maximumf %69, %70 : vector<1x2xf32>
    %72 = arith.truncf %71 : vector<1x2xf32> to vector<1x2xbf16>
    %c0_39 = arith.constant 0 : index
    %c0_40 = arith.constant 0 : index
    %73 = vector.load %arg10[%c0_39, %c0_40] : memref<2x16xbf16, #tpu.memory_space<vmem>>, vector<2x16xbf16>
    %cst_41 = arith.constant dense<0.000000e+00> : vector<1x16xf32>
    %74 = tpu.matmul %72, %73, %cst_41 {dimension_numbers = #tpu.dot_dimension_numbers<[1], [0], [0], [1], [0, 0, 1, 1], [], []>} : vector<1x2xbf16>, vector<2x16xbf16>, vector<1x16xf32> -> vector<1x16xf32>
    %75 = arith.truncf %66 : vector<1x16xf32> to vector<1x16xbf16>
    %c0_42 = arith.constant 0 : index
    %c0_43 = arith.constant 0 : index
    %76 = vector.load %arg9[%c0_42, %c0_43] : memref<16x2xbf16, #tpu.memory_space<vmem>>, vector<16x2xbf16>
    %cst_44 = arith.constant dense<0.000000e+00> : vector<1x2xf32>
    %77 = tpu.matmul %75, %76, %cst_44 {dimension_numbers = #tpu.dot_dimension_numbers<[1], [0], [0], [1], [0, 0, 1, 1], [], []>} : vector<1x16xbf16>, vector<16x2xbf16>, vector<1x2xf32> -> vector<1x2xf32>
    %cst_45 = arith.constant 0.000000e+00 : f32
    %78 = vector.broadcast %cst_45 : f32 to vector<1x2xf32>
    %79 = arith.maximumf %77, %78 : vector<1x2xf32>
    %80 = arith.truncf %79 : vector<1x2xf32> to vector<1x2xbf16>
    %c0_46 = arith.constant 0 : index
    %c0_47 = arith.constant 0 : index
    %81 = vector.load %arg10[%c0_46, %c0_47] : memref<2x16xbf16, #tpu.memory_space<vmem>>, vector<2x16xbf16>
    %cst_48 = arith.constant dense<0.000000e+00> : vector<1x16xf32>
    %82 = tpu.matmul %80, %81, %cst_48 {dimension_numbers = #tpu.dot_dimension_numbers<[1], [0], [0], [1], [0, 0, 1, 1], [], []>} : vector<1x2xbf16>, vector<2x16xbf16>, vector<1x16xf32> -> vector<1x16xf32>
    %83 = arith.addf %74, %82 : vector<1x16xf32>
    %84 = arith.negf %83 : vector<1x16xf32>
    %85 = math.exp %84 : vector<1x16xf32>
    %cst_49 = arith.constant 1.000000e+00 : f32
    %86 = vector.broadcast %cst_49 : f32 to vector<1x16xf32>
    %87 = arith.addf %86, %85 : vector<1x16xf32>
    %88 = arith.divf %86, %87 : vector<1x16xf32>
    %89 = vector.broadcast %88 : vector<1x16xf32> to vector<64x16xf32>
    %90 = arith.mulf %60, %89 : vector<64x16xf32>
    %91 = vector.shape_cast %90 : vector<64x16xf32> to vector<8x8x16xf32>
    %cst_50 = arith.constant dense<0.000000e+00> : vector<8x8xf32>
    %92 = vector.multi_reduction <add>, %91, %cst_50 [2] : vector<8x8x16xf32> to vector<8x8xf32>
    %cst_51 = arith.constant 1.600000e+01 : f32
    %93 = vector.broadcast %cst_51 : f32 to vector<8x8xf32>
    %94 = arith.divf %92, %93 : vector<8x8xf32>
    %cst_52 = arith.constant dense<0xFF800000> : vector<8x8xf32>
    %95 = vector.multi_reduction <maximumf>, %91, %cst_52 [2] : vector<8x8x16xf32> to vector<8x8xf32>
    %cst_53 = arith.constant 0.000000e+00 : f32
    %96 = vector.broadcast %cst_53 : f32 to vector<3x8xf32>
    %97 = tpu.concatenate %96, %94, %96 in 0 : vector<3x8xf32>, vector<8x8xf32>, vector<3x8xf32> -> vector<14x8xf32>
    %98 = tpu.concatenate %96, %95, %96 in 0 : vector<3x8xf32>, vector<8x8xf32>, vector<3x8xf32> -> vector<14x8xf32>
    %99 = vector.extract_strided_slice %97 {offsets = [0, 0], sizes = [8, 8], strides = [1, 1]} : vector<14x8xf32> to vector<8x8xf32>
    %100 = vector.extract_strided_slice %97 {offsets = [1, 0], sizes = [8, 8], strides = [1, 1]} : vector<14x8xf32> to vector<8x8xf32>
    %101 = vector.extract_strided_slice %97 {offsets = [2, 0], sizes = [8, 8], strides = [1, 1]} : vector<14x8xf32> to vector<8x8xf32>
    %102 = vector.extract_strided_slice %97 {offsets = [3, 0], sizes = [8, 8], strides = [1, 1]} : vector<14x8xf32> to vector<8x8xf32>
    %103 = vector.extract_strided_slice %97 {offsets = [4, 0], sizes = [8, 8], strides = [1, 1]} : vector<14x8xf32> to vector<8x8xf32>
    %104 = vector.extract_strided_slice %97 {offsets = [5, 0], sizes = [8, 8], strides = [1, 1]} : vector<14x8xf32> to vector<8x8xf32>
    %105 = vector.extract_strided_slice %97 {offsets = [6, 0], sizes = [8, 8], strides = [1, 1]} : vector<14x8xf32> to vector<8x8xf32>
    %106 = vector.extract_strided_slice %98 {offsets = [0, 0], sizes = [8, 8], strides = [1, 1]} : vector<14x8xf32> to vector<8x8xf32>
    %107 = vector.extract_strided_slice %98 {offsets = [1, 0], sizes = [8, 8], strides = [1, 1]} : vector<14x8xf32> to vector<8x8xf32>
    %108 = vector.extract_strided_slice %98 {offsets = [2, 0], sizes = [8, 8], strides = [1, 1]} : vector<14x8xf32> to vector<8x8xf32>
    %109 = vector.extract_strided_slice %98 {offsets = [3, 0], sizes = [8, 8], strides = [1, 1]} : vector<14x8xf32> to vector<8x8xf32>
    %110 = vector.extract_strided_slice %98 {offsets = [4, 0], sizes = [8, 8], strides = [1, 1]} : vector<14x8xf32> to vector<8x8xf32>
    %111 = vector.extract_strided_slice %98 {offsets = [5, 0], sizes = [8, 8], strides = [1, 1]} : vector<14x8xf32> to vector<8x8xf32>
    %112 = vector.extract_strided_slice %98 {offsets = [6, 0], sizes = [8, 8], strides = [1, 1]} : vector<14x8xf32> to vector<8x8xf32>
    %113 = tpu.concatenate %99, %100, %101, %102, %103, %104, %105, %106, %107, %108, %109, %110, %111, %112 in 1 : vector<8x8xf32>, vector<8x8xf32>, vector<8x8xf32>, vector<8x8xf32>, vector<8x8xf32>, vector<8x8xf32>, vector<8x8xf32>, vector<8x8xf32>, vector<8x8xf32>, vector<8x8xf32>, vector<8x8xf32>, vector<8x8xf32>, vector<8x8xf32>, vector<8x8xf32> -> vector<8x112xf32>
    %c0_54 = arith.constant 0 : index
    %c0_55 = arith.constant 0 : index
    %114 = vector.load %arg11[%c0_54, %c0_55] : memref<112x8xf32, #tpu.memory_space<vmem>>, vector<112x8xf32>
    %cst_56 = arith.constant dense<0.000000e+00> : vector<8x8xf32>
    %115 = tpu.matmul %113, %114, %cst_56 {dimension_numbers = #tpu.dot_dimension_numbers<[1], [0], [0], [1], [0, 0, 1, 1], [], []>} : vector<8x112xf32>, vector<112x8xf32>, vector<8x8xf32> -> vector<8x8xf32>
    %116 = arith.negf %115 : vector<8x8xf32>
    %117 = math.exp %116 : vector<8x8xf32>
    %cst_57 = arith.constant 1.000000e+00 : f32
    %118 = vector.broadcast %cst_57 : f32 to vector<8x8xf32>
    %119 = arith.addf %118, %117 : vector<8x8xf32>
    %120 = arith.divf %118, %119 : vector<8x8xf32>
    %121 = vector.shape_cast %120 : vector<8x8xf32> to vector<8x8x1xf32>
    %122 = vector.broadcast %121 : vector<8x8x1xf32> to vector<8x8x16xf32>
    %123 = arith.mulf %91, %122 : vector<8x8x16xf32>
    %c0_58 = arith.constant 0 : index
    %c0_59 = arith.constant 0 : index
    %124 = vector.load %arg2[%c0_58, %c0_59] : memref<64x256xf32, #tpu.memory_space<vmem>>, vector<64x256xf32>
    %cst_60 = arith.constant dense<0.000000e+00> : vector<64x8xf32>
    %125 = tpu.matmul %124, %2, %cst_60 {dimension_numbers = #tpu.dot_dimension_numbers<[1], [0], [0], [1], [0, 0, 1, 1], [], []>} : vector<64x256xf32>, vector<256x8xf32>, vector<64x8xf32> -> vector<64x8xf32>
    %126 = arith.truncf %125 : vector<64x8xf32> to vector<64x8xbf16>
    %c0_61 = arith.constant 0 : index
    %c0_62 = arith.constant 0 : index
    %127 = vector.load %arg12[%c0_61, %c0_62] : memref<8x16xbf16, #tpu.memory_space<vmem>>, vector<8x16xbf16>
    %cst_63 = arith.constant dense<0.000000e+00> : vector<64x16xf32>
    %128 = tpu.matmul %126, %127, %cst_63 {dimension_numbers = #tpu.dot_dimension_numbers<[1], [0], [0], [1], [0, 0, 1, 1], [], []>} : vector<64x8xbf16>, vector<8x16xbf16>, vector<64x16xf32> -> vector<64x16xf32>
    %c0_64 = arith.constant 0 : index
    %c0_65 = arith.constant 0 : index
    %129 = vector.load %arg13[%c0_64, %c0_65] : memref<1x16xf32, #tpu.memory_space<vmem>>, vector<1x16xf32>
    %130 = vector.broadcast %129 : vector<1x16xf32> to vector<64x16xf32>
    %131 = arith.addf %128, %130 : vector<64x16xf32>
    %132 = vector.shape_cast %131 : vector<64x16xf32> to vector<8x8x16xf32>
    %133 = arith.addf %123, %132 : vector<8x8x16xf32>
    %cst_66 = arith.constant 0.000000e+00 : f32
    %134 = vector.broadcast %cst_66 : f32 to vector<8x8x16xf32>
    %135 = arith.maximumf %133, %134 : vector<8x8x16xf32>
    %136 = vector.shape_cast %135 : vector<8x8x16xf32> to vector<64x16xf32>
    %137 = arith.truncf %136 : vector<64x16xf32> to vector<64x16xbf16>
    %c0_67 = arith.constant 0 : index
    %c0_68 = arith.constant 0 : index
    %138 = vector.load %arg14[%c0_67, %c0_68] : memref<16x16xbf16, #tpu.memory_space<vmem>>, vector<16x16xbf16>
    %cst_69 = arith.constant dense<0.000000e+00> : vector<64x16xf32>
    %139 = tpu.matmul %137, %138, %cst_69 {dimension_numbers = #tpu.dot_dimension_numbers<[1], [0], [0], [1], [0, 0, 1, 1], [], []>} : vector<64x16xbf16>, vector<16x16xbf16>, vector<64x16xf32> -> vector<64x16xf32>
    %c0_70 = arith.constant 0 : index
    %c0_71 = arith.constant 0 : index
    %140 = vector.load %arg15[%c0_70, %c0_71] : memref<1x16xf32, #tpu.memory_space<vmem>>, vector<1x16xf32>
    %141 = vector.broadcast %140 : vector<1x16xf32> to vector<64x16xf32>
    %142 = arith.addf %139, %141 : vector<64x16xf32>
    %cst_72 = arith.constant 0.000000e+00 : f32
    %143 = vector.broadcast %cst_72 : f32 to vector<64x16xf32>
    %144 = arith.maximumf %142, %143 : vector<64x16xf32>
    %145 = arith.truncf %144 : vector<64x16xf32> to vector<64x16xbf16>
    %146 = vector.shape_cast %145 : vector<64x16xbf16> to vector<8x8x16xbf16>
    %cst_73 = arith.constant 0.000000e+00 : bf16
    %147 = vector.broadcast %cst_73 : bf16 to vector<1x8x16xbf16>
    %148 = tpu.concatenate %147, %146, %147 in 0 : vector<1x8x16xbf16>, vector<8x8x16xbf16>, vector<1x8x16xbf16> -> vector<10x8x16xbf16>
    %cst_74 = arith.constant 0.000000e+00 : bf16
    %149 = vector.broadcast %cst_74 : bf16 to vector<10x1x16xbf16>
    %150 = tpu.concatenate %149, %148, %149 in 1 : vector<10x1x16xbf16>, vector<10x8x16xbf16>, vector<10x1x16xbf16> -> vector<10x10x16xbf16>
    %cst_75 = arith.constant 0.000000e+00 : f32
    %151 = vector.broadcast %cst_75 : f32 to vector<64x16xf32>
    %152 = vector.extract_strided_slice %150 {offsets = [0, 0, 0], sizes = [8, 10, 16], strides = [1, 1, 1]} : vector<10x10x16xbf16> to vector<8x10x16xbf16>
    %153 = vector.extract_strided_slice %152 {offsets = [0, 0, 0], sizes = [8, 8, 16], strides = [1, 1, 1]} : vector<8x10x16xbf16> to vector<8x8x16xbf16>
    %154 = vector.extract_strided_slice %152 {offsets = [0, 1, 0], sizes = [8, 8, 16], strides = [1, 1, 1]} : vector<8x10x16xbf16> to vector<8x8x16xbf16>
    %155 = vector.extract_strided_slice %152 {offsets = [0, 2, 0], sizes = [8, 8, 16], strides = [1, 1, 1]} : vector<8x10x16xbf16> to vector<8x8x16xbf16>
    %156 = tpu.concatenate %153, %154, %155 in 2 : vector<8x8x16xbf16>, vector<8x8x16xbf16>, vector<8x8x16xbf16> -> vector<8x8x48xbf16>
    %157 = vector.shape_cast %156 : vector<8x8x48xbf16> to vector<64x48xbf16>
    %c0_76 = arith.constant 0 : index
    %c0_77 = arith.constant 0 : index
    %c0_78 = arith.constant 0 : index
    %158 = vector.load %arg16[%c0_76, %c0_77, %c0_78] : memref<3x48x16xbf16, #tpu.memory_space<vmem>>, vector<1x48x16xbf16>
    %159 = vector.shape_cast %158 : vector<1x48x16xbf16> to vector<48x16xbf16>
    %cst_79 = arith.constant dense<0.000000e+00> : vector<64x16xf32>
    %160 = tpu.matmul %157, %159, %cst_79 {dimension_numbers = #tpu.dot_dimension_numbers<[1], [0], [0], [1], [0, 0, 1, 1], [], []>} : vector<64x48xbf16>, vector<48x16xbf16>, vector<64x16xf32> -> vector<64x16xf32>
    %161 = arith.addf %151, %160 : vector<64x16xf32>
    %162 = vector.extract_strided_slice %150 {offsets = [1, 0, 0], sizes = [8, 10, 16], strides = [1, 1, 1]} : vector<10x10x16xbf16> to vector<8x10x16xbf16>
    %163 = vector.extract_strided_slice %162 {offsets = [0, 0, 0], sizes = [8, 8, 16], strides = [1, 1, 1]} : vector<8x10x16xbf16> to vector<8x8x16xbf16>
    %164 = vector.extract_strided_slice %162 {offsets = [0, 1, 0], sizes = [8, 8, 16], strides = [1, 1, 1]} : vector<8x10x16xbf16> to vector<8x8x16xbf16>
    %165 = vector.extract_strided_slice %162 {offsets = [0, 2, 0], sizes = [8, 8, 16], strides = [1, 1, 1]} : vector<8x10x16xbf16> to vector<8x8x16xbf16>
    %166 = tpu.concatenate %163, %164, %165 in 2 : vector<8x8x16xbf16>, vector<8x8x16xbf16>, vector<8x8x16xbf16> -> vector<8x8x48xbf16>
    %167 = vector.shape_cast %166 : vector<8x8x48xbf16> to vector<64x48xbf16>
    %c1_80 = arith.constant 1 : index
    %c0_81 = arith.constant 0 : index
    %c0_82 = arith.constant 0 : index
    %168 = vector.load %arg16[%c1_80, %c0_81, %c0_82] : memref<3x48x16xbf16, #tpu.memory_space<vmem>>, vector<1x48x16xbf16>
    %169 = vector.shape_cast %168 : vector<1x48x16xbf16> to vector<48x16xbf16>
    %cst_83 = arith.constant dense<0.000000e+00> : vector<64x16xf32>
    %170 = tpu.matmul %167, %169, %cst_83 {dimension_numbers = #tpu.dot_dimension_numbers<[1], [0], [0], [1], [0, 0, 1, 1], [], []>} : vector<64x48xbf16>, vector<48x16xbf16>, vector<64x16xf32> -> vector<64x16xf32>
    %171 = arith.addf %161, %170 : vector<64x16xf32>
    %172 = vector.extract_strided_slice %150 {offsets = [2, 0, 0], sizes = [8, 10, 16], strides = [1, 1, 1]} : vector<10x10x16xbf16> to vector<8x10x16xbf16>
    %173 = vector.extract_strided_slice %172 {offsets = [0, 0, 0], sizes = [8, 8, 16], strides = [1, 1, 1]} : vector<8x10x16xbf16> to vector<8x8x16xbf16>
    %174 = vector.extract_strided_slice %172 {offsets = [0, 1, 0], sizes = [8, 8, 16], strides = [1, 1, 1]} : vector<8x10x16xbf16> to vector<8x8x16xbf16>
    %175 = vector.extract_strided_slice %172 {offsets = [0, 2, 0], sizes = [8, 8, 16], strides = [1, 1, 1]} : vector<8x10x16xbf16> to vector<8x8x16xbf16>
    %176 = tpu.concatenate %173, %174, %175 in 2 : vector<8x8x16xbf16>, vector<8x8x16xbf16>, vector<8x8x16xbf16> -> vector<8x8x48xbf16>
    %177 = vector.shape_cast %176 : vector<8x8x48xbf16> to vector<64x48xbf16>
    %c2_84 = arith.constant 2 : index
    %c0_85 = arith.constant 0 : index
    %c0_86 = arith.constant 0 : index
    %178 = vector.load %arg16[%c2_84, %c0_85, %c0_86] : memref<3x48x16xbf16, #tpu.memory_space<vmem>>, vector<1x48x16xbf16>
    %179 = vector.shape_cast %178 : vector<1x48x16xbf16> to vector<48x16xbf16>
    %cst_87 = arith.constant dense<0.000000e+00> : vector<64x16xf32>
    %180 = tpu.matmul %177, %179, %cst_87 {dimension_numbers = #tpu.dot_dimension_numbers<[1], [0], [0], [1], [0, 0, 1, 1], [], []>} : vector<64x48xbf16>, vector<48x16xbf16>, vector<64x16xf32> -> vector<64x16xf32>
    %181 = arith.addf %171, %180 : vector<64x16xf32>
    %c0_88 = arith.constant 0 : index
    %c0_89 = arith.constant 0 : index
    %182 = vector.load %arg17[%c0_88, %c0_89] : memref<1x16xf32, #tpu.memory_space<vmem>>, vector<1x16xf32>
    %183 = vector.broadcast %182 : vector<1x16xf32> to vector<64x16xf32>
    %184 = arith.addf %181, %183 : vector<64x16xf32>
    %cst_90 = arith.constant 0.000000e+00 : f32
    %185 = vector.broadcast %cst_90 : f32 to vector<64x16xf32>
    %186 = arith.maximumf %184, %185 : vector<64x16xf32>
    %187 = arith.truncf %186 : vector<64x16xf32> to vector<64x16xbf16>
    %c0_91 = arith.constant 0 : index
    %c0_92 = arith.constant 0 : index
    %188 = vector.load %arg18[%c0_91, %c0_92] : memref<16x16xbf16, #tpu.memory_space<vmem>>, vector<16x16xbf16>
    %cst_93 = arith.constant dense<0.000000e+00> : vector<64x16xf32>
    %189 = tpu.matmul %187, %188, %cst_93 {dimension_numbers = #tpu.dot_dimension_numbers<[1], [0], [0], [1], [0, 0, 1, 1], [], []>} : vector<64x16xbf16>, vector<16x16xbf16>, vector<64x16xf32> -> vector<64x16xf32>
    %c0_94 = arith.constant 0 : index
    %c0_95 = arith.constant 0 : index
    %190 = vector.load %arg19[%c0_94, %c0_95] : memref<1x16xf32, #tpu.memory_space<vmem>>, vector<1x16xf32>
    %191 = vector.broadcast %190 : vector<1x16xf32> to vector<64x16xf32>
    %192 = arith.addf %189, %191 : vector<64x16xf32>
    %cst_96 = arith.constant dense<0.000000e+00> : vector<16xf32>
    %193 = vector.multi_reduction <add>, %192, %cst_96 [0] : vector<64x16xf32> to vector<16xf32>
    %194 = vector.shape_cast %193 : vector<16xf32> to vector<1x16xf32>
    %cst_97 = arith.constant 6.400000e+01 : f32
    %195 = vector.broadcast %cst_97 : f32 to vector<1x16xf32>
    %196 = arith.divf %194, %195 : vector<1x16xf32>
    %cst_98 = arith.constant dense<0xFF800000> : vector<16xf32>
    %197 = vector.multi_reduction <maximumf>, %192, %cst_98 [0] : vector<64x16xf32> to vector<16xf32>
    %198 = vector.shape_cast %197 : vector<16xf32> to vector<1x16xf32>
    %199 = arith.truncf %196 : vector<1x16xf32> to vector<1x16xbf16>
    %c0_99 = arith.constant 0 : index
    %c0_100 = arith.constant 0 : index
    %200 = vector.load %arg20[%c0_99, %c0_100] : memref<16x2xbf16, #tpu.memory_space<vmem>>, vector<16x2xbf16>
    %cst_101 = arith.constant dense<0.000000e+00> : vector<1x2xf32>
    %201 = tpu.matmul %199, %200, %cst_101 {dimension_numbers = #tpu.dot_dimension_numbers<[1], [0], [0], [1], [0, 0, 1, 1], [], []>} : vector<1x16xbf16>, vector<16x2xbf16>, vector<1x2xf32> -> vector<1x2xf32>
    %cst_102 = arith.constant 0.000000e+00 : f32
    %202 = vector.broadcast %cst_102 : f32 to vector<1x2xf32>
    %203 = arith.maximumf %201, %202 : vector<1x2xf32>
    %204 = arith.truncf %203 : vector<1x2xf32> to vector<1x2xbf16>
    %c0_103 = arith.constant 0 : index
    %c0_104 = arith.constant 0 : index
    %205 = vector.load %arg21[%c0_103, %c0_104] : memref<2x16xbf16, #tpu.memory_space<vmem>>, vector<2x16xbf16>
    %cst_105 = arith.constant dense<0.000000e+00> : vector<1x16xf32>
    %206 = tpu.matmul %204, %205, %cst_105 {dimension_numbers = #tpu.dot_dimension_numbers<[1], [0], [0], [1], [0, 0, 1, 1], [], []>} : vector<1x2xbf16>, vector<2x16xbf16>, vector<1x16xf32> -> vector<1x16xf32>
    %207 = arith.truncf %198 : vector<1x16xf32> to vector<1x16xbf16>
    %c0_106 = arith.constant 0 : index
    %c0_107 = arith.constant 0 : index
    %208 = vector.load %arg20[%c0_106, %c0_107] : memref<16x2xbf16, #tpu.memory_space<vmem>>, vector<16x2xbf16>
    %cst_108 = arith.constant dense<0.000000e+00> : vector<1x2xf32>
    %209 = tpu.matmul %207, %208, %cst_108 {dimension_numbers = #tpu.dot_dimension_numbers<[1], [0], [0], [1], [0, 0, 1, 1], [], []>} : vector<1x16xbf16>, vector<16x2xbf16>, vector<1x2xf32> -> vector<1x2xf32>
    %cst_109 = arith.constant 0.000000e+00 : f32
    %210 = vector.broadcast %cst_109 : f32 to vector<1x2xf32>
    %211 = arith.maximumf %209, %210 : vector<1x2xf32>
    %212 = arith.truncf %211 : vector<1x2xf32> to vector<1x2xbf16>
    %c0_110 = arith.constant 0 : index
    %c0_111 = arith.constant 0 : index
    %213 = vector.load %arg21[%c0_110, %c0_111] : memref<2x16xbf16, #tpu.memory_space<vmem>>, vector<2x16xbf16>
    %cst_112 = arith.constant dense<0.000000e+00> : vector<1x16xf32>
    %214 = tpu.matmul %212, %213, %cst_112 {dimension_numbers = #tpu.dot_dimension_numbers<[1], [0], [0], [1], [0, 0, 1, 1], [], []>} : vector<1x2xbf16>, vector<2x16xbf16>, vector<1x16xf32> -> vector<1x16xf32>
    %215 = arith.addf %206, %214 : vector<1x16xf32>
    %216 = arith.negf %215 : vector<1x16xf32>
    %217 = math.exp %216 : vector<1x16xf32>
    %cst_113 = arith.constant 1.000000e+00 : f32
    %218 = vector.broadcast %cst_113 : f32 to vector<1x16xf32>
    %219 = arith.addf %218, %217 : vector<1x16xf32>
    %220 = arith.divf %218, %219 : vector<1x16xf32>
    %221 = vector.broadcast %220 : vector<1x16xf32> to vector<64x16xf32>
    %222 = arith.mulf %192, %221 : vector<64x16xf32>
    %223 = vector.shape_cast %222 : vector<64x16xf32> to vector<8x8x16xf32>
    %cst_114 = arith.constant dense<0.000000e+00> : vector<8x8xf32>
    %224 = vector.multi_reduction <add>, %223, %cst_114 [2] : vector<8x8x16xf32> to vector<8x8xf32>
    %cst_115 = arith.constant 1.600000e+01 : f32
    %225 = vector.broadcast %cst_115 : f32 to vector<8x8xf32>
    %226 = arith.divf %224, %225 : vector<8x8xf32>
    %cst_116 = arith.constant dense<0xFF800000> : vector<8x8xf32>
    %227 = vector.multi_reduction <maximumf>, %223, %cst_116 [2] : vector<8x8x16xf32> to vector<8x8xf32>
    %cst_117 = arith.constant 0.000000e+00 : f32
    %228 = vector.broadcast %cst_117 : f32 to vector<3x8xf32>
    %229 = tpu.concatenate %228, %226, %228 in 0 : vector<3x8xf32>, vector<8x8xf32>, vector<3x8xf32> -> vector<14x8xf32>
    %230 = tpu.concatenate %228, %227, %228 in 0 : vector<3x8xf32>, vector<8x8xf32>, vector<3x8xf32> -> vector<14x8xf32>
    %231 = vector.extract_strided_slice %229 {offsets = [0, 0], sizes = [8, 8], strides = [1, 1]} : vector<14x8xf32> to vector<8x8xf32>
    %232 = vector.extract_strided_slice %229 {offsets = [1, 0], sizes = [8, 8], strides = [1, 1]} : vector<14x8xf32> to vector<8x8xf32>
    %233 = vector.extract_strided_slice %229 {offsets = [2, 0], sizes = [8, 8], strides = [1, 1]} : vector<14x8xf32> to vector<8x8xf32>
    %234 = vector.extract_strided_slice %229 {offsets = [3, 0], sizes = [8, 8], strides = [1, 1]} : vector<14x8xf32> to vector<8x8xf32>
    %235 = vector.extract_strided_slice %229 {offsets = [4, 0], sizes = [8, 8], strides = [1, 1]} : vector<14x8xf32> to vector<8x8xf32>
    %236 = vector.extract_strided_slice %229 {offsets = [5, 0], sizes = [8, 8], strides = [1, 1]} : vector<14x8xf32> to vector<8x8xf32>
    %237 = vector.extract_strided_slice %229 {offsets = [6, 0], sizes = [8, 8], strides = [1, 1]} : vector<14x8xf32> to vector<8x8xf32>
    %238 = vector.extract_strided_slice %230 {offsets = [0, 0], sizes = [8, 8], strides = [1, 1]} : vector<14x8xf32> to vector<8x8xf32>
    %239 = vector.extract_strided_slice %230 {offsets = [1, 0], sizes = [8, 8], strides = [1, 1]} : vector<14x8xf32> to vector<8x8xf32>
    %240 = vector.extract_strided_slice %230 {offsets = [2, 0], sizes = [8, 8], strides = [1, 1]} : vector<14x8xf32> to vector<8x8xf32>
    %241 = vector.extract_strided_slice %230 {offsets = [3, 0], sizes = [8, 8], strides = [1, 1]} : vector<14x8xf32> to vector<8x8xf32>
    %242 = vector.extract_strided_slice %230 {offsets = [4, 0], sizes = [8, 8], strides = [1, 1]} : vector<14x8xf32> to vector<8x8xf32>
    %243 = vector.extract_strided_slice %230 {offsets = [5, 0], sizes = [8, 8], strides = [1, 1]} : vector<14x8xf32> to vector<8x8xf32>
    %244 = vector.extract_strided_slice %230 {offsets = [6, 0], sizes = [8, 8], strides = [1, 1]} : vector<14x8xf32> to vector<8x8xf32>
    %245 = tpu.concatenate %231, %232, %233, %234, %235, %236, %237, %238, %239, %240, %241, %242, %243, %244 in 1 : vector<8x8xf32>, vector<8x8xf32>, vector<8x8xf32>, vector<8x8xf32>, vector<8x8xf32>, vector<8x8xf32>, vector<8x8xf32>, vector<8x8xf32>, vector<8x8xf32>, vector<8x8xf32>, vector<8x8xf32>, vector<8x8xf32>, vector<8x8xf32>, vector<8x8xf32> -> vector<8x112xf32>
    %c0_118 = arith.constant 0 : index
    %c0_119 = arith.constant 0 : index
    %246 = vector.load %arg22[%c0_118, %c0_119] : memref<112x8xf32, #tpu.memory_space<vmem>>, vector<112x8xf32>
    %cst_120 = arith.constant dense<0.000000e+00> : vector<8x8xf32>
    %247 = tpu.matmul %245, %246, %cst_120 {dimension_numbers = #tpu.dot_dimension_numbers<[1], [0], [0], [1], [0, 0, 1, 1], [], []>} : vector<8x112xf32>, vector<112x8xf32>, vector<8x8xf32> -> vector<8x8xf32>
    %248 = arith.negf %247 : vector<8x8xf32>
    %249 = math.exp %248 : vector<8x8xf32>
    %cst_121 = arith.constant 1.000000e+00 : f32
    %250 = vector.broadcast %cst_121 : f32 to vector<8x8xf32>
    %251 = arith.addf %250, %249 : vector<8x8xf32>
    %252 = arith.divf %250, %251 : vector<8x8xf32>
    %253 = vector.shape_cast %252 : vector<8x8xf32> to vector<8x8x1xf32>
    %254 = vector.broadcast %253 : vector<8x8x1xf32> to vector<8x8x16xf32>
    %255 = arith.mulf %223, %254 : vector<8x8x16xf32>
    %256 = arith.addf %255, %135 : vector<8x8x16xf32>
    %cst_122 = arith.constant 0.000000e+00 : f32
    %257 = vector.broadcast %cst_122 : f32 to vector<8x8x16xf32>
    %258 = arith.maximumf %256, %257 : vector<8x8x16xf32>
    %259 = vector.shape_cast %258 : vector<8x8x16xf32> to vector<64x16xf32>
    %260 = arith.truncf %259 : vector<64x16xf32> to vector<64x16xbf16>
    %c0_123 = arith.constant 0 : index
    %c0_124 = arith.constant 0 : index
    %261 = vector.load %arg23[%c0_123, %c0_124] : memref<16x16xbf16, #tpu.memory_space<vmem>>, vector<16x16xbf16>
    %cst_125 = arith.constant dense<0.000000e+00> : vector<64x16xf32>
    %262 = tpu.matmul %260, %261, %cst_125 {dimension_numbers = #tpu.dot_dimension_numbers<[1], [0], [0], [1], [0, 0, 1, 1], [], []>} : vector<64x16xbf16>, vector<16x16xbf16>, vector<64x16xf32> -> vector<64x16xf32>
    %c0_126 = arith.constant 0 : index
    %c0_127 = arith.constant 0 : index
    %263 = vector.load %arg24[%c0_126, %c0_127] : memref<1x16xf32, #tpu.memory_space<vmem>>, vector<1x16xf32>
    %264 = vector.broadcast %263 : vector<1x16xf32> to vector<64x16xf32>
    %265 = arith.addf %262, %264 : vector<64x16xf32>
    %cst_128 = arith.constant 0.000000e+00 : f32
    %266 = vector.broadcast %cst_128 : f32 to vector<64x16xf32>
    %267 = arith.maximumf %265, %266 : vector<64x16xf32>
    %268 = arith.truncf %267 : vector<64x16xf32> to vector<64x16xbf16>
    %269 = vector.shape_cast %268 : vector<64x16xbf16> to vector<8x8x16xbf16>
    %cst_129 = arith.constant 0.000000e+00 : bf16
    %270 = vector.broadcast %cst_129 : bf16 to vector<1x8x16xbf16>
    %271 = tpu.concatenate %270, %269, %270 in 0 : vector<1x8x16xbf16>, vector<8x8x16xbf16>, vector<1x8x16xbf16> -> vector<10x8x16xbf16>
    %cst_130 = arith.constant 0.000000e+00 : bf16
    %272 = vector.broadcast %cst_130 : bf16 to vector<10x1x16xbf16>
    %273 = tpu.concatenate %272, %271, %272 in 1 : vector<10x1x16xbf16>, vector<10x8x16xbf16>, vector<10x1x16xbf16> -> vector<10x10x16xbf16>
    %cst_131 = arith.constant 0.000000e+00 : f32
    %274 = vector.broadcast %cst_131 : f32 to vector<64x16xf32>
    %275 = vector.extract_strided_slice %273 {offsets = [0, 0, 0], sizes = [8, 10, 16], strides = [1, 1, 1]} : vector<10x10x16xbf16> to vector<8x10x16xbf16>
    %276 = vector.extract_strided_slice %275 {offsets = [0, 0, 0], sizes = [8, 8, 16], strides = [1, 1, 1]} : vector<8x10x16xbf16> to vector<8x8x16xbf16>
    %277 = vector.extract_strided_slice %275 {offsets = [0, 1, 0], sizes = [8, 8, 16], strides = [1, 1, 1]} : vector<8x10x16xbf16> to vector<8x8x16xbf16>
    %278 = vector.extract_strided_slice %275 {offsets = [0, 2, 0], sizes = [8, 8, 16], strides = [1, 1, 1]} : vector<8x10x16xbf16> to vector<8x8x16xbf16>
    %279 = tpu.concatenate %276, %277, %278 in 2 : vector<8x8x16xbf16>, vector<8x8x16xbf16>, vector<8x8x16xbf16> -> vector<8x8x48xbf16>
    %280 = vector.shape_cast %279 : vector<8x8x48xbf16> to vector<64x48xbf16>
    %c0_132 = arith.constant 0 : index
    %c0_133 = arith.constant 0 : index
    %c0_134 = arith.constant 0 : index
    %281 = vector.load %arg25[%c0_132, %c0_133, %c0_134] : memref<3x48x16xbf16, #tpu.memory_space<vmem>>, vector<1x48x16xbf16>
    %282 = vector.shape_cast %281 : vector<1x48x16xbf16> to vector<48x16xbf16>
    %cst_135 = arith.constant dense<0.000000e+00> : vector<64x16xf32>
    %283 = tpu.matmul %280, %282, %cst_135 {dimension_numbers = #tpu.dot_dimension_numbers<[1], [0], [0], [1], [0, 0, 1, 1], [], []>} : vector<64x48xbf16>, vector<48x16xbf16>, vector<64x16xf32> -> vector<64x16xf32>
    %284 = arith.addf %274, %283 : vector<64x16xf32>
    %285 = vector.extract_strided_slice %273 {offsets = [1, 0, 0], sizes = [8, 10, 16], strides = [1, 1, 1]} : vector<10x10x16xbf16> to vector<8x10x16xbf16>
    %286 = vector.extract_strided_slice %285 {offsets = [0, 0, 0], sizes = [8, 8, 16], strides = [1, 1, 1]} : vector<8x10x16xbf16> to vector<8x8x16xbf16>
    %287 = vector.extract_strided_slice %285 {offsets = [0, 1, 0], sizes = [8, 8, 16], strides = [1, 1, 1]} : vector<8x10x16xbf16> to vector<8x8x16xbf16>
    %288 = vector.extract_strided_slice %285 {offsets = [0, 2, 0], sizes = [8, 8, 16], strides = [1, 1, 1]} : vector<8x10x16xbf16> to vector<8x8x16xbf16>
    %289 = tpu.concatenate %286, %287, %288 in 2 : vector<8x8x16xbf16>, vector<8x8x16xbf16>, vector<8x8x16xbf16> -> vector<8x8x48xbf16>
    %290 = vector.shape_cast %289 : vector<8x8x48xbf16> to vector<64x48xbf16>
    %c1_136 = arith.constant 1 : index
    %c0_137 = arith.constant 0 : index
    %c0_138 = arith.constant 0 : index
    %291 = vector.load %arg25[%c1_136, %c0_137, %c0_138] : memref<3x48x16xbf16, #tpu.memory_space<vmem>>, vector<1x48x16xbf16>
    %292 = vector.shape_cast %291 : vector<1x48x16xbf16> to vector<48x16xbf16>
    %cst_139 = arith.constant dense<0.000000e+00> : vector<64x16xf32>
    %293 = tpu.matmul %290, %292, %cst_139 {dimension_numbers = #tpu.dot_dimension_numbers<[1], [0], [0], [1], [0, 0, 1, 1], [], []>} : vector<64x48xbf16>, vector<48x16xbf16>, vector<64x16xf32> -> vector<64x16xf32>
    %294 = arith.addf %284, %293 : vector<64x16xf32>
    %295 = vector.extract_strided_slice %273 {offsets = [2, 0, 0], sizes = [8, 10, 16], strides = [1, 1, 1]} : vector<10x10x16xbf16> to vector<8x10x16xbf16>
    %296 = vector.extract_strided_slice %295 {offsets = [0, 0, 0], sizes = [8, 8, 16], strides = [1, 1, 1]} : vector<8x10x16xbf16> to vector<8x8x16xbf16>
    %297 = vector.extract_strided_slice %295 {offsets = [0, 1, 0], sizes = [8, 8, 16], strides = [1, 1, 1]} : vector<8x10x16xbf16> to vector<8x8x16xbf16>
    %298 = vector.extract_strided_slice %295 {offsets = [0, 2, 0], sizes = [8, 8, 16], strides = [1, 1, 1]} : vector<8x10x16xbf16> to vector<8x8x16xbf16>
    %299 = tpu.concatenate %296, %297, %298 in 2 : vector<8x8x16xbf16>, vector<8x8x16xbf16>, vector<8x8x16xbf16> -> vector<8x8x48xbf16>
    %300 = vector.shape_cast %299 : vector<8x8x48xbf16> to vector<64x48xbf16>
    %c2_140 = arith.constant 2 : index
    %c0_141 = arith.constant 0 : index
    %c0_142 = arith.constant 0 : index
    %301 = vector.load %arg25[%c2_140, %c0_141, %c0_142] : memref<3x48x16xbf16, #tpu.memory_space<vmem>>, vector<1x48x16xbf16>
    %302 = vector.shape_cast %301 : vector<1x48x16xbf16> to vector<48x16xbf16>
    %cst_143 = arith.constant dense<0.000000e+00> : vector<64x16xf32>
    %303 = tpu.matmul %300, %302, %cst_143 {dimension_numbers = #tpu.dot_dimension_numbers<[1], [0], [0], [1], [0, 0, 1, 1], [], []>} : vector<64x48xbf16>, vector<48x16xbf16>, vector<64x16xf32> -> vector<64x16xf32>
    %304 = arith.addf %294, %303 : vector<64x16xf32>
    %c0_144 = arith.constant 0 : index
    %c0_145 = arith.constant 0 : index
    %305 = vector.load %arg26[%c0_144, %c0_145] : memref<1x16xf32, #tpu.memory_space<vmem>>, vector<1x16xf32>
    %306 = vector.broadcast %305 : vector<1x16xf32> to vector<64x16xf32>
    %307 = arith.addf %304, %306 : vector<64x16xf32>
    %cst_146 = arith.constant 0.000000e+00 : f32
    %308 = vector.broadcast %cst_146 : f32 to vector<64x16xf32>
    %309 = arith.maximumf %307, %308 : vector<64x16xf32>
    %310 = arith.truncf %309 : vector<64x16xf32> to vector<64x16xbf16>
    %c0_147 = arith.constant 0 : index
    %c0_148 = arith.constant 0 : index
    %311 = vector.load %arg27[%c0_147, %c0_148] : memref<16x16xbf16, #tpu.memory_space<vmem>>, vector<16x16xbf16>
    %cst_149 = arith.constant dense<0.000000e+00> : vector<64x16xf32>
    %312 = tpu.matmul %310, %311, %cst_149 {dimension_numbers = #tpu.dot_dimension_numbers<[1], [0], [0], [1], [0, 0, 1, 1], [], []>} : vector<64x16xbf16>, vector<16x16xbf16>, vector<64x16xf32> -> vector<64x16xf32>
    %c0_150 = arith.constant 0 : index
    %c0_151 = arith.constant 0 : index
    %313 = vector.load %arg28[%c0_150, %c0_151] : memref<1x16xf32, #tpu.memory_space<vmem>>, vector<1x16xf32>
    %314 = vector.broadcast %313 : vector<1x16xf32> to vector<64x16xf32>
    %315 = arith.addf %312, %314 : vector<64x16xf32>
    %cst_152 = arith.constant dense<0.000000e+00> : vector<16xf32>
    %316 = vector.multi_reduction <add>, %315, %cst_152 [0] : vector<64x16xf32> to vector<16xf32>
    %317 = vector.shape_cast %316 : vector<16xf32> to vector<1x16xf32>
    %cst_153 = arith.constant 6.400000e+01 : f32
    %318 = vector.broadcast %cst_153 : f32 to vector<1x16xf32>
    %319 = arith.divf %317, %318 : vector<1x16xf32>
    %cst_154 = arith.constant dense<0xFF800000> : vector<16xf32>
    %320 = vector.multi_reduction <maximumf>, %315, %cst_154 [0] : vector<64x16xf32> to vector<16xf32>
    %321 = vector.shape_cast %320 : vector<16xf32> to vector<1x16xf32>
    %322 = arith.truncf %319 : vector<1x16xf32> to vector<1x16xbf16>
    %c0_155 = arith.constant 0 : index
    %c0_156 = arith.constant 0 : index
    %323 = vector.load %arg29[%c0_155, %c0_156] : memref<16x2xbf16, #tpu.memory_space<vmem>>, vector<16x2xbf16>
    %cst_157 = arith.constant dense<0.000000e+00> : vector<1x2xf32>
    %324 = tpu.matmul %322, %323, %cst_157 {dimension_numbers = #tpu.dot_dimension_numbers<[1], [0], [0], [1], [0, 0, 1, 1], [], []>} : vector<1x16xbf16>, vector<16x2xbf16>, vector<1x2xf32> -> vector<1x2xf32>
    %cst_158 = arith.constant 0.000000e+00 : f32
    %325 = vector.broadcast %cst_158 : f32 to vector<1x2xf32>
    %326 = arith.maximumf %324, %325 : vector<1x2xf32>
    %327 = arith.truncf %326 : vector<1x2xf32> to vector<1x2xbf16>
    %c0_159 = arith.constant 0 : index
    %c0_160 = arith.constant 0 : index
    %328 = vector.load %arg30[%c0_159, %c0_160] : memref<2x16xbf16, #tpu.memory_space<vmem>>, vector<2x16xbf16>
    %cst_161 = arith.constant dense<0.000000e+00> : vector<1x16xf32>
    %329 = tpu.matmul %327, %328, %cst_161 {dimension_numbers = #tpu.dot_dimension_numbers<[1], [0], [0], [1], [0, 0, 1, 1], [], []>} : vector<1x2xbf16>, vector<2x16xbf16>, vector<1x16xf32> -> vector<1x16xf32>
    %330 = arith.truncf %321 : vector<1x16xf32> to vector<1x16xbf16>
    %c0_162 = arith.constant 0 : index
    %c0_163 = arith.constant 0 : index
    %331 = vector.load %arg29[%c0_162, %c0_163] : memref<16x2xbf16, #tpu.memory_space<vmem>>, vector<16x2xbf16>
    %cst_164 = arith.constant dense<0.000000e+00> : vector<1x2xf32>
    %332 = tpu.matmul %330, %331, %cst_164 {dimension_numbers = #tpu.dot_dimension_numbers<[1], [0], [0], [1], [0, 0, 1, 1], [], []>} : vector<1x16xbf16>, vector<16x2xbf16>, vector<1x2xf32> -> vector<1x2xf32>
    %cst_165 = arith.constant 0.000000e+00 : f32
    %333 = vector.broadcast %cst_165 : f32 to vector<1x2xf32>
    %334 = arith.maximumf %332, %333 : vector<1x2xf32>
    %335 = arith.truncf %334 : vector<1x2xf32> to vector<1x2xbf16>
    %c0_166 = arith.constant 0 : index
    %c0_167 = arith.constant 0 : index
    %336 = vector.load %arg30[%c0_166, %c0_167] : memref<2x16xbf16, #tpu.memory_space<vmem>>, vector<2x16xbf16>
    %cst_168 = arith.constant dense<0.000000e+00> : vector<1x16xf32>
    %337 = tpu.matmul %335, %336, %cst_168 {dimension_numbers = #tpu.dot_dimension_numbers<[1], [0], [0], [1], [0, 0, 1, 1], [], []>} : vector<1x2xbf16>, vector<2x16xbf16>, vector<1x16xf32> -> vector<1x16xf32>
    %338 = arith.addf %329, %337 : vector<1x16xf32>
    %339 = arith.negf %338 : vector<1x16xf32>
    %340 = math.exp %339 : vector<1x16xf32>
    %cst_169 = arith.constant 1.000000e+00 : f32
    %341 = vector.broadcast %cst_169 : f32 to vector<1x16xf32>
    %342 = arith.addf %341, %340 : vector<1x16xf32>
    %343 = arith.divf %341, %342 : vector<1x16xf32>
    %344 = vector.broadcast %343 : vector<1x16xf32> to vector<64x16xf32>
    %345 = arith.mulf %315, %344 : vector<64x16xf32>
    %346 = vector.shape_cast %345 : vector<64x16xf32> to vector<8x8x16xf32>
    %cst_170 = arith.constant dense<0.000000e+00> : vector<8x8xf32>
    %347 = vector.multi_reduction <add>, %346, %cst_170 [2] : vector<8x8x16xf32> to vector<8x8xf32>
    %cst_171 = arith.constant 1.600000e+01 : f32
    %348 = vector.broadcast %cst_171 : f32 to vector<8x8xf32>
    %349 = arith.divf %347, %348 : vector<8x8xf32>
    %cst_172 = arith.constant dense<0xFF800000> : vector<8x8xf32>
    %350 = vector.multi_reduction <maximumf>, %346, %cst_172 [2] : vector<8x8x16xf32> to vector<8x8xf32>
    %cst_173 = arith.constant 0.000000e+00 : f32
    %351 = vector.broadcast %cst_173 : f32 to vector<3x8xf32>
    %352 = tpu.concatenate %351, %349, %351 in 0 : vector<3x8xf32>, vector<8x8xf32>, vector<3x8xf32> -> vector<14x8xf32>
    %353 = tpu.concatenate %351, %350, %351 in 0 : vector<3x8xf32>, vector<8x8xf32>, vector<3x8xf32> -> vector<14x8xf32>
    %354 = vector.extract_strided_slice %352 {offsets = [0, 0], sizes = [8, 8], strides = [1, 1]} : vector<14x8xf32> to vector<8x8xf32>
    %355 = vector.extract_strided_slice %352 {offsets = [1, 0], sizes = [8, 8], strides = [1, 1]} : vector<14x8xf32> to vector<8x8xf32>
    %356 = vector.extract_strided_slice %352 {offsets = [2, 0], sizes = [8, 8], strides = [1, 1]} : vector<14x8xf32> to vector<8x8xf32>
    %357 = vector.extract_strided_slice %352 {offsets = [3, 0], sizes = [8, 8], strides = [1, 1]} : vector<14x8xf32> to vector<8x8xf32>
    %358 = vector.extract_strided_slice %352 {offsets = [4, 0], sizes = [8, 8], strides = [1, 1]} : vector<14x8xf32> to vector<8x8xf32>
    %359 = vector.extract_strided_slice %352 {offsets = [5, 0], sizes = [8, 8], strides = [1, 1]} : vector<14x8xf32> to vector<8x8xf32>
    %360 = vector.extract_strided_slice %352 {offsets = [6, 0], sizes = [8, 8], strides = [1, 1]} : vector<14x8xf32> to vector<8x8xf32>
    %361 = vector.extract_strided_slice %353 {offsets = [0, 0], sizes = [8, 8], strides = [1, 1]} : vector<14x8xf32> to vector<8x8xf32>
    %362 = vector.extract_strided_slice %353 {offsets = [1, 0], sizes = [8, 8], strides = [1, 1]} : vector<14x8xf32> to vector<8x8xf32>
    %363 = vector.extract_strided_slice %353 {offsets = [2, 0], sizes = [8, 8], strides = [1, 1]} : vector<14x8xf32> to vector<8x8xf32>
    %364 = vector.extract_strided_slice %353 {offsets = [3, 0], sizes = [8, 8], strides = [1, 1]} : vector<14x8xf32> to vector<8x8xf32>
    %365 = vector.extract_strided_slice %353 {offsets = [4, 0], sizes = [8, 8], strides = [1, 1]} : vector<14x8xf32> to vector<8x8xf32>
    %366 = vector.extract_strided_slice %353 {offsets = [5, 0], sizes = [8, 8], strides = [1, 1]} : vector<14x8xf32> to vector<8x8xf32>
    %367 = vector.extract_strided_slice %353 {offsets = [6, 0], sizes = [8, 8], strides = [1, 1]} : vector<14x8xf32> to vector<8x8xf32>
    %368 = tpu.concatenate %354, %355, %356, %357, %358, %359, %360, %361, %362, %363, %364, %365, %366, %367 in 1 : vector<8x8xf32>, vector<8x8xf32>, vector<8x8xf32>, vector<8x8xf32>, vector<8x8xf32>, vector<8x8xf32>, vector<8x8xf32>, vector<8x8xf32>, vector<8x8xf32>, vector<8x8xf32>, vector<8x8xf32>, vector<8x8xf32>, vector<8x8xf32>, vector<8x8xf32> -> vector<8x112xf32>
    %c0_174 = arith.constant 0 : index
    %c0_175 = arith.constant 0 : index
    %369 = vector.load %arg31[%c0_174, %c0_175] : memref<112x8xf32, #tpu.memory_space<vmem>>, vector<112x8xf32>
    %cst_176 = arith.constant dense<0.000000e+00> : vector<8x8xf32>
    %370 = tpu.matmul %368, %369, %cst_176 {dimension_numbers = #tpu.dot_dimension_numbers<[1], [0], [0], [1], [0, 0, 1, 1], [], []>} : vector<8x112xf32>, vector<112x8xf32>, vector<8x8xf32> -> vector<8x8xf32>
    %371 = arith.negf %370 : vector<8x8xf32>
    %372 = math.exp %371 : vector<8x8xf32>
    %cst_177 = arith.constant 1.000000e+00 : f32
    %373 = vector.broadcast %cst_177 : f32 to vector<8x8xf32>
    %374 = arith.addf %373, %372 : vector<8x8xf32>
    %375 = arith.divf %373, %374 : vector<8x8xf32>
    %376 = vector.shape_cast %375 : vector<8x8xf32> to vector<8x8x1xf32>
    %377 = vector.broadcast %376 : vector<8x8x1xf32> to vector<8x8x16xf32>
    %378 = arith.mulf %346, %377 : vector<8x8x16xf32>
    %379 = arith.addf %378, %258 : vector<8x8x16xf32>
    %cst_178 = arith.constant 0.000000e+00 : f32
    %380 = vector.broadcast %cst_178 : f32 to vector<8x8x16xf32>
    %381 = arith.maximumf %379, %380 : vector<8x8x16xf32>
    %c0_179 = arith.constant 0 : index
    %c0_180 = arith.constant 0 : index
    %c0_181 = arith.constant 0 : index
    %c0_182 = arith.constant 0 : index
    %382 = vector.load %arg32[%c0_179, %c0_180, %c0_181, %c0_182] : memref<1x8x8x16xf32, #tpu.memory_space<vmem>>, vector<1x8x8x16xf32>
    %383 = vector.shape_cast %382 : vector<1x8x8x16xf32> to vector<8x8x16xf32>
    %384 = vector.shape_cast %381 : vector<8x8x16xf32> to vector<1x8x8x16xf32>
    tpu.vector_store %arg32[%c0_179, %c0_180, %c0_181, %c0_182], %384 {strides = array<i32>} : memref<1x8x8x16xf32, #tpu.memory_space<vmem>>, vector<1x8x8x16xf32>,
    return
  }
  func.func @transform_0(%arg0: i32) -> (i32, i32, i32, i32) {
    %c0_i32 = arith.constant 0 : i32
    %c0_i32_0 = arith.constant 0 : i32
    %c0_i32_1 = arith.constant 0 : i32
    %c0_i32_2 = arith.constant 0 : i32
    return %arg0, %c0_i32, %c0_i32_0, %c0_i32_1 : i32, i32, i32, i32
  }
  func.func @transform_1(%arg0: i32) -> (i32, i32) {
    %c0_i32 = arith.constant 0 : i32
    %c0_i32_0 = arith.constant 0 : i32
    %c0_i32_1 = arith.constant 0 : i32
    return %c0_i32, %c0_i32_0 : i32, i32
  }
  func.func @transform_2(%arg0: i32) -> (i32, i32) {
    %c0_i32 = arith.constant 0 : i32
    %c0_i32_0 = arith.constant 0 : i32
    %c0_i32_1 = arith.constant 0 : i32
    return %c0_i32, %c0_i32_0 : i32, i32
  }
  func.func @transform_3(%arg0: i32) -> (i32, i32) {
    %c0_i32 = arith.constant 0 : i32
    %c0_i32_0 = arith.constant 0 : i32
    %c0_i32_1 = arith.constant 0 : i32
    return %c0_i32, %c0_i32_0 : i32, i32
  }
  func.func @transform_4(%arg0: i32) -> (i32, i32, i32) {
    %c0_i32 = arith.constant 0 : i32
    %c0_i32_0 = arith.constant 0 : i32
    %c0_i32_1 = arith.constant 0 : i32
    %c0_i32_2 = arith.constant 0 : i32
    return %c0_i32, %c0_i32_0, %c0_i32_1 : i32, i32, i32
  }
  func.func @transform_5(%arg0: i32) -> (i32, i32) {
    %c0_i32 = arith.constant 0 : i32
    %c0_i32_0 = arith.constant 0 : i32
    %c0_i32_1 = arith.constant 0 : i32
    return %c0_i32, %c0_i32_0 : i32, i32
  }
  func.func @transform_6(%arg0: i32) -> (i32, i32) {
    %c0_i32 = arith.constant 0 : i32
    %c0_i32_0 = arith.constant 0 : i32
    %c0_i32_1 = arith.constant 0 : i32
    return %c0_i32, %c0_i32_0 : i32, i32
  }
  func.func @transform_7(%arg0: i32) -> (i32, i32) {
    %c0_i32 = arith.constant 0 : i32
    %c0_i32_0 = arith.constant 0 : i32
    %c0_i32_1 = arith.constant 0 : i32
    return %c0_i32, %c0_i32_0 : i32, i32
  }
  func.func @transform_8(%arg0: i32) -> (i32, i32) {
    %c0_i32 = arith.constant 0 : i32
    %c0_i32_0 = arith.constant 0 : i32
    %c0_i32_1 = arith.constant 0 : i32
    return %c0_i32, %c0_i32_0 : i32, i32
  }
  func.func @transform_9(%arg0: i32) -> (i32, i32) {
    %c0_i32 = arith.constant 0 : i32
    %c0_i32_0 = arith.constant 0 : i32
    %c0_i32_1 = arith.constant 0 : i32
    return %c0_i32, %c0_i32_0 : i32, i32
  }
  func.func @transform_10(%arg0: i32) -> (i32, i32) {
    %c0_i32 = arith.constant 0 : i32
    %c0_i32_0 = arith.constant 0 : i32
    %c0_i32_1 = arith.constant 0 : i32
    return %c0_i32, %c0_i32_0 : i32, i32
  }
  func.func @transform_11(%arg0: i32) -> (i32, i32) {
    %c0_i32 = arith.constant 0 : i32
    %c0_i32_0 = arith.constant 0 : i32
    %c0_i32_1 = arith.constant 0 : i32
    return %c0_i32, %c0_i32_0 : i32, i32
  }
  func.func @transform_12(%arg0: i32) -> (i32, i32) {
    %c0_i32 = arith.constant 0 : i32
    %c0_i32_0 = arith.constant 0 : i32
    %c0_i32_1 = arith.constant 0 : i32
    return %c0_i32, %c0_i32_0 : i32, i32
  }
  func.func @transform_13(%arg0: i32) -> (i32, i32) {
    %c0_i32 = arith.constant 0 : i32
    %c0_i32_0 = arith.constant 0 : i32
    %c0_i32_1 = arith.constant 0 : i32
    return %c0_i32, %c0_i32_0 : i32, i32
  }
  func.func @transform_14(%arg0: i32) -> (i32, i32) {
    %c0_i32 = arith.constant 0 : i32
    %c0_i32_0 = arith.constant 0 : i32
    %c0_i32_1 = arith.constant 0 : i32
    return %c0_i32, %c0_i32_0 : i32, i32
  }
  func.func @transform_15(%arg0: i32) -> (i32, i32, i32) {
    %c0_i32 = arith.constant 0 : i32
    %c0_i32_0 = arith.constant 0 : i32
    %c0_i32_1 = arith.constant 0 : i32
    %c0_i32_2 = arith.constant 0 : i32
    return %c0_i32, %c0_i32_0, %c0_i32_1 : i32, i32, i32
  }
  func.func @transform_16(%arg0: i32) -> (i32, i32) {
    %c0_i32 = arith.constant 0 : i32
    %c0_i32_0 = arith.constant 0 : i32
    %c0_i32_1 = arith.constant 0 : i32
    return %c0_i32, %c0_i32_0 : i32, i32
  }
  func.func @transform_17(%arg0: i32) -> (i32, i32) {
    %c0_i32 = arith.constant 0 : i32
    %c0_i32_0 = arith.constant 0 : i32
    %c0_i32_1 = arith.constant 0 : i32
    return %c0_i32, %c0_i32_0 : i32, i32
  }
  func.func @transform_18(%arg0: i32) -> (i32, i32) {
    %c0_i32 = arith.constant 0 : i32
    %c0_i32_0 = arith.constant 0 : i32
    %c0_i32_1 = arith.constant 0 : i32
    return %c0_i32, %c0_i32_0 : i32, i32
  }
  func.func @transform_19(%arg0: i32) -> (i32, i32) {
    %c0_i32 = arith.constant 0 : i32
    %c0_i32_0 = arith.constant 0 : i32
    %c0_i32_1 = arith.constant 0 : i32
    return %c0_i32, %c0_i32_0 : i32, i32
  }
  func.func @transform_20(%arg0: i32) -> (i32, i32) {
    %c0_i32 = arith.constant 0 : i32
    %c0_i32_0 = arith.constant 0 : i32
    %c0_i32_1 = arith.constant 0 : i32
    return %c0_i32, %c0_i32_0 : i32, i32
  }
  func.func @transform_21(%arg0: i32) -> (i32, i32) {
    %c0_i32 = arith.constant 0 : i32
    %c0_i32_0 = arith.constant 0 : i32
    %c0_i32_1 = arith.constant 0 : i32
    return %c0_i32, %c0_i32_0 : i32, i32
  }
  func.func @transform_22(%arg0: i32) -> (i32, i32) {
    %c0_i32 = arith.constant 0 : i32
    %c0_i32_0 = arith.constant 0 : i32
    %c0_i32_1 = arith.constant 0 : i32
    return %c0_i32, %c0_i32_0 : i32, i32
  }
  func.func @transform_23(%arg0: i32) -> (i32, i32) {
    %c0_i32 = arith.constant 0 : i32
    %c0_i32_0 = arith.constant 0 : i32
    %c0_i32_1 = arith.constant 0 : i32
    return %c0_i32, %c0_i32_0 : i32, i32
  }
  func.func @transform_24(%arg0: i32) -> (i32, i32, i32) {
    %c0_i32 = arith.constant 0 : i32
    %c0_i32_0 = arith.constant 0 : i32
    %c0_i32_1 = arith.constant 0 : i32
    %c0_i32_2 = arith.constant 0 : i32
    return %c0_i32, %c0_i32_0, %c0_i32_1 : i32, i32, i32
  }
  func.func @transform_25(%arg0: i32) -> (i32, i32) {
    %c0_i32 = arith.constant 0 : i32
    %c0_i32_0 = arith.constant 0 : i32
    %c0_i32_1 = arith.constant 0 : i32
    return %c0_i32, %c0_i32_0 : i32, i32
  }
  func.func @transform_26(%arg0: i32) -> (i32, i32) {
    %c0_i32 = arith.constant 0 : i32
    %c0_i32_0 = arith.constant 0 : i32
    %c0_i32_1 = arith.constant 0 : i32
    return %c0_i32, %c0_i32_0 : i32, i32
  }
  func.func @transform_27(%arg0: i32) -> (i32, i32) {
    %c0_i32 = arith.constant 0 : i32
    %c0_i32_0 = arith.constant 0 : i32
    %c0_i32_1 = arith.constant 0 : i32
    return %c0_i32, %c0_i32_0 : i32, i32
  }
  func.func @transform_28(%arg0: i32) -> (i32, i32) {
    %c0_i32 = arith.constant 0 : i32
    %c0_i32_0 = arith.constant 0 : i32
    %c0_i32_1 = arith.constant 0 : i32
    return %c0_i32, %c0_i32_0 : i32, i32
  }
  func.func @transform_29(%arg0: i32) -> (i32, i32) {
    %c0_i32 = arith.constant 0 : i32
    %c0_i32_0 = arith.constant 0 : i32
    %c0_i32_1 = arith.constant 0 : i32
    return %c0_i32, %c0_i32_0 : i32, i32
  }
  func.func @transform_30(%arg0: i32) -> (i32, i32) {
    %c0_i32 = arith.constant 0 : i32
    %c0_i32_0 = arith.constant 0 : i32
    %c0_i32_1 = arith.constant 0 : i32
    return %c0_i32, %c0_i32_0 : i32, i32
  }
  func.func @transform_31(%arg0: i32) -> (i32, i32, i32, i32) {
    %c0_i32 = arith.constant 0 : i32
    %c0_i32_0 = arith.constant 0 : i32
    %c0_i32_1 = arith.constant 0 : i32
    %c0_i32_2 = arith.constant 0 : i32
    return %arg0, %c0_i32, %c0_i32_0, %c0_i32_1 : i32, i32, i32, i32
  }
}

</mosaic_0001>

<bundles_post_ra>
// kernel: layer4_forward.1
= control target key start
LH: loop header
LB: loop body
LE: loop exit
PB: predicated region body
PF: predicated region fallthrough
CT: control target
= control target key end

     0   :  { %s8283_s6 = smov 1   ;;  %s8284_s10 = smov 2   ;;  %s10630_s0 = inlined_call_operand.smem [shape: u32[32], index: -1, kind: input, shape index: {}] }
   0x1   :  { %s8341_s5 = sld [smem:[%s10630_s0]]   ;;  %s8285_s14 = smov 3  }
   0x2   :  { %s8346_s9 = sld [smem:[%s10630_s0 + %s8283_s6]]   ;;  %s8286_s18 = smov 4  }
   0x3   :  { %s8351_s13 = sld [smem:[%s10630_s0 + %s8284_s10]]   ;;  %s8287_s22 = smov 5  }
   0x4   :  { %s8356_s17 = sld [smem:[%s10630_s0 + %s8285_s14]]   ;;  %s8288_s26 = smov 6  }
   0x5   :  { %s8361_s21 = sld [smem:[%s10630_s0 + %s8286_s18]]   ;;  %s8289_s30 = smov 7  }
   0x6   :  { %s8366_s25 = sld [smem:[%s10630_s0 + %s8287_s22]]   ;;  %s8290_s4 = smov 8  }
   0x7   :  { %10700 = sst [smem:[#allocation5_spill]] %s8341_s5  ;;  %s8291_s10 = smov 9  }
   0x8   :  { %10701 = sst [smem:[#allocation6_spill]] %s8346_s9  ;;  %s8292_s15 = smov 10  }
   0x9   :  { %10702 = sst [smem:[#allocation7_spill]] %s8351_s13  ;;  %s8293_s20 = smov 11  }
   0xa   :  { %10703 = sst [smem:[#allocation8_spill]] %s8356_s17  ;;  %s8295_s1 = smov 13  }
   0xb   :  { %10704 = sst [smem:[#allocation9_spill]] %s8361_s21  ;;  %s8296_s7 = smov 14  }
   0xc   :  { %10705 = sst [smem:[#allocation10_spill]] %s8366_s25  ;;  %s8298_s22 = smov 16  }
   0xd   :  { %s8371_s29 = sld [smem:[%s10630_s0 + %s8288_s26]]   ;;  %s8294_s26 = smov 12  }
   0xe   :  { %s8376_s3 = sld [smem:[%s10630_s0 + %s8289_s30]]   ;;  %s8299_s28 = smov 17  }
   0xf   :  { %s8381_s8 = sld [smem:[%s10630_s0 + %s8290_s4]]  }
  0x10   :  { %s8386_s14 = sld [smem:[%s10630_s0 + %s8291_s10]]  }
  0x11   :  { %s8391_s19 = sld [smem:[%s10630_s0 + %s8292_s15]]   ;;  %s8297_s15 = smov 15  }
  0x12   :  { %s8396_s24 = sld [smem:[%s10630_s0 + %s8293_s20]]  }
  0x13   :  { %s8401_s30 = sld [smem:[%s10630_s0 + %s8294_s26]]  }
  0x14   :  { %10706 = sst [smem:[#allocation11_spill]] %s8376_s3 }
  0x15   :  { %10707 = sst [smem:[#allocation12_spill]] %s8381_s8 }
  0x16   :  { %10708 = sst [smem:[#allocation13_spill]] %s8386_s14 }
  0x17   :  { %10709 = sst [smem:[#allocation14_spill]] %s8391_s19 }
  0x18   :  { %10710 = sst [smem:[#allocation15_spill]] %s8396_s24 }
  0x19   :  { %s8406_s6 = sld [smem:[%s10630_s0 + %s8295_s1]]  }
  0x1a   :  { %s8411_s12 = sld [smem:[%s10630_s0 + %s8296_s7]]   ;;  %s8300_s7 = smov 18  }
  0x1b   :  { %s8416_s20 = sld [smem:[%s10630_s0 + %s8297_s15]]   ;;  %s8301_s15 = smov 19  }
  0x1c   :  { %s8421_s27 = sld [smem:[%s10630_s0 + %s8298_s22]]   ;;  %s8302_s22 = smov 20  }
  0x1d   :  { %s8426_s4 = sld [smem:[%s10630_s0 + %s8299_s28]]   ;;  %s8303_s28 = smov 21  }
  0x1f   :  { %10711 = sst [smem:[#allocation16_spill]] %s8406_s6 }
  0x20   :  { %10712 = sst [smem:[#allocation17_spill]] %s8411_s12 }
  0x21   :  { %10713 = sst [smem:[#allocation18_spill]] %s8416_s20 }
  0x22   :  { %10714 = sst [smem:[#allocation19_spill]] %s8421_s27 }
  0x23   :  { %10715 = sst [smem:[#allocation20_spill]] %s8426_s4 }
  0x24   :  { %s8431_s12 = sld [smem:[%s10630_s0 + %s8300_s7]]   ;;  %s8304_s7 = smov 22  }
  0x25   :  { %s8436_s20 = sld [smem:[%s10630_s0 + %s8301_s15]]   ;;  %s8305_s15 = smov 23  }
  0x26   :  { %s8441_s27 = sld [smem:[%s10630_s0 + %s8302_s22]]   ;;  %s8306_s22 = smov 24  }
  0x27   :  { %s8446_s4 = sld [smem:[%s10630_s0 + %s8303_s28]]   ;;  %s8307_s28 = smov 25  }
  0x2a   :  { %10716 = sst [smem:[#allocation21_spill]] %s8431_s12 }
  0x2b   :  { %10717 = sst [smem:[#allocation22_spill]] %s8436_s20 }
  0x2c   :  { %10718 = sst [smem:[#allocation23_spill]] %s8441_s27 }
  0x2d   :  { %10719 = sst [smem:[#allocation24_spill]] %s8446_s4 }
  0x2e   :  { %s8451_s12 = sld [smem:[%s10630_s0 + %s8304_s7]]   ;;  %s8308_s7 = smov 26  }
  0x2f   :  { %s8456_s20 = sld [smem:[%s10630_s0 + %s8305_s15]]   ;;  %s8309_s15 = smov 27  }
  0x30   :  { %s8461_s27 = sld [smem:[%s10630_s0 + %s8306_s22]]   ;;  %s8310_s22 = smov 28  }
  0x31   :  { %s8466_s4 = sld [smem:[%s10630_s0 + %s8307_s28]]   ;;  %s8311_s28 = smov 29  }
  0x34   :  { %10720 = sst [smem:[#allocation25_spill]] %s8451_s12 }
  0x35   :  { %10721 = sst [smem:[#allocation26_spill]] %s8456_s20 }
  0x36   :  { %10722 = sst [smem:[#allocation27_spill]] %s8461_s27 }
  0x37   :  { %10723 = sst [smem:[#allocation28_spill]] %s8466_s4 }
  0x38   :  { %s8471_s12 = sld [smem:[%s10630_s0 + %s8308_s7]]   ;;  %s8312_s7 = smov 30  }
  0x39   :  { %s8476_s20 = sld [smem:[%s10630_s0 + %s8309_s15]]   ;;  %s8313_s15 = smov 31  }
  0x3a   :  { %s8481_s27 = sld [smem:[%s10630_s0 + %s8310_s22]]  }
  0x3b   :  { %s8486_s4 = sld [smem:[%s10630_s0 + %s8311_s28]]  }
  0x3e   :  { %10724 = sst [smem:[#allocation29_spill]] %s8471_s12 }
  0x3f   :  { %10725 = sst [smem:[#allocation30_spill]] %s8476_s20 }
  0x40   :  { %s8491_s12 = sld [smem:[%s10630_s0 + %s8312_s7]]  }
  0x41   :  { %s8496_s20 = sld [smem:[%s10630_s0 + %s8313_s15]]  }
  0x42   :  { %68 = vsyncpa [#allocation3], 0 }
  0x43   :  { %70 = vsyncpa [#allocation3 + $0x1], 0  ;;  %s8498_s22 = smov 0   ;;  %s8500_s23 = smov 0  }
  0x44   :  { %s8502_s26 = smov 0   ;;  %s8504_s28 = smov 0  }
  0x45 LB: > { %s10726_s21 = sld [smem:[#allocation9_spill]]  ;;  %s10727_s19 = sld [smem:[#allocation14_spill]]  ;;  %s8277_s26 = sphi %s8502_s26, %s10858_s26   ;;  %s8273_s23 = sphi %s8500_s23, %s10857_s23   ;;  %s8269_s22 = sphi %s8498_s22, %s10856_s22   ;;  %s8281_s28 = sphi %s8504_s28, %s10859_s28  }
  0x46   : > { %s10728_s9 = sld [smem:[#allocation6_spill]]  ;;  %s8519_s0 = sadd.s32 4294967295, %s8281_s28  }
  0x47   : > { %s6769_s1 = sadd.s32 4294967294, %s8281_s28   ;;  %s8523_s2 = sadd.s32 1, %s8281_s28  }
  0x48   : > { %s739_s7 = sadd.s32 1, %s8277_s26  ;;  %s736_s10 = ssub.s32 %s8281_s28, %s8523_s2 }
  0x49   : > { %p749_p0 = scmp.ne.s32.totalorder %s8277_s26, %s8273_s23  ;;  %p737_p1 = scmp.eq.s32.totalorder %s736_s10, 0 }
  0x4a   : > { %p750_p2 = scmp.eq.s32.totalorder %s8519_s0, 1  ;;  %p755_p3 = scmp.ne.s32.totalorder %s8273_s23, %s8269_s22 }
  0x4b   : > { %p756_p4 = scmp.eq.s32.totalorder %s6769_s1, 1  ;;  %p6772_p7 = scmp.ge.s32.totalorder %s8281_s28, 1 }
  0x4c   : > { %s8534_s11 = scalar_select %p737_p1, %s8277_s26, %s739_s7  }
  0x4d   : > { %p8536_p5 = por %p750_p2, %p749_p0  ;;  %p8540_p6 = por %p756_p4, %p755_p3 }
  0x4e   : > { %p872_p8 = scmp.lt.s32.totalorder %s8281_s28, 3 }
  0x50   : > { %p873_p9 = pnand %p6772_p7, %p872_p8 }
  0x52   : > { %876 = sbr.rel (%p873_p9) target bundleno = 6748 (0x1a5c), region = 144 }
  0x59   : > { %s10731_s13 = sld [smem:[#allocation7_spill]]  ;;  %s10732_s5 = sld [smem:[#allocation5_spill]]  ;;  %vm1063_vm0 = vcmask 1043456   ;;  %vm1014_vm1 = vcmask 64512   ;;  %v8159_v50 = vld [vmem:[%s10726_s21 + $0x18] sm:$0xff]   ;;  %vm10676_vm2 = vcmask 1040384  }
  0x5a   : > { %p952_p10 = scmp.lt.s32.totalorder %s8519_s0, 1  ;;  %s10733_s17 = sld [smem:[#allocation8_spill]]  ;;  %7408 = vmatprep.subr.bf16.mxu1 %v8159_v50  ;;  %vm1430_vm3 = vsmask.f32 256  ;;  %vm10669_vm5 = vcmask 1046528   ;;  %vm1804_vm7 = vcmask 130048  }
  0x5b   : > { %7409 = vmatpush3.bf16.msra.mxu1 %v8159_v50  ;;  %vm8662_vm4 = vmand %vm10676_vm2, %vm1430_vm3  ;;  %vm1466_vm6 = vsmask.f32 7424  ;;  %s10666_s10 = smov 32   ;;  %vm1837_vm8 = vcmask 261120   ;;  %vm1926_vm9 = vcmask 392192   ;;  %s10738_s25 = sld [smem:[#allocation10_spill]] }
  0x5c   : > { %s953_s18 = scalar_select %p952_p10, %s8519_s0, 1  ;;  %vm10689_vm10 = vmmov 0   ;;  %vm10646_vm11 = vcmask 15360   ;;  %vm10675_vm12 = vcmask 1044484   ;;  %vm10673_vm13 = vcmask 1045509  }
  0x5d   : > { %s10739_s8 = sld [smem:[#allocation12_spill]]  ;;  %s10740_s3 = sld [smem:[#allocation11_spill]]  ;;  %vm10672_vm14 = vcmask 1046534   ;;  %vm10652_vm15 = vcmask 1047559   ;;  %vm10670_vm3 = vcmask 1042432  }
  0x5e   : > { %s7029_s1 = sshll.u32 %s953_s18, 8  ;;  %s10662_s18 = smov 16  }
  0x5f   : > { %v1006_v0 = vld [vmem:[%s10731_s13] sm:$0xf]  ;;  %s8552_s7 = scalar_lea.vmem %s10732_s5, %s7029_s1  ;;  %s10741_s14 = sld [smem:[#allocation13_spill]] }
  0x60   : > { %8068 = vmatprep.subr.msk.bf16.mxu0 %vm1063_vm0, %v1006_v0  ;;  %v1065_v1 = vsel %vm1063_vm0, %v1006_v0, 0  ;;  %v958_v2 = vld [vmem:[%s8552_s7] sm:$0xff]  ;;  %v959_v3 = vld [vmem:[%s8552_s7 + $0x8] sm:$0xff]  ;;  %v960_v4 = vld [vmem:[%s8552_s7 + $0x10] sm:$0xff]  ;;  %s10648_s1 = smov 56   ;;  %s10748_s24 = sld [smem:[#allocation15_spill]] }
  0x61   : > { %7375 = vmatpush3.bf16.msra.mxu0 %v1065_v1  ;;  %v8557_v5 = vpack.c.bf16 %v959_v3, %v958_v2  ;;  %v961_v6 = vld [vmem:[%s8552_s7 + $0x18] sm:$0xff]  ;;  %v962_v7 = vld [vmem:[%s8552_s7 + $0x20] sm:$0xff]  ;;  %v963_v8 = vld [vmem:[%s8552_s7 + $0x28] sm:$0xff]  ;;  %s10749_s6 = sld [smem:[#allocation16_spill]]  ;;  %s10790_s5 = smov 64  }
  0x62   : > { %v8562_v9 = vpack.c.bf16 %v961_v6, %v960_v4  ;;  %v8564_v10 = vpack.c.bf16 %v963_v8, %v962_v7  ;;  %v964_v11 = vld [vmem:[%s8552_s7 + $0x30] sm:$0xff]  ;;  %v965_v12 = vld [vmem:[%s8552_s7 + $0x38] sm:$0xff]  ;;  %v966_v13 = vld [vmem:[%s8552_s7 + $0x40] sm:$0xff]  ;;  %s10799_s13 = smov 80  }
  0x63   : > { %7376 = vmatprep.mubr.msk.bf16.mxu0 %vm1014_vm1, %v8557_v5  ;;  %v967_v14 = vld [vmem:[%s8552_s7 + $0x48] sm:$0xff]  ;;  %v8576_v15 = vpack.c.bf16 %v965_v12, %v964_v11  ;;  %v968_v17 = vld [vmem:[%s8552_s7 + $0x50] sm:$0xff]  ;;  %v969_v18 = vld [vmem:[%s8552_s7 + $0x58] sm:$0xff] }
  0x64   : > { %7377 = vmatmul.mubr.msk.bf16.vlgmr.msra.gmra.mrb[0].mxu0 %vm1014_vm1, %v8562_v9  ;;  %v8578_v16 = vpack.c.bf16 %v967_v14, %v966_v13  ;;  %v970_v19 = vld [vmem:[%s8552_s7 + $0x60] sm:$0xff]  ;;  %v971_v20 = vld [vmem:[%s8552_s7 + $0x68] sm:$0xff]  ;;  %v8588_v21 = vpack.c.bf16 %v969_v18, %v968_v17  ;;  %v972_v23 = vld [vmem:[%s8552_s7 + $0x70] sm:$0xff]  ;;  %v10734_v17 = vmov 0 }
  0x65   : > { %7380 = vmatprep.mubr.msk.bf16.mxu0 %vm1014_vm1, %v8564_v10  ;;  %v8590_v22 = vpack.c.bf16 %v971_v20, %v970_v19  ;;  %v973_v24 = vld [vmem:[%s8552_s7 + $0x78] sm:$0xff]  ;;  %v974_v25 = vld [vmem:[%s8552_s7 + $0x80] sm:$0xff]  ;;  %v975_v26 = vld [vmem:[%s8552_s7 + $0x88] sm:$0xff]  ;;  %v10735_v17 = vsel %vm8662_vm4, 4294967295, %v10734_v17 }
  0x66   : > { %v8600_v27 = vpack.c.bf16 %v973_v24, %v972_v23  ;;  %v8602_v28 = vpack.c.bf16 %v975_v26, %v974_v25  ;;  %v976_v29 = vld [vmem:[%s8552_s7 + $0x90] sm:$0xff]  ;;  %v977_v30 = vld [vmem:[%s8552_s7 + $0x98] sm:$0xff]  ;;  %v978_v31 = vld [vmem:[%s8552_s7 + $0xa0] sm:$0xff]  ;;  %10736 = vst [vmem:[#allocation31_spill] sm:$0xff] %v10735_v17 }
  0x67   : > { %v979_v32 = vld [vmem:[%s8552_s7 + $0xa8] sm:$0xff]  ;;  %v8612_v33 = vpack.c.bf16 %v977_v30, %v976_v29  ;;  %v980_v35 = vld [vmem:[%s8552_s7 + $0xb0] sm:$0xff]  ;;  %v981_v36 = vld [vmem:[%s8552_s7 + $0xb8] sm:$0xff] }
  0x68   : > { %v8614_v34 = vpack.c.bf16 %v979_v32, %v978_v31  ;;  %v982_v37 = vld [vmem:[%s8552_s7 + $0xc0] sm:$0xff]  ;;  %v983_v38 = vld [vmem:[%s8552_s7 + $0xc8] sm:$0xff]  ;;  %v8624_v39 = vpack.c.bf16 %v981_v36, %v980_v35  ;;  %v984_v41 = vld [vmem:[%s8552_s7 + $0xd0] sm:$0xff] }
  0x69   : > { %v8626_v40 = vpack.c.bf16 %v983_v38, %v982_v37  ;;  %v985_v42 = vld [vmem:[%s8552_s7 + $0xd8] sm:$0xff]  ;;  %v986_v43 = vld [vmem:[%s8552_s7 + $0xe0] sm:$0xff]  ;;  %v987_v44 = vld [vmem:[%s8552_s7 + $0xe8] sm:$0xff] }
  0x6a   : > { %v8636_v45 = vpack.c.bf16 %v985_v42, %v984_v41  ;;  %v8638_v46 = vpack.c.bf16 %v987_v44, %v986_v43  ;;  %v988_v47 = vld [vmem:[%s8552_s7 + $0xf0] sm:$0xff]  ;;  %v989_v48 = vld [vmem:[%s8552_s7 + $0xf8] sm:$0xff]  ;;  %v8652_v51 = vld [vmem:[%s10733_s17] ss:$0 sm:$0xff]  ;;  %s10650_s7 = smov 72   ;;  %s10802_s17 = smov 96  }
  0x6b   : > { %v8646_v49 = vpack.c.bf16 %v989_v48, %v988_v47  ;;  %v8160_v0 = vld [vmem:[%s10726_s21 + $0x20] sm:$0xff]   ;;  %v8161_v38 = vld [vmem:[%s10726_s21 + $0x28] sm:$0xff]  }
  0x6c   : > { %7381 = vmatmul.mubr.msk.bf16.gmra.mrb[4].mxu0 %vm1014_vm1, %v8576_v15  ;;  %7410 = vmatprep.subr.bf16.mxu1 %v8160_v0 }
  0x6d   : > { %7384 = vmatprep.mubr.msk.bf16.mxu0 %vm1014_vm1, %v8578_v16  ;;  %7411 = vmatpush3.bf16.msra.mxu1 %v8160_v0 }
  0x6e   : > { %7412 = vmatprep.subr.bf16.mxu1 %v8161_v38 }
  0x71   : > { %7413 = vmatpush3.bf16.msra.mxu1 %v8161_v38 }
  0x74   : > { %7385 = vmatmul.mubr.msk.bf16.gmra.mrb[8].mxu0 %vm1014_vm1, %v8588_v21 }
  0x75   : > { %7388 = vmatprep.mubr.msk.bf16.mxu0 %vm1014_vm1, %v8590_v22 }
  0x7c   : > { %7389 = vmatmul.mubr.msk.bf16.gmra.mrb[12].mxu0 %vm1014_vm1, %v8600_v27 }
  0x7d   : > { %7392 = vmatprep.mubr.msk.bf16.mxu0 %vm1014_vm1, %v8602_v28 }
  0x84   : > { %7393 = vmatmul.mubr.msk.bf16.gmra.mrb[16].mxu0 %vm1014_vm1, %v8612_v33 }
  0x85   : > { %7396 = vmatprep.mubr.msk.bf16.mxu0 %vm1014_vm1, %v8614_v34 }
  0x8c   : > { %7397 = vmatmul.mubr.msk.bf16.gmra.mrb[20].mxu0 %vm1014_vm1, %v8624_v39 }
  0x8d   : > { %7400 = vmatprep.mubr.msk.bf16.mxu0 %vm1014_vm1, %v8626_v40 }
  0x94   : > { %7401 = vmatmul.mubr.msk.bf16.gmra.mrb[24].mxu0 %vm1014_vm1, %v8636_v45 }
  0x95   : > { %7404 = vmatprep.mubr.msk.bf16.mxu0 %vm1014_vm1, %v8638_v46 }
  0x9c   : > { %7405 = vmatmul.mubr.msk.bf16.gmra.mrb[28].mxu0 %vm1014_vm1, %v8646_v49 }
 0x137   : > { %v7378_v52 = vpop.f32.mrb[0].mxu0 }
 0x138   : > { %v1110_v53 = vadd.f32 %v7378_v52, %v8652_v51  ;;  %v1101_v54 = vpop.f32.mrb[1].mxu0 }
 0x139   : > { %v1102_v55 = vadd.f32 %v8652_v51, %v1101_v54  ;;  %v7379_v56 = vpop.f32.mrb[2].mxu0 }
 0x13a   : > { %v1113_v57 = vadd.f32 %v7379_v56, %v8652_v51  ;;  %v1104_v58 = vpop.f32.mrb[3].mxu0  ;;  %v1230_v60 = vmax.f32 %v1110_v53, 0.0 }
 0x13b   : > { %v1105_v59 = vadd.f32 %v8652_v51, %v1104_v58  ;;  %v1228_v62 = vmax.f32 %v1102_v55, 0.0 }
 0x13c   : > { %v1231_v61 = vmax.f32 %v1113_v57, 0.0 }
 0x13d   : > { %v1229_v63 = vmax.f32 %v1105_v59, 0.0 }
 0x13e   : > { %v1261_v1 = vpack.c.bf16 %v1231_v61, %v1230_v60 }
 0x13f   : > { %v1260_v2 = vpack.c.bf16 %v1229_v63, %v1228_v62  ;;  %v7382_v3 = vpop.f32.mrb[4].mxu0 }
 0x140   : > { %v1291_v4 = vshrl.u32 %v1261_v1, 16  ;;  %v1126_v6 = vadd.f32 %v7382_v3, %v8652_v51  ;;  %v1117_v7 = vpop.f32.mrb[5].mxu0  ;;  %v1294_v14 = vshll.u32 %v1261_v1, 16 }
 0x141   : > { %v1284_v8 = vshrl.u32 %v1260_v2, 16  ;;  %v1118_v11 = vadd.f32 %v8652_v51, %v1117_v7  ;;  %v7383_v12 = vpop.f32.mrb[6].mxu0  ;;  %v1287_v23 = vshll.u32 %v1260_v2, 16 }
 0x142   : > { %v1293_v13 = vrot.slane %v1291_v4, 7  ;;  %v1129_v18 = vadd.f32 %v7383_v12, %v8652_v51  ;;  %v1120_v19 = vpop.f32.mrb[7].mxu0  ;;  %v1234_v26 = vmax.f32 %v1126_v6, 0.0 }
 0x143   : > { %v1286_v20 = vrot.slane %v1284_v8, 7  ;;  %v1121_v24 = vadd.f32 %v8652_v51, %v1120_v19  ;;  %v1232_v31 = vmax.f32 %v1118_v11, 0.0 }
 0x144   : > { %v1296_v25 = vor.u32 %v1294_v14, %v1293_v13  ;;  %v1235_v29 = vmax.f32 %v1129_v18, 0.0  ;;  %v8681_v44 = vsel %vm8662_vm4, %v1293_v13, 0 }
 0x145   : > { %v1289_v30 = vor.u32 %v1287_v23, %v1286_v20  ;;  %v1233_v32 = vmax.f32 %v1121_v24, 0.0  ;;  %v1450_v35 = vsel %vm8662_vm4, %v1286_v20, 0  ;;  %v1731_v62 = vrot.slane %v8681_v44, 1 }
 0x146   : > { %v8672_v36 = vsel %vm8662_vm4, 0, %v1296_v25  ;;  %v1263_v37 = vpack.c.bf16 %v1235_v29, %v1234_v26  ;;  %v1728_v53 = vrot.slane %v1450_v35, 1  ;;  %v1487_v2 = vshll.u32 %v1450_v35, 16 }
 0x147   : > { %v1262_v41 = vpack.c.bf16 %v1233_v32, %v1232_v31  ;;  %v7386_v42 = vpop.f32.mrb[8].mxu0  ;;  %v8677_v43 = vsel %vm8662_vm4, 0, %v1289_v30  ;;  %v1730_v57 = vrot.slane %v8672_v36, 1  ;;  %v1494_v20 = vshll.u32 %v8672_v36, 16 }
 0x148   : > { %v1305_v47 = vshrl.u32 %v1263_v37, 16  ;;  %v1142_v48 = vadd.f32 %v7386_v42, %v8652_v51  ;;  %v1133_v50 = vpop.f32.mrb[9].mxu0  ;;  %v1727_v52 = vrot.slane %v8677_v43, 1  ;;  %v1308_v63 = vshll.u32 %v1263_v37, 16 }
 0x149   : > { %v1298_v54 = vshrl.u32 %v1262_v41, 16  ;;  %v1134_v55 = vadd.f32 %v8652_v51, %v1133_v50  ;;  %v7387_v56 = vpop.f32.mrb[10].mxu0  ;;  %v1301_v3 = vshll.u32 %v1262_v41, 16  ;;  %v1482_v7 = vshll.u32 %v8677_v43, 16 }
 0x14a   : > { %v1307_v58 = vrot.slane %v1305_v47, 7  ;;  %v1145_v59 = vadd.f32 %v7387_v56, %v8652_v51  ;;  %v1136_v60 = vpop.f32.mrb[11].mxu0  ;;  %v1729_v61 = vsel %vm10669_vm5, %v1727_v52, %v1728_v53  ;;  %v1238_v4 = vmax.f32 %v1142_v48, 0.0 }
 0x14b   : > { %v1300_v0 = vrot.slane %v1298_v54, 7  ;;  %v1137_v1 = vadd.f32 %v8652_v51, %v1136_v60  ;;  %1774 = vrot.lane.b32.xlu1 %v1729_v61, %s10666_s10  ;;  %v1236_v8 = vmax.f32 %v1134_v55, 0.0  ;;  %v1732_v12 = vsel %vm10669_vm5, %v1730_v57, %v1731_v62 }
 0x14c   : > { %v1239_v6 = vmax.f32 %v1145_v59, 0.0  ;;  %v1480_v13 = vshrl.u32 %v8677_v43, 16  ;;  %v1310_v14 = vor.u32 %v1308_v63, %v1307_v58  ;;  %v1484_v19 = vrot.slane %v1482_v7, 1 }
 0x14d   : > { %v1237_v11 = vmax.f32 %v1137_v1, 0.0  ;;  %v1303_v23 = vor.u32 %v1301_v3, %v1300_v0  ;;  %v1489_v26 = vrot.slane %v1487_v2, 1  ;;  %v1492_v29 = vshrl.u32 %v8672_v36, 16 }
 0x14e   : > { %v1265_v18 = vpack.c.bf16 %v1239_v6, %v1238_v4  ;;  %v1485_v32 = vor.u32 %v1484_v19, %v1480_v13  ;;  %v1499_v37 = vshll.u32 %v8681_v44, 16  ;;  %v8702_v38 = vsel %vm8662_vm4, %v1307_v58, 0 }
 0x14f   : > { %v1264_v24 = vpack.c.bf16 %v1237_v11, %v1236_v8  ;;  %v7390_v25 = vpop.f32.mrb[12].mxu0  ;;  %1776 = vrot.lane.b32.xlu1 %v1732_v12, %s10666_s10  ;;  %v1496_v48 = vrot.slane %v1494_v20, 1  ;;  %v8707_v50 = vsel %vm8662_vm4, 0, %v1310_v14  ;;  %v8713_v44 = vsel %vm8662_vm4, 0, %v1303_v23 }
 0x150   : > { %v1319_v30 = vshrl.u32 %v1265_v18, 16  ;;  %v1158_v31 = vadd.f32 %v7390_v25, %v8652_v51  ;;  %v1149_v35 = vpop.f32.mrb[13].mxu0  ;;  %v1490_v53 = vsel %vm1466_vm6, %v1485_v32, %v1489_v26  ;;  %v1322_v56 = vshll.u32 %v1265_v18, 16 }
 0x151   : > { %v1312_v41 = vshrl.u32 %v1264_v24, 16  ;;  %v1150_v42 = vadd.f32 %v8652_v51, %v1149_v35  ;;  %v7391_v47 = vpop.f32.mrb[14].mxu0  ;;  %1661 = vrot.lane.b32.xlu0 %v1490_v53, %s10662_s18  ;;  %v1497_v58 = vor.u32 %v1496_v48, %v1492_v29  ;;  %v1501_v62 = vrot.slane %v1499_v37, 1 }
 0x152   : > { %v1321_v52 = vrot.slane %v1319_v30, 7  ;;  %v1161_v54 = vadd.f32 %v7391_v47, %v8652_v51  ;;  %v1152_v55 = vpop.f32.mrb[15].mxu0  ;;  %v1242_v60 = vmax.f32 %v1158_v31, 0.0  ;;  %v1315_v63 = vshll.u32 %v1264_v24, 16 }
 0x153   : > { %v1153_v57 = vadd.f32 %v8652_v51, %v1152_v55  ;;  %v1314_v59 = vrot.slane %v1312_v41, 7  ;;  %v1240_v1 = vmax.f32 %v1150_v42, 0.0  ;;  %v1518_v3 = vshll.u32 %v8707_v50, 16 }
 0x154   : > { %v1243_v61 = vmax.f32 %v1161_v54, 0.0  ;;  %v1324_v4 = vor.u32 %v1322_v56, %v1321_v52  ;;  %v1502_v7 = vsel %vm1466_vm6, %v1497_v58, %v1501_v62  ;;  %v1523_v8 = vshll.u32 %v8702_v38, 16 }
 0x155   : > { %v1241_v2 = vmax.f32 %v1153_v57, 0.0  ;;  %v1452_v11 = vsel %vm8662_vm4, %v1300_v0, 0  ;;  %1663 = vrot.lane.b32.xlu0 %v1502_v7, %s10662_s18  ;;  %v1516_v13 = vshrl.u32 %v8707_v50, 16  ;;  %v1520_v14 = vrot.slane %v1518_v3, 1 }
 0x156   : > { %v1267_v6 = vpack.c.bf16 %v1243_v61, %v1242_v60  ;;  %v8726_v19 = vsel %vm8662_vm4, %v1321_v52, 0  ;;  %v1317_v20 = vor.u32 %v1315_v63, %v1314_v59  ;;  %v1525_v24 = vrot.slane %v1523_v8, 1 }
 0x157   : > { %v1266_v12 = vpack.c.bf16 %v1241_v2, %v1240_v1  ;;  %v7394_v18 = vpop.f32.mrb[16].mxu0  ;;  %v1521_v29 = vor.u32 %v1520_v14, %v1516_v13  ;;  %v1506_v0 = vshll.u32 %v8713_v44, 16  ;;  %v8732_v32 = vsel %vm8662_vm4, 0, %v1324_v4 }
 0x158   : > { %v1333_v23 = vshrl.u32 %v1267_v6, 16  ;;  %v1165_v25 = vpop.f32.mrb[17].mxu0  ;;  %v1174_v30 = vadd.f32 %v7394_v18, %v8652_v51  ;;  %v8736_v35 = vsel %vm8662_vm4, %v1314_v59, 0  ;;  %v1511_v41 = vshll.u32 %v1452_v11, 16 }
 0x159   : > { %v1326_v26 = vshrl.u32 %v1266_v12, 16  ;;  %v7395_v31 = vpop.f32.mrb[18].mxu0  ;;  %v1526_v47 = vsel %vm1466_vm6, %v1521_v29, %v1525_v24  ;;  %v1504_v48 = vshrl.u32 %v8713_v44, 16  ;;  %v1508_v52 = vrot.slane %v1506_v0, 1 }
 0x15a   : > { %v1335_v37 = vrot.slane %v1333_v23, 7  ;;  %v1168_v42 = vpop.f32.mrb[19].mxu0  ;;  %v1177_v53 = vadd.f32 %v7395_v31, %v8652_v51  ;;  %v1336_v54 = vshll.u32 %v1267_v6, 16  ;;  %v1329_v56 = vshll.u32 %v1266_v12, 16  ;;  %1667 = vrot.lane.b32.xlu1 %v1526_v47, %s10662_s18 }
 0x15b   : > { %v1328_v55 = vrot.slane %v1326_v26, 7  ;;  %v1166_v57 = vadd.f32 %v8652_v51, %v1165_v25  ;;  %v1246_v58 = vmax.f32 %v1174_v30, 0.0  ;;  %v1509_v59 = vor.u32 %v1508_v52, %v1504_v48 }
 0x15c   : > { %v1513_v60 = vrot.slane %v1511_v41, 1  ;;  %v1247_v61 = vmax.f32 %v1177_v53, 0.0  ;;  %v1338_v62 = vor.u32 %v1336_v54, %v1335_v37  ;;  %v1169_v63 = vadd.f32 %v8652_v51, %v1168_v42 }
 0x15d   : > { %v1736_v1 = vrot.slane %v8707_v50, 1  ;;  %v1737_v2 = vrot.slane %v8702_v38, 1  ;;  %v8748_v3 = vsel %vm8662_vm4, 0, %v1317_v20  ;;  %v1733_v7 = vrot.slane %v8713_v44, 1 }
 0x15e   : > { %v1514_v4 = vsel %vm1466_vm6, %v1509_v59, %v1513_v60  ;;  %v1269_v6 = vpack.c.bf16 %v1247_v61, %v1246_v58  ;;  %v1331_v12 = vor.u32 %v1329_v56, %v1328_v55  ;;  %v1244_v13 = vmax.f32 %v1166_v57, 0.0 }
 0x15f   : > { %v7398_v8 = vpop.f32.mrb[20].mxu0  ;;  %1665 = vrot.lane.b32.xlu0 %v1514_v4, %s10662_s18  ;;  %v1245_v14 = vmax.f32 %v1169_v63, 0.0  ;;  %v1738_v18 = vsel %vm10669_vm5, %v1736_v1, %v1737_v2  ;;  %v8756_v38 = vsel %vm8662_vm4, %v1335_v37, 0  ;;  %v1734_v20 = vrot.slane %v1452_v11, 1 }
 0x160   : > { %v1181_v23 = vpop.f32.mrb[21].mxu0  ;;  %1780 = vrot.lane.b32.xlu1 %v1738_v18, %s10666_s10  ;;  %v1542_v24 = vshll.u32 %v8732_v32, 16  ;;  %v1547_v25 = vshll.u32 %v8726_v19, 16  ;;  %v8763_v29 = vsel %vm8662_vm4, 0, %v1338_v62  ;;  %v8767_v30 = vsel %vm8662_vm4, %v1328_v55, 0 }
 0x161   : > { %v7399_v26 = vpop.f32.mrb[22].mxu0  ;;  %v1347_v0 = vshrl.u32 %v1269_v6, 16  ;;  %v1268_v31 = vpack.c.bf16 %v1245_v14, %v1244_v13  ;;  %v1735_v41 = vsel %vm10669_vm5, %v1733_v7, %v1734_v20  ;;  %v1540_v11 = vshrl.u32 %v8732_v32, 16 }
 0x162   : > { %v1184_v37 = vpop.f32.mrb[23].mxu0  ;;  %v1544_v42 = vrot.slane %v1542_v24, 1  ;;  %v1530_v47 = vshll.u32 %v8748_v3, 16  ;;  %v8774_v48 = vsel %vm8662_vm4, 0, %v1331_v12  ;;  %v1190_v53 = vadd.f32 %v7398_v8, %v8652_v51 }
 0x163   : > { %v1340_v52 = vshrl.u32 %v1268_v31, 16  ;;  %1778 = vrot.lane.b32.xlu0 %v1735_v41, %s10666_s10  ;;  %v1535_v54 = vshll.u32 %v8736_v35, 16  ;;  %v1549_v56 = vrot.slane %v1547_v25, 1  ;;  %v1528_v57 = vshrl.u32 %v8748_v3, 16 }
 0x164   : > { %v1545_v55 = vor.u32 %v1544_v42, %v1540_v11  ;;  %v1532_v58 = vrot.slane %v1530_v47, 1  ;;  %v1349_v59 = vrot.slane %v1347_v0, 7  ;;  %v1350_v60 = vshll.u32 %v1269_v6, 16 }
 0x165   : > { %v1182_v61 = vadd.f32 %v8652_v51, %v1181_v23  ;;  %v1193_v62 = vadd.f32 %v7399_v26, %v8652_v51  ;;  %v1537_v2 = vrot.slane %v1535_v54, 1  ;;  %v1185_v4 = vadd.f32 %v8652_v51, %v1184_v37 }
 0x166   : > { %v1550_v63 = vsel %vm1466_vm6, %v1545_v55, %v1549_v56  ;;  %v1533_v1 = vor.u32 %v1532_v58, %v1528_v57  ;;  %v1342_v8 = vrot.slane %v1340_v52, 7  ;;  %v1250_v12 = vmax.f32 %v1190_v53, 0.0 }
 0x167   : > { %v7402_v7 = vpop.f32.mrb[24].mxu0  ;;  %1671 = vrot.lane.b32.xlu1 %v1550_v63, %s10662_s18  ;;  %v1248_v13 = vmax.f32 %v1182_v61, 0.0  ;;  %v1251_v14 = vmax.f32 %v1193_v62, 0.0  ;;  %v1249_v20 = vmax.f32 %v1185_v4, 0.0  ;;  %v1742_v23 = vrot.slane %v8732_v32, 1 }
 0x168   : > { %v1197_v18 = vpop.f32.mrb[25].mxu0  ;;  %v1538_v6 = vsel %vm1466_vm6, %v1533_v1, %v1537_v2  ;;  %v1743_v24 = vrot.slane %v8726_v19, 1  ;;  %v1352_v26 = vor.u32 %v1350_v60, %v1349_v59  ;;  %v1343_v0 = vshll.u32 %v1268_v31, 16 }
 0x169   : > { %v7403_v25 = vpop.f32.mrb[26].mxu0  ;;  %1669 = vrot.lane.b32.xlu0 %v1538_v6, %s10662_s18  ;;  %v1271_v37 = vpack.c.bf16 %v1251_v14, %v1250_v12  ;;  %v1739_v41 = vrot.slane %v8748_v3, 1  ;;  %v1270_v42 = vpack.c.bf16 %v1249_v20, %v1248_v13  ;;  %v1740_v52 = vrot.slane %v8736_v35, 1 }
 0x16a   : > { %v1200_v11 = vpop.f32.mrb[27].mxu0  ;;  %v1744_v47 = vsel %vm10669_vm5, %v1742_v23, %v1743_v24  ;;  %v1566_v53 = vshll.u32 %v8763_v29, 16  ;;  %v8795_v54 = vsel %vm8662_vm4, %v1349_v59, 0  ;;  %v1345_v19 = vor.u32 %v1343_v0, %v1342_v8 }
 0x16b   : > { %v1361_v55 = vshrl.u32 %v1271_v37, 16  ;;  %1784 = vrot.lane.b32.xlu1 %v1744_v47, %s10666_s10  ;;  %v1571_v31 = vshll.u32 %v8756_v38, 16  ;;  %v1354_v56 = vshrl.u32 %v1270_v42, 16  ;;  %v1741_v57 = vsel %vm10669_vm5, %v1739_v41, %v1740_v52 }
 0x16c   : > { %v1564_v58 = vshrl.u32 %v8763_v29, 16  ;;  %v1568_v60 = vrot.slane %v1566_v53, 1  ;;  %v8803_v35 = vsel %vm8662_vm4, 0, %v1352_v26  ;;  %v8807_v59 = vsel %vm8662_vm4, %v1342_v8, 0 }
 0x16d   : > { %1782 = vrot.lane.b32.xlu0 %v1741_v57, %s10666_s10  ;;  %v1206_v61 = vadd.f32 %v7402_v7, %v8652_v51  ;;  %v1554_v62 = vshll.u32 %v8774_v48, 16  ;;  %v1363_v63 = vrot.slane %v1361_v55, 7  ;;  %v1573_v2 = vrot.slane %v1571_v31, 1 }
 0x16e   : > { %v1569_v1 = vor.u32 %v1568_v60, %v1564_v58  ;;  %v1559_v4 = vshll.u32 %v8767_v30, 16  ;;  %v8815_v13 = vsel %vm8662_vm4, 0, %v1345_v19  ;;  %v1364_v14 = vshll.u32 %v1271_v37, 16 }
 0x16f   : > { %v7406_v12 = vpop.f32.mrb[28].mxu0  ;;  %v1552_v8 = vshrl.u32 %v8774_v48, 16  ;;  %v1556_v6 = vrot.slane %v1554_v62, 1  ;;  %v1356_v23 = vrot.slane %v1354_v56, 7  ;;  %v1357_v24 = vshll.u32 %v1270_v42, 16 }
 0x170   : > { %v1213_v20 = vpop.f32.mrb[29].mxu0  ;;  %v1574_v7 = vsel %vm1466_vm6, %v1569_v1, %v1573_v2  ;;  %v1198_v26 = vadd.f32 %v8652_v51, %v1197_v18  ;;  %v1254_v41 = vmax.f32 %v1206_v61, 0.0  ;;  %v1561_v52 = vrot.slane %v1559_v4, 1 }
 0x171   : > { %v7407_v0 = vpop.f32.mrb[30].mxu0  ;;  %1675 = vrot.lane.b32.xlu1 %v1574_v7, %s10662_s18  ;;  %v1557_v47 = vor.u32 %v1556_v6, %v1552_v8  ;;  %v1209_v53 = vadd.f32 %v7403_v25, %v8652_v51  ;;  %v1366_v37 = vor.u32 %v1364_v14, %v1363_v63  ;;  %v1201_v55 = vadd.f32 %v8652_v51, %v1200_v11  ;;  %v8840_v6 = vld [vmem:[%s10726_s21] sm:$0xff]  }
 0x172   : > { %v1216_v19 = vpop.f32.mrb[31].mxu0  ;;  %v1748_v31 = vrot.slane %v8763_v29, 1  ;;  %v1749_v42 = vrot.slane %v8756_v38, 1  ;;  %v8827_v56 = vsel %vm8662_vm4, %v1363_v63, 0  ;;  %v1745_v58 = vrot.slane %v8774_v48, 1  ;;  %7446 = vmatprep.subr.bf16.mxu1 %v8840_v6 }
 0x173   : > { %v1562_v18 = vsel %vm1466_vm6, %v1557_v47, %v1561_v52  ;;  %v1255_v57 = vmax.f32 %v1209_v53, 0.0  ;;  %v1252_v25 = vmax.f32 %v1198_v26, 0.0  ;;  %v1253_v60 = vmax.f32 %v1201_v55, 0.0 }
 0x174   : > { %1673 = vrot.lane.b32.xlu0 %v1562_v18, %s10662_s18  ;;  %v1750_v11 = vsel %vm10669_vm5, %v1748_v31, %v1749_v42  ;;  %v1590_v61 = vshll.u32 %v8803_v35, 16  ;;  %v1359_v62 = vor.u32 %v1357_v24, %v1356_v23  ;;  %v1746_v63 = vrot.slane %v8767_v30, 1 }
 0x175   : > { %v1273_v38 = vpack.c.bf16 %v1255_v57, %v1254_v41  ;;  %1788 = vrot.lane.b32.xlu1 %v1750_v11, %s10666_s10  ;;  %v1595_v1 = vshll.u32 %v8795_v54, 16  ;;  %v1272_v2 = vpack.c.bf16 %v1253_v60, %v1252_v25  ;;  %v1588_v4 = vshrl.u32 %v8803_v35, 16 }
 0x176   : > { %v1592_v14 = vrot.slane %v1590_v61, 1  ;;  %v1578_v8 = vshll.u32 %v8815_v13, 16  ;;  %v1747_v26 = vsel %vm10669_vm5, %v1745_v58, %v1746_v63  ;;  %v1222_v24 = vadd.f32 %v7406_v12, %v8652_v51 }
 0x177   : > { %v1375_v7 = vshrl.u32 %v1273_v38, 16  ;;  %v1576_v41 = vshrl.u32 %v8815_v13, 16  ;;  %v1368_v47 = vshrl.u32 %v1272_v2, 16  ;;  %v1597_v52 = vrot.slane %v1595_v1, 1 }
 0x178   : > { %1786 = vrot.lane.b32.xlu0 %v1747_v26, %s10666_s10  ;;  %v1593_v30 = vor.u32 %v1592_v14, %v1588_v4  ;;  %v1580_v53 = vrot.slane %v1578_v8, 1  ;;  %v8849_v55 = vsel %vm8662_vm4, %v1356_v23, 0  ;;  %v1583_v31 = vshll.u32 %v8807_v59, 16 }
 0x179   : > { %v1214_v42 = vadd.f32 %v8652_v51, %v1213_v20  ;;  %v1225_v12 = vadd.f32 %v7407_v0, %v8652_v51  ;;  %v8856_v18 = vsel %vm8662_vm4, 0, %v1366_v37  ;;  %v1217_v25 = vadd.f32 %v8652_v51, %v1216_v19 }
 0x17a   : > { %v1598_v57 = vsel %vm1466_vm6, %v1593_v30, %v1597_v52  ;;  %v1581_v58 = vor.u32 %v1580_v53, %v1576_v41  ;;  %v8862_v60 = vsel %vm8662_vm4, 0, %v1359_v62  ;;  %v1377_v23 = vrot.slane %v1375_v7, 7 }
 0x17b   : > { %1679 = vrot.lane.b32.xlu1 %v1598_v57, %s10662_s18  ;;  %v1258_v11 = vmax.f32 %v1222_v24, 0.0  ;;  %v1585_v20 = vrot.slane %v1583_v31, 1  ;;  %v1370_v61 = vrot.slane %v1368_v47, 7  ;;  %v1256_v0 = vmax.f32 %v1214_v42, 0.0 }
 0x17c   : > { %v1259_v63 = vmax.f32 %v1225_v12, 0.0  ;;  %v1257_v1 = vmax.f32 %v1217_v25, 0.0  ;;  %v1378_v37 = vshll.u32 %v1273_v38, 16  ;;  %v1754_v14 = vrot.slane %v8803_v35, 1 }
 0x17d   : > { %v1586_v4 = vsel %vm1466_vm6, %v1581_v58, %v1585_v20  ;;  %v1755_v51 = vrot.slane %v8795_v54, 1  ;;  %v1371_v19 = vshll.u32 %v1272_v2, 16  ;;  %v1751_v7 = vrot.slane %v8815_v13, 1 }
 0x17e   : > { %1677 = vrot.lane.b32.xlu0 %v1586_v4, %s10662_s18  ;;  %v1275_v62 = vpack.c.bf16 %v1259_v63, %v1258_v11  ;;  %v1274_v8 = vpack.c.bf16 %v1257_v1, %v1256_v0  ;;  %v1380_v26 = vor.u32 %v1378_v37, %v1377_v23  ;;  %v1752_v41 = vrot.slane %v8807_v59, 1 }
 0x17f   : > { %v1756_v24 = vsel %vm10669_vm5, %v1754_v14, %v1755_v51  ;;  %v1614_v38 = vshll.u32 %v8856_v18, 16  ;;  %v8875_v47 = vsel %vm8662_vm4, %v1377_v23, 0  ;;  %v1373_v30 = vor.u32 %v1371_v19, %v1370_v61 }
 0x180   : > { %v1389_v54 = vshrl.u32 %v1275_v62, 16  ;;  %v1382_v2 = vshrl.u32 %v1274_v8, 16  ;;  %1792 = vrot.lane.b32.xlu1 %v1756_v24, %s10666_s10  ;;  %v1753_v52 = vsel %vm10669_vm5, %v1751_v7, %v1752_v41  ;;  %v1612_v53 = vshrl.u32 %v8856_v18, 16 }
 0x181   : > { %v1616_v31 = vrot.slane %v1614_v38, 1  ;;  %v1619_v42 = vshll.u32 %v8827_v56, 16  ;;  %v8883_v59 = vsel %vm8662_vm4, %v1370_v61, 0  ;;  %v1602_v57 = vshll.u32 %v8862_v60, 16 }
 0x182   : > { %v1384_v12 = vrot.slane %v1382_v2, 7  ;;  %1790 = vrot.lane.b32.xlu0 %v1753_v52, %s10666_s10  ;;  %v1607_v58 = vshll.u32 %v8849_v55, 16  ;;  %v8888_v25 = vrot.slane %v1389_v54, 7  ;;  %v1385_v23 = vshll.u32 %v1274_v8, 16 }
 0x183   : > { %v1617_v11 = vor.u32 %v1616_v31, %v1612_v53  ;;  %v1621_v20 = vrot.slane %v1619_v42, 1  ;;  %v8892_v0 = vsel %vm8662_vm4, 0, %v1380_v26  ;;  %v8896_v61 = vsel %vm8662_vm4, 0, %v1373_v30 }
 0x184   : > { %v1600_v63 = vshrl.u32 %v8862_v60, 16  ;;  %v1604_v1 = vrot.slane %v1602_v57, 1  ;;  %v1392_v37 = vshll.u32 %v1275_v62, 16  ;;  %v1387_v4 = vor.u32 %v1385_v23, %v1384_v12 }
 0x185   : > { %v1622_v14 = vsel %vm1466_vm6, %v1617_v11, %v1621_v20  ;;  %v1760_v51 = vrot.slane %v8856_v18, 1  ;;  %v1609_v8 = vrot.slane %v1607_v58, 1  ;;  %v1761_v26 = vrot.slane %v8827_v56, 1 }
 0x186   : > { %1683 = vrot.lane.b32.xlu1 %v1622_v14, %s10662_s18  ;;  %v1605_v19 = vor.u32 %v1604_v1, %v1600_v63  ;;  %v1394_v7 = vor.u32 %v1392_v37, %v8888_v25  ;;  %v1638_v24 = vshll.u32 %v8892_v0, 16  ;;  %v1643_v41 = vshll.u32 %v8875_v47, 16 }
 0x187   : > { %v1757_v62 = vrot.slane %v8862_v60, 1  ;;  %v1626_v30 = vshll.u32 %v8896_v61, 16  ;;  %v1631_v54 = vshll.u32 %v8883_v59, 16  ;;  %v8912_v2 = vsel %vm8662_vm4, 0, %v1387_v4 }
 0x188   : > { %v1610_v38 = vsel %vm1466_vm6, %v1605_v19, %v1609_v8  ;;  %v1762_v56 = vsel %vm10669_vm5, %v1760_v51, %v1761_v26  ;;  %v1636_v52 = vshrl.u32 %v8892_v0, 16  ;;  %v1640_v53 = vrot.slane %v1638_v24, 1 }
 0x189   : > { %1681 = vrot.lane.b32.xlu0 %v1610_v38, %s10662_s18  ;;  %v1758_v31 = vrot.slane %v8849_v55, 1  ;;  %v1624_v42 = vshrl.u32 %v8896_v61, 16  ;;  %v1628_v57 = vrot.slane %v1626_v30, 1  ;;  %v1645_v23 = vrot.slane %v1643_v41, 1 }
 0x18a   : > { %1796 = vrot.lane.b32.xlu1 %v1762_v56, %s10666_s10  ;;  %v1641_v58 = vor.u32 %v1640_v53, %v1636_v52  ;;  %v8316_v11 = vmov 0   ;;  %v1633_v37 = vrot.slane %v1631_v54, 1  ;;  %v1650_v4 = vshll.u32 %v8912_v2, 16 }
 0x18b   : > { %v1279_v20 = vrot.slane %v8316_v11, 7  ;;  %v1759_v63 = vsel %vm10669_vm5, %v1757_v62, %v1758_v31  ;;  %v1629_v1 = vor.u32 %v1628_v57, %v1624_v42  ;;  %v8924_v14 = vsel %vm8662_vm4, 0, %v1394_v7 }
 0x18c   : > { %v1646_v55 = vsel %vm1466_vm6, %v1641_v58, %v1645_v23  ;;  %v1766_v51 = vrot.slane %v8892_v0, 1  ;;  %v1464_v19 = vsel %vm8662_vm4, %v1384_v12, 0  ;;  %v1652_v26 = vrot.slane %v1650_v4, 1 }
 0x18d   : > { %1794 = vrot.lane.b32.xlu0 %v1759_v63, %s10666_s10  ;;  %v1634_v8 = vsel %vm1466_vm6, %v1629_v1, %v1633_v37  ;;  %v1767_v24 = vrot.slane %v8875_v47, 1  ;;  %v8936_v7 = vsel %vm8662_vm4, 0, %v1279_v20  ;;  %v1763_v41 = vrot.slane %v8896_v61, 1 }
 0x18e   : > { %1687 = vrot.lane.b32.xlu1 %v1646_v55, %s10662_s18  ;;  %10737 = vst [vmem:[#allocation32_spill] sm:$0xff] %v8936_v7  ;;  %v1648_v38 = vshrl.u32 %v8912_v2, 16  ;;  %v1655_v62 = vshll.u32 %v1464_v19, 16  ;;  %v1879_v30 = vshll.u32 %v8924_v14, 16  ;;  %v1769_v54 = vrot.slane %v8912_v2, 1 }
 0x18f   : > { %v1768_v12 = vsel %vm10669_vm5, %v1766_v51, %v1767_v24  ;;  %v1764_v47 = vrot.slane %v8883_v59, 1  ;;  %v1449_v52 = vsel %vm8662_vm4, %v1279_v20, 0  ;;  %v1470_v53 = vshll.u32 %v8936_v7, 16 }
 0x190   : > { %v1653_v56 = vor.u32 %v1652_v26, %v1648_v38  ;;  %v1770_v31 = vrot.slane %v1464_v19, 1  ;;  %v1465_v42 = vsel %vm8662_vm4, %v8888_v25, 0  ;;  %v1657_v58 = vrot.slane %v1655_v62, 1 }
 0x191   : > { %1685 = vrot.lane.b32.xlu0 %v1634_v8, %s10662_s18  ;;  %v1765_v57 = vsel %vm10669_vm5, %v1763_v41, %v1764_v47  ;;  %v1881_v23 = vrot.slane %v1879_v30, 1  ;;  %v1892_v59 = vrot.slane %v8924_v14, 1  ;;  %v1468_v63 = vshrl.u32 %v8936_v7, 16 }
 0x192   : > { %1800 = vrot.lane.b32.xlu1 %v1768_v12, %s10666_s10  ;;  %v1771_v11 = vsel %vm10669_vm5, %v1769_v54, %v1770_v31  ;;  %v1475_v20 = vshll.u32 %v1449_v52, 16  ;;  %v1658_v1 = vsel %vm1466_vm6, %v1653_v56, %v1657_v58  ;;  %v1877_v37 = vshrl.u32 %v8924_v14, 16 }
 0x193   : > { %v1884_v25 = vshll.u32 %v1465_v42, 16  ;;  %v1472_v4 = vrot.slane %v1470_v53, 1  ;;  %v1893_v55 = vrot.slane %v1465_v42, 1  ;;  %v1724_v51 = vrot.slane %v8936_v7, 1 }
 0x194   : > { %v1725_v19 = vrot.slane %v1449_v52, 1  ;;  %v1882_v8 = vor.u32 %v1881_v23, %v1877_v37  ;;  %v1477_v38 = vrot.slane %v1475_v20, 1  ;;  %v8164_v23 = vld [vmem:[%s10726_s21 + $0x10] sm:$0xff]  }
 0x195   : > { %1798 = vrot.lane.b32.xlu0 %v1765_v57, %s10666_s10  ;;  %v1894_v26 = vsel %vm10669_vm5, %v1892_v59, %v1893_v55  ;;  %v1886_v24 = vrot.slane %v1884_v25, 1  ;;  %v1473_v41 = vor.u32 %v1472_v4, %v1468_v63  ;;  %v8163_v57 = vld [vmem:[%s10726_s21 + $0x8] sm:$0xff]   ;;  %v8988_v59 = vld [vmem:[%s10726_s21 + $0x30] sm:$0xff]  }
 0x196   : > { %1802 = vrot.lane.b32.xlu1 %v1771_v11, %s10666_s10  ;;  %v1726_v62 = vsel %vm10669_vm5, %v1724_v51, %v1725_v19 }
 0x197   : > { %v1887_v30 = vsel %vm1466_vm6, %v1882_v8, %v1886_v24  ;;  %v1478_v12 = vsel %vm1466_vm6, %v1473_v41, %v1477_v38  ;;  %vm10671_vm6 = vcmask 1041409  }
 0x199   : > { %1689 = vrot.lane.b32.xlu0 %v1658_v1, %s10662_s18 }
 0x19a   : > { %1895 = vrot.lane.b32.xlu1 %v1894_v26, %s10666_s10 }
 0x19d   : > { %1888 = vrot.lane.b32.xlu0 %v1887_v30, %s10662_s18 }
 0x19e   : > { %1772 = vrot.lane.b32.xlu1 %v1726_v62, %s10666_s10 }
 0x1a1   : > { %1659 = vrot.lane.b32.xlu0 %v1478_v12, %s10662_s18 }
 0x1bd   : > { %v1775_v54 = vpop.permute.xlu1 %1774 }
 0x1c1   : > { %v1777_v31 = vpop.permute.xlu1 %1776 }
 0x1c3   : > { %v1662_v47 = vpop.permute.xlu0 %1661 }
 0x1c4   : > { %v1808_v56 = vsel %vm1804_vm7, %v8677_v43, %v1662_v47 }
 0x1c5   : > { %v8973_v52 = vsel %vm1837_vm8, %v1808_v56, %v1775_v54 }
 0x1c6   : > { %7414 = vmatprep.mubr.msk.bf16.mxu1 %vm1926_vm9, %v8973_v52 }
 0x1c7   : > { %v1664_v53 = vpop.permute.xlu0 %1663 }
 0x1c8   : > { %v1810_v42 = vsel %vm1804_vm7, %v8672_v36, %v1664_v53 }
 0x1c9   : > { %v8981_v58 = vsel %vm1837_vm8, %v1810_v42, %v1777_v31 }
 0x1ca   : > { %7415 = vmatmul.mubr.msk.bf16.vlgmr.msra.gmra.mrb[0].mxu1 %vm1926_vm9, %v8981_v58 }
 0x1cb   : > { %7447 = vmatpush3.bf16.msra.mxu1 %v8840_v6 }
 0x1cc   : > { %v1668_v43 = vpop.permute.xlu1 %1667  ;;  %7448 = vmatprep.subr.bf16.mxu1 %v8163_v57 }
 0x1cd   : > { %v1814_v1 = vsel %vm1804_vm7, %v8707_v50, %v1668_v43 }
 0x1cf   : > { %7449 = vmatpush3.bf16.msra.mxu1 %v8163_v57 }
 0x1d0   : > { %7450 = vmatprep.subr.bf16.mxu1 %v8164_v23 }
 0x1d1   : > { %v1666_v11 = vpop.permute.xlu0 %1665 }
 0x1d2   : > { %v1781_v63 = vpop.permute.xlu1 %1780  ;;  %v1812_v36 = vsel %vm1804_vm7, %v8713_v44, %v1666_v11 }
 0x1d3   : > { %7451 = vmatpush3.bf16.msra.mxu1 %v8164_v23  ;;  %v8999_v37 = vsel %vm1837_vm8, %v1814_v1, %v1781_v63 }
 0x1d4   : > { %7484 = vmatprep.subr.bf16.mxu1 %v8988_v59 }
 0x1d5   : > { %v1779_v20 = vpop.permute.xlu0 %1778 }
 0x1d6   : > { %v8996_v6 = vsel %vm1837_vm8, %v1812_v36, %v1779_v20 }
 0x1d7   : > { %7418 = vmatprep.mubr.msk.bf16.mxu1 %vm1926_vm9, %v8996_v6 }
 0x1d8   : > { %7419 = vmatmul.mubr.msk.bf16.gmra.mrb[4].mxu1 %vm1926_vm9, %v8999_v37 }
 0x1d9   : > { %v1672_v25 = vpop.permute.xlu1 %1671 }
 0x1da   : > { %v1818_v50 = vsel %vm1804_vm7, %v8732_v32, %v1672_v25 }
 0x1db   : > { %v1670_v44 = vpop.permute.xlu0 %1669 }
 0x1dc   : > { %v1816_v55 = vsel %vm1804_vm7, %v8748_v3, %v1670_v44 }
 0x1dd   : > { %v1785_v4 = vpop.permute.xlu1 %1784 }
 0x1de   : > { %v9013_v8 = vsel %vm1837_vm8, %v1818_v50, %v1785_v4 }
 0x1df   : > { %v1783_v51 = vpop.permute.xlu0 %1782 }
 0x1e0   : > { %v9010_v19 = vsel %vm1837_vm8, %v1816_v55, %v1783_v51 }
 0x1e1   : > { %7422 = vmatprep.mubr.msk.bf16.mxu1 %vm1926_vm9, %v9010_v19 }
 0x1e2   : > { %7423 = vmatmul.mubr.msk.bf16.gmra.mrb[8].mxu1 %vm1926_vm9, %v9013_v8 }
 0x1e3   : > { %v1676_v26 = vpop.permute.xlu1 %1675 }
 0x1e4   : > { %v1822_v32 = vsel %vm1804_vm7, %v8763_v29, %v1676_v26 }
 0x1e6   : > { %v1674_v24 = vpop.permute.xlu0 %1673 }
 0x1e7   : > { %v1789_v41 = vpop.permute.xlu1 %1788  ;;  %v1820_v3 = vsel %vm1804_vm7, %v8774_v48, %v1674_v24 }
 0x1e8   : > { %v9027_v30 = vsel %vm1837_vm8, %v1822_v32, %v1789_v41 }
 0x1ea   : > { %v1787_v38 = vpop.permute.xlu0 %1786 }
 0x1eb   : > { %v9024_v62 = vsel %vm1837_vm8, %v1820_v3, %v1787_v38 }
 0x1ec   : > { %7426 = vmatprep.mubr.msk.bf16.mxu1 %vm1926_vm9, %v9024_v62 }
 0x1ed   : > { %v1680_v12 = vpop.permute.xlu1 %1679  ;;  %7427 = vmatmul.mubr.msk.bf16.gmra.mrb[12].mxu1 %vm1926_vm9, %v9027_v30 }
 0x1ee   : > { %v1826_v29 = vsel %vm1804_vm7, %v8803_v35, %v1680_v12  ;;  %v8166_v12 = vld [vmem:[%s10726_s21 + $0x38] sm:$0xff]  }
 0x1f0   : > { %v1678_v54 = vpop.permute.xlu0 %1677 }
 0x1f1   : > { %v1824_v48 = vsel %vm1804_vm7, %v8815_v13, %v1678_v54 }
 0x1f2   : > { %v1793_v47 = vpop.permute.xlu1 %1792 }
 0x1f3   : > { %v9041_v31 = vsel %vm1837_vm8, %v1826_v29, %v1793_v47 }
 0x1f4   : > { %v1791_v56 = vpop.permute.xlu0 %1790 }
 0x1f5   : > { %v9038_v53 = vsel %vm1837_vm8, %v1824_v48, %v1791_v56 }
 0x1f6   : > { %7430 = vmatprep.mubr.msk.bf16.mxu1 %vm1926_vm9, %v9038_v53 }
 0x1f7   : > { %7431 = vmatmul.mubr.msk.bf16.gmra.mrb[16].mxu1 %vm1926_vm9, %v9041_v31 }
 0x1f8   : > { %v1684_v42 = vpop.permute.xlu1 %1683 }
 0x1f9   : > { %v1830_v35 = vsel %vm1804_vm7, %v8856_v18, %v1684_v42 }
 0x1fb   : > { %v1682_v57 = vpop.permute.xlu0 %1681 }
 0x1fc   : > { %v1797_v43 = vpop.permute.xlu1 %1796  ;;  %v1828_v13 = vsel %vm1804_vm7, %v8862_v60, %v1682_v57 }
 0x1fd   : > { %v1863_v36 = vsel %vm1837_vm8, %v1830_v35, %v1797_v43 }
 0x1ff   : > { %v1795_v23 = vpop.permute.xlu0 %1794 }
 0x200   : > { %v1861_v11 = vsel %vm1837_vm8, %v1828_v13, %v1795_v23  ;;  %v1688_v63 = vpop.permute.xlu1 %1687 }
 0x201   : > { %7434 = vmatprep.mubr.msk.bf16.mxu1 %vm1926_vm9, %v1861_v11  ;;  %v1834_v60 = vsel %vm1804_vm7, %v8892_v0, %v1688_v63 }
 0x202   : > { %7435 = vmatmul.mubr.msk.bf16.gmra.mrb[20].mxu1 %vm1926_vm9, %v1863_v36 }
 0x203   : > { %v1686_v20 = vpop.permute.xlu0 %1685 }
 0x204   : > { %v1801_v1 = vpop.permute.xlu1 %1800  ;;  %v1832_v25 = vsel %vm1804_vm7, %v8896_v61, %v1686_v20 }
 0x205   : > { %v1867_v55 = vsel %vm1837_vm8, %v1834_v60, %v1801_v1 }
 0x207   : > { %v1799_v44 = vpop.permute.xlu0 %1798 }
 0x208   : > { %v1865_v18 = vsel %vm1837_vm8, %v1832_v25, %v1799_v44  ;;  %v1803_v4 = vpop.permute.xlu1 %1802 }
 0x209   : > { %7438 = vmatprep.mubr.msk.bf16.mxu1 %vm1926_vm9, %v1865_v18 }
 0x20a   : > { %7439 = vmatmul.mubr.msk.bf16.gmra.mrb[24].mxu1 %vm1926_vm9, %v1867_v55 }
 0x20b   : > { %v1690_v51 = vpop.permute.xlu0 %1689 }
 0x20c   : > { %v1836_v50 = vsel %vm1804_vm7, %v8912_v2, %v1690_v51  ;;  %v1896_v26 = vpop.permute.xlu1 %1895 }
 0x20d   : > { %v1869_v61 = vsel %vm1837_vm8, %v1836_v50, %v1803_v4 }
 0x20e   : > { %7442 = vmatprep.mubr.msk.bf16.mxu1 %vm1926_vm9, %v1869_v61 }
 0x20f   : > { %v1889_v0 = vpop.permute.xlu0 %1888 }
 0x210   : > { %v1898_v24 = vsel %vm1804_vm7, %v8924_v14, %v1889_v0  ;;  %v1773_v3 = vpop.permute.xlu1 %1772  ;;  %v8167_v14 = vld [vmem:[%s10726_s21 + $0x40] sm:$0xff]   ;;  %s10811_s21 = sld [smem:[#allocation25_spill]] }
 0x211   : > { %v1900_v41 = vsel %vm1837_vm8, %v1898_v24, %v1896_v26 }
 0x212   : > { %7443 = vmatmul.mubr.msk.bf16.gmra.mrb[28].mxu1 %vm1926_vm9, %v1900_v41 }
 0x213   : > { %v1660_v38 = vpop.permute.xlu0 %1659 }
 0x214   : > { %v1806_v32 = vsel %vm1804_vm7, %v8936_v7, %v1660_v38 }
 0x215   : > { %v1839_v2 = vsel %vm1837_vm8, %v1806_v32, %v1773_v3 }
 0x216   : > { %7452 = vmatprep.mubr.msk.bf16.mxu1 %vm1926_vm9, %v1839_v2 }
 0x21a   : > { %7453 = vmatmul.mubr.msk.bf16.vlgmr.msra.gmra.mrb[0].mxu1 %vm1926_vm9, %v8973_v52  ;;  %v2591_v52 = vld [vmem:[%s10728_s9 + $0x8] sm:$0xff] }
 0x21b   : > { %7456 = vmatprep.mubr.msk.bf16.mxu1 %vm1926_vm9, %v8981_v58  ;;  %7485 = vmatpush3.bf16.msra.mxu1 %v8988_v59 }
 0x21c   : > { %7486 = vmatprep.subr.bf16.mxu1 %v8166_v12  ;;  %2670 = vmatprep.mubr.f32.mxu0 %v2591_v52 }
 0x21f   : > { %7487 = vmatpush3.bf16.msra.mxu1 %v8166_v12 }
 0x220   : > { %7488 = vmatprep.subr.bf16.mxu1 %v8167_v14 }
 0x222   : > { %7457 = vmatmul.mubr.msk.bf16.gmra.mrb[4].mxu1 %vm1926_vm9, %v8996_v6 }
 0x223   : > { %7460 = vmatprep.mubr.msk.bf16.mxu1 %vm1926_vm9, %v8999_v37  ;;  %7489 = vmatpush3.bf16.msra.mxu1 %v8167_v14 }
 0x22a   : > { %7461 = vmatmul.mubr.msk.bf16.gmra.mrb[8].mxu1 %vm1926_vm9, %v9010_v19 }
 0x22b   : > { %7464 = vmatprep.mubr.msk.bf16.mxu1 %vm1926_vm9, %v9013_v8 }
 0x232   : > { %7465 = vmatmul.mubr.msk.bf16.gmra.mrb[12].mxu1 %vm1926_vm9, %v9024_v62 }
 0x233   : > { %7468 = vmatprep.mubr.msk.bf16.mxu1 %vm1926_vm9, %v9027_v30 }
 0x23a   : > { %7469 = vmatmul.mubr.msk.bf16.gmra.mrb[16].mxu1 %vm1926_vm9, %v9038_v53 }
 0x23b   : > { %7472 = vmatprep.mubr.msk.bf16.mxu1 %vm1926_vm9, %v9041_v31 }
 0x242   : > { %7473 = vmatmul.mubr.msk.bf16.gmra.mrb[20].mxu1 %vm1926_vm9, %v1861_v11 }
 0x243   : > { %7476 = vmatprep.mubr.msk.bf16.mxu1 %vm1926_vm9, %v1863_v36 }
 0x24a   : > { %7477 = vmatmul.mubr.msk.bf16.gmra.mrb[24].mxu1 %vm1926_vm9, %v1865_v18 }
 0x24b   : > { %7480 = vmatprep.mubr.msk.bf16.mxu1 %vm1926_vm9, %v1867_v55 }
 0x252   : > { %7481 = vmatmul.mubr.msk.bf16.gmra.mrb[28].mxu1 %vm1926_vm9, %v1869_v61 }
 0x253   : > { %7490 = vmatprep.mubr.msk.bf16.mxu1 %vm1926_vm9, %v8981_v58  ;;  %v9130_v58 = vld [vmem:[%s10738_s25] ss:$0 sm:$0xff]  ;;  %s10818_s25 = sld [smem:[#allocation28_spill]] }
 0x25a   : > { %7491 = vmatmul.mubr.msk.bf16.vlgmr.msra.gmra.mrb[0].mxu1 %vm1926_vm9, %v8996_v6 }
 0x25b   : > { %7494 = vmatprep.mubr.msk.bf16.mxu1 %vm1926_vm9, %v8999_v37 }
 0x262   : > { %7495 = vmatmul.mubr.msk.bf16.gmra.mrb[4].mxu1 %vm1926_vm9, %v9010_v19 }
 0x263   : > { %7498 = vmatprep.mubr.msk.bf16.mxu1 %vm1926_vm9, %v9013_v8 }
 0x26a   : > { %7499 = vmatmul.mubr.msk.bf16.gmra.mrb[8].mxu1 %vm1926_vm9, %v9024_v62 }
 0x26b   : > { %7502 = vmatprep.mubr.msk.bf16.mxu1 %vm1926_vm9, %v9027_v30 }
 0x272   : > { %7503 = vmatmul.mubr.msk.bf16.gmra.mrb[12].mxu1 %vm1926_vm9, %v9038_v53 }
 0x273   : > { %7506 = vmatprep.mubr.msk.bf16.mxu1 %vm1926_vm9, %v9041_v31 }
 0x27a   : > { %7507 = vmatmul.mubr.msk.bf16.gmra.mrb[16].mxu1 %vm1926_vm9, %v1861_v11 }
 0x27b   : > { %7510 = vmatprep.mubr.msk.bf16.mxu1 %vm1926_vm9, %v1863_v36 }
 0x282   : > { %7511 = vmatmul.mubr.msk.bf16.gmra.mrb[20].mxu1 %vm1926_vm9, %v1865_v18 }
 0x283   : > { %7514 = vmatprep.mubr.msk.bf16.mxu1 %vm1926_vm9, %v1867_v55 }
 0x28a   : > { %7515 = vmatmul.mubr.msk.bf16.gmra.mrb[24].mxu1 %vm1926_vm9, %v1869_v61 }
 0x28b   : > { %7518 = vmatprep.mubr.msk.bf16.mxu1 %vm1926_vm9, %v1900_v41 }
 0x292   : > { %7519 = vmatmul.mubr.msk.bf16.gmra.mrb[28].mxu1 %vm1926_vm9, %v1839_v2 }
 0x32d   : > { %v7492_v59 = vpop.f32.mrb[0].mxu1 }
 0x32e   : > { %v2528_v6 = vadd.f32 %v7492_v59, %v9130_v58  ;;  %v2360_v37 = vpop.f32.mrb[1].mxu1 }
 0x32f   : > { %v2526_v19 = vadd.f32 %v9130_v58, %v2360_v37  ;;  %v7493_v8 = vpop.f32.mrb[2].mxu1 }
 0x330   : > { %v2529_v62 = vadd.f32 %v7493_v8, %v9130_v58  ;;  %v2363_v30 = vpop.f32.mrb[3].mxu1  ;;  %v2560_v47 = vmax.f32 %v2528_v6, 0.0 }
 0x331   : > { %v2527_v54 = vadd.f32 %v9130_v58, %v2363_v30  ;;  %v2558_v56 = vmax.f32 %v2526_v19, 0.0 }
 0x332   : > { %v2561_v48 = vmax.f32 %v2529_v62, 0.0 }
 0x333   : > { %v2559_v29 = vmax.f32 %v2527_v54, 0.0 }
 0x334   : > { %v9136_v53 = vpack.c.bf16 %v2561_v48, %v2560_v47 }
 0x335   : > { %v9138_v31 = vpack.c.bf16 %v2559_v29, %v2558_v56  ;;  %v7496_v42 = vpop.f32.mrb[4].mxu1 }
 0x336   : > { %v2532_v57 = vadd.f32 %v7496_v42, %v9130_v58  ;;  %v2376_v43 = vpop.f32.mrb[5].mxu1 }
 0x337   : > { %v2530_v13 = vadd.f32 %v9130_v58, %v2376_v43  ;;  %v7497_v23 = vpop.f32.mrb[6].mxu1 }
 0x338   : > { %v2533_v35 = vadd.f32 %v7497_v23, %v9130_v58  ;;  %v2379_v11 = vpop.f32.mrb[7].mxu1  ;;  %v2564_v36 = vmax.f32 %v2532_v57, 0.0 }
 0x339   : > { %v2531_v63 = vadd.f32 %v9130_v58, %v2379_v11  ;;  %v2562_v1 = vmax.f32 %v2530_v13, 0.0 }
 0x33a   : > { %v2565_v20 = vmax.f32 %v2533_v35, 0.0 }
 0x33b   : > { %v2563_v25 = vmax.f32 %v2531_v63, 0.0 }
 0x33c   : > { %v9144_v44 = vpack.c.bf16 %v2565_v20, %v2564_v36 }
 0x33d   : > { %v9146_v60 = vpack.c.bf16 %v2563_v25, %v2562_v1  ;;  %v7500_v18 = vpop.f32.mrb[8].mxu1 }
 0x33e   : > { %v2536_v4 = vadd.f32 %v7500_v18, %v9130_v58  ;;  %v2392_v55 = vpop.f32.mrb[9].mxu1 }
 0x33f   : > { %v2534_v51 = vadd.f32 %v9130_v58, %v2392_v55  ;;  %v7501_v50 = vpop.f32.mrb[10].mxu1 }
 0x340   : > { %v2537_v61 = vadd.f32 %v7501_v50, %v9130_v58  ;;  %v2395_v26 = vpop.f32.mrb[11].mxu1  ;;  %v2568_v24 = vmax.f32 %v2536_v4, 0.0 }
 0x341   : > { %v2535_v0 = vadd.f32 %v9130_v58, %v2395_v26  ;;  %v2566_v3 = vmax.f32 %v2534_v51, 0.0 }
 0x342   : > { %v2569_v41 = vmax.f32 %v2537_v61, 0.0 }
 0x343   : > { %v2567_v38 = vmax.f32 %v2535_v0, 0.0 }
 0x344   : > { %v9152_v32 = vpack.c.bf16 %v2569_v41, %v2568_v24 }
 0x345   : > { %v9154_v2 = vpack.c.bf16 %v2567_v38, %v2566_v3  ;;  %v7504_v12 = vpop.f32.mrb[12].mxu1 }
 0x346   : > { %v2540_v14 = vadd.f32 %v7504_v12, %v9130_v58  ;;  %v2408_v52 = vpop.f32.mrb[13].mxu1 }
 0x347   : > { %v2538_v59 = vadd.f32 %v9130_v58, %v2408_v52  ;;  %v7505_v6 = vpop.f32.mrb[14].mxu1 }
 0x348   : > { %v2541_v37 = vadd.f32 %v7505_v6, %v9130_v58  ;;  %v2411_v19 = vpop.f32.mrb[15].mxu1  ;;  %v2572_v62 = vmax.f32 %v2540_v14, 0.0 }
 0x349   : > { %v2539_v8 = vadd.f32 %v9130_v58, %v2411_v19  ;;  %v2570_v54 = vmax.f32 %v2538_v59, 0.0 }
 0x34a   : > { %v2573_v30 = vmax.f32 %v2541_v37, 0.0 }
 0x34b   : > { %v2571_v47 = vmax.f32 %v2539_v8, 0.0 }
 0x34c   : > { %v9160_v48 = vpack.c.bf16 %v2573_v30, %v2572_v62 }
 0x34d   : > { %v9162_v56 = vpack.c.bf16 %v2571_v47, %v2570_v54  ;;  %v7508_v29 = vpop.f32.mrb[16].mxu1 }
 0x34e   : > { %v2544_v42 = vadd.f32 %v7508_v29, %v9130_v58  ;;  %v2424_v57 = vpop.f32.mrb[17].mxu1 }
 0x34f   : > { %v2542_v43 = vadd.f32 %v9130_v58, %v2424_v57  ;;  %v7509_v13 = vpop.f32.mrb[18].mxu1 }
 0x350   : > { %v2545_v23 = vadd.f32 %v7509_v13, %v9130_v58  ;;  %v2427_v35 = vpop.f32.mrb[19].mxu1  ;;  %v2576_v63 = vmax.f32 %v2544_v42, 0.0 }
 0x351   : > { %v2543_v11 = vadd.f32 %v9130_v58, %v2427_v35  ;;  %v2574_v20 = vmax.f32 %v2542_v43, 0.0 }
 0x352   : > { %v2577_v36 = vmax.f32 %v2545_v23, 0.0 }
 0x353   : > { %v2575_v1 = vmax.f32 %v2543_v11, 0.0 }
 0x354   : > { %v7835_v25 = vpack.c.bf16 %v2577_v36, %v2576_v63 }
 0x355   : > { %v7831_v18 = vpack.c.bf16 %v2575_v1, %v2574_v20  ;;  %v7512_v4 = vpop.f32.mrb[20].mxu1 }
 0x356   : > { %v2548_v55 = vadd.f32 %v7512_v4, %v9130_v58  ;;  %v2440_v51 = vpop.f32.mrb[21].mxu1 }
 0x357   : > { %v2546_v50 = vadd.f32 %v9130_v58, %v2440_v51  ;;  %v7513_v61 = vpop.f32.mrb[22].mxu1  ;;  %7832 = vmatprep.subr.bf16.mxu0 %v7831_v18  ;;  %v9213_v51 = vld [vmem:[%s10728_s9 + $0x30] sm:$0xff] }
 0x358   : > { %v2549_v26 = vadd.f32 %v7513_v61, %v9130_v58  ;;  %v2443_v0 = vpop.f32.mrb[23].mxu1  ;;  %7834 = vmatpush3.bf16.msra.mxu0 %v9138_v31  ;;  %v2580_v41 = vmax.f32 %v2548_v55, 0.0  ;;  %v9200_v55 = vld [vmem:[%s10728_s9 + $0x28] sm:$0xff]  ;;  %v9221_v61 = vld [vmem:[%s10728_s9 + $0x40] sm:$0xff] }
 0x359   : > { %v2547_v24 = vadd.f32 %v9130_v58, %v2443_v0  ;;  %7836 = vmatprep.subr.bf16.mxu0 %v7835_v25  ;;  %v2578_v38 = vmax.f32 %v2546_v50, 0.0  ;;  %v9216_v50 = vld [vmem:[%s10728_s9 + $0x48] sm:$0xff]  ;;  %v9229_v0 = vld [vmem:[%s10728_s9 + $0x50] sm:$0xff] }
 0x35a   : > { %v2581_v3 = vmax.f32 %v2549_v26, 0.0  ;;  %v9224_v26 = vld [vmem:[%s10728_s9 + $0x58] sm:$0xff] }
 0x35b   : > { %v2579_v12 = vmax.f32 %v2547_v24, 0.0  ;;  %v9232_v24 = vld [vmem:[%s10728_s9 + $0x68] sm:$0xff] }
 0x35c   : > { %v7843_v14 = vpack.c.bf16 %v2581_v3, %v2580_v41  ;;  %7838 = vmatpush3.bf16.msra.mxu0 %v9136_v53  ;;  %v9237_v41 = vld [vmem:[%s10728_s9 + $0x60] sm:$0xff]  ;;  %v9240_v3 = vld [vmem:[%s10728_s9 + $0x78] sm:$0xff] }
 0x35d   : > { %v7839_v52 = vpack.c.bf16 %v2579_v12, %v2578_v38  ;;  %v7516_v59 = vpop.f32.mrb[24].mxu1  ;;  %v9245_v38 = vld [vmem:[%s10728_s9 + $0x70] sm:$0xff]  ;;  %v8168_v12 = vld [vmem:[%s8371_s29] sm:$0xff]  }
 0x35e   : > { %v2552_v6 = vadd.f32 %v7516_v59, %v9130_v58  ;;  %v2456_v37 = vpop.f32.mrb[25].mxu1 }
 0x35f   : > { %v2550_v19 = vadd.f32 %v9130_v58, %v2456_v37  ;;  %v7517_v8 = vpop.f32.mrb[26].mxu1  ;;  %7840 = vmatprep.subr.bf16.mxu0 %v7839_v52 }
 0x360   : > { %v2553_v31 = vadd.f32 %v7517_v8, %v9130_v58  ;;  %v2459_v62 = vpop.f32.mrb[27].mxu1  ;;  %7842 = vmatpush3.bf16.msra.mxu0 %v9146_v60  ;;  %v2584_v54 = vmax.f32 %v2552_v6, 0.0 }
 0x361   : > { %v2551_v30 = vadd.f32 %v9130_v58, %v2459_v62  ;;  %7844 = vmatprep.subr.bf16.mxu0 %v7843_v14  ;;  %v2582_v53 = vmax.f32 %v2550_v19, 0.0 }
 0x362   : > { %v2585_v47 = vmax.f32 %v2553_v31, 0.0 }
 0x363   : > { %v2583_v29 = vmax.f32 %v2551_v30, 0.0 }
 0x364   : > { %v7851_v42 = vpack.c.bf16 %v2585_v47, %v2584_v54  ;;  %7846 = vmatpush3.bf16.msra.mxu0 %v9144_v44 }
 0x365   : > { %v7847_v57 = vpack.c.bf16 %v2583_v29, %v2582_v53  ;;  %v7520_v43 = vpop.f32.mrb[28].mxu1 }
 0x366   : > { %v2556_v13 = vadd.f32 %v7520_v43, %v9130_v58  ;;  %v2472_v23 = vpop.f32.mrb[29].mxu1 }
 0x367   : > { %v2554_v35 = vadd.f32 %v9130_v58, %v2472_v23  ;;  %v7521_v11 = vpop.f32.mrb[30].mxu1  ;;  %7848 = vmatprep.subr.bf16.mxu0 %v7847_v57 }
 0x368   : > { %v2557_v60 = vadd.f32 %v7521_v11, %v9130_v58  ;;  %v2475_v63 = vpop.f32.mrb[31].mxu1  ;;  %7850 = vmatpush3.bf16.msra.mxu0 %v9154_v2  ;;  %v2588_v44 = vmax.f32 %v2556_v13, 0.0  ;;  %v9192_v2 = vld [vmem:[%s10728_s9 + $0x18] sm:$0xff] }
 0x369   : > { %v2555_v36 = vadd.f32 %v9130_v58, %v2475_v63  ;;  %7852 = vmatprep.subr.bf16.mxu0 %v7851_v42  ;;  %v2586_v1 = vmax.f32 %v2554_v35, 0.0  ;;  %v9189_v58 = vld [vmem:[%s10728_s9] sm:$0xff] }
 0x36a   : > { %v2589_v20 = vmax.f32 %v2557_v60, 0.0 }
 0x36b   : > { %v2587_v25 = vmax.f32 %v2555_v36, 0.0 }
 0x36c   : > { %v7859_v18 = vpack.c.bf16 %v2589_v20, %v2588_v44  ;;  %7854 = vmatpush3.bf16.msra.mxu0 %v9152_v32  ;;  %v9197_v32 = vld [vmem:[%s10728_s9 + $0x10] sm:$0xff] }
 0x36d   : > { %v7855_v4 = vpack.c.bf16 %v2587_v25, %v2586_v1 }
 0x36f   : > { %7856 = vmatprep.subr.bf16.mxu0 %v7855_v4  ;;  %v10634_v4 = vmov 0.0  }
 0x370   : > { %7858 = vmatpush3.bf16.msra.mxu0 %v9162_v56  ;;  %v9208_v56 = vld [vmem:[%s10728_s9 + $0x38] sm:$0xff] }
 0x371   : > { %7860 = vmatprep.subr.bf16.mxu0 %v7859_v18  ;;  %v9254_v18 = vld [vmem:[%s10739_s8] sm:$0xff]   ;;  %s10793_s8 = smov 8  }
 0x374   : > { %7862 = vmatpush3.bf16.msra.mxu0 %v9160_v48  ;;  %v9205_v48 = vld [vmem:[%s10728_s9 + $0x20] sm:$0xff] }
 0x375   : > { %7522 = vmatprep.subr.bf16.mxu0 %v8168_v12 }
 0x377   : > { %2671 = vmatmul.mubr.f32.vlgmr.msra.gmra.mrb[32].mxu0 %v9189_v58 }
 0x378   : > { %2675 = vmatprep.mubr.f32.mxu0 %v9192_v2  ;;  %7523 = vmatpush3.bf16.msra.mxu0 %v8168_v12 }
 0x379   : > { %7532 = vmatprep.subr.bf16.mxu0 %v10634_v4 }
 0x37b   : > { %2676 = vmatmul.mubr.f32.gmra.mrb[34].mxu0 %v9197_v32 }
 0x37c   : > { %2680 = vmatprep.mubr.f32.mxu0 %v9200_v55 }
 0x37f   : > { %2681 = vmatmul.mubr.f32.gmra.mrb[36].mxu0 %v9205_v48 }
 0x380   : > { %2685 = vmatprep.mubr.f32.mxu0 %v9208_v56 }
 0x383   : > { %2686 = vmatmul.mubr.f32.gmra.mrb[38].mxu0 %v9213_v51 }
 0x384   : > { %2690 = vmatprep.mubr.f32.mxu0 %v9216_v50 }
 0x387   : > { %2691 = vmatmul.mubr.f32.gmra.mrb[40].mxu0 %v9221_v61 }
 0x388   : > { %2695 = vmatprep.mubr.f32.mxu0 %v9224_v26 }
 0x38b   : > { %2696 = vmatmul.mubr.f32.gmra.mrb[42].mxu0 %v9229_v0 }
 0x38c   : > { %2700 = vmatprep.mubr.f32.mxu0 %v9232_v24 }
 0x38f   : > { %2701 = vmatmul.mubr.f32.gmra.mrb[44].mxu0 %v9237_v41 }
 0x390   : > { %2705 = vmatprep.mubr.f32.mxu0 %v9240_v3 }
 0x393   : > { %2706 = vmatmul.mubr.f32.gmra.mrb[46].mxu0 %v9245_v38 }
 0x44a   : > { %v7153_v14 = vpop.f32.mrb[32].mxu0 }
 0x44b   : > { %v7154_v52 = vpop.f32.mrb[33].mxu0 }
 0x44c   : > { %v7155_v59 = vadd.f32 %v7154_v52, %v7153_v14 }
 0x44e   : > { %v7156_v6 = vpop.f32.mrb[34].mxu0 }
 0x44f   : > { %v7157_v37 = vpop.f32.mrb[35].mxu0 }
 0x450   : > { %v7158_v19 = vadd.f32 %v7157_v37, %v7156_v6 }
 0x452   : > { %v2711_v8 = vpack.c.bf16 %v7158_v19, %v7155_v59  ;;  %v7159_v31 = vpop.f32.mrb[36].mxu0  ;;  %v6863_v59 = vld [vmem:[%s10740_s3] ss:$0 sm:$0xff]  ;;  %s10763_s3 = sld [smem:[#allocation19_spill]] }
 0x453   : > { %v7160_v62 = vpop.f32.mrb[37].mxu0 }
 0x454   : > { %v7161_v30 = vadd.f32 %v7160_v62, %v7159_v31  ;;  %7524 = vmatprep.mubr.msk.bf16.mxu0 %vm1804_vm7, %v2711_v8 }
 0x456   : > { %v7162_v54 = vpop.f32.mrb[38].mxu0 }
 0x457   : > { %v7163_v47 = vpop.f32.mrb[39].mxu0 }
 0x458   : > { %v7164_v53 = vadd.f32 %v7163_v47, %v7162_v54 }
 0x45a   : > { %v2712_v29 = vpack.c.bf16 %v7164_v53, %v7161_v30  ;;  %v7165_v42 = vpop.f32.mrb[40].mxu0 }
 0x45b   : > { %v7166_v57 = vpop.f32.mrb[41].mxu0 }
 0x45c   : > { %v7167_v43 = vadd.f32 %v7166_v57, %v7165_v42  ;;  %7525 = vmatmul.mubr.msk.bf16.vlgmr.msra.gmra.mrb[48].mxu0 %vm1804_vm7, %v2712_v29 }
 0x45d   : > { %7533 = vmatpush3.bf16.msra.mxu0 %v9254_v18 }
 0x45e   : > { %v7168_v13 = vpop.f32.mrb[42].mxu0  ;;  %7538 = vmatprep.subr.bf16.mxu0 %v10634_v4 }
 0x45f   : > { %v7169_v23 = vpop.f32.mrb[43].mxu0 }
 0x460   : > { %v7170_v35 = vadd.f32 %v7169_v23, %v7168_v13 }
 0x462   : > { %v2713_v11 = vpack.c.bf16 %v7170_v35, %v7167_v43  ;;  %v7171_v60 = vpop.f32.mrb[44].mxu0 }
 0x463   : > { %v7172_v63 = vpop.f32.mrb[45].mxu0 }
 0x464   : > { %v7173_v36 = vadd.f32 %v7172_v63, %v7171_v60  ;;  %7528 = vmatprep.mubr.msk.bf16.mxu0 %vm1804_vm7, %v2713_v11 }
 0x466   : > { %v7174_v44 = vpop.f32.mrb[46].mxu0 }
 0x467   : > { %v7175_v20 = vpop.f32.mrb[47].mxu0 }
 0x468   : > { %v7176_v1 = vadd.f32 %v7175_v20, %v7174_v44 }
 0x46a   : > { %v2714_v25 = vpack.c.bf16 %v7176_v1, %v7173_v36 }
 0x46c   : > { %7529 = vmatmul.mubr.msk.bf16.gmra.mrb[52].mxu0 %vm1804_vm7, %v2714_v25 }
 0x46d   : > { %7534 = vmatprep.mubr.msk.bf16.mxu0 %vm10689_vm10, %v10634_v4 }
 0x52f   : > { %v7526_v12 = vpop.f32.mrb[48].mxu0 }
 0x530   : > { %v2776_v14 = vpop.f32.mrb[49].mxu0  ;;  %v9268_v31 = vadd.f32 %v7526_v12, %v6863_v59 }
 0x531   : > { %v7527_v52 = vpop.f32.mrb[50].mxu0  ;;  %v9264_v19 = vadd.f32 %v6863_v59, %v2776_v14 }
 0x532   : > { %v2779_v6 = vpop.f32.mrb[51].mxu0  ;;  %v2810_v54 = vsel %vm1804_vm7, %v9268_v31, 0.0  ;;  %v9274_v47 = vadd.f32 %v7527_v52, %v6863_v59  ;;  %v2832_v35 = vsel %vm1804_vm7, %v9268_v31, -inf }
 0x533   : > { %v9262_v37 = vadd.f32 %v6863_v59, %v2779_v6  ;;  %v2807_v62 = vsel %vm1804_vm7, %v9264_v19, 0.0  ;;  %v2830_v44 = vsel %vm1804_vm7, %v9264_v19, -inf }
 0x534   : > { %v2812_v43 = vsel %vm1804_vm7, %v9274_v47, 0.0  ;;  %v2833_v12 = vsel %vm1804_vm7, %v9274_v47, -inf }
 0x535   : > { %v2808_v8 = vsel %vm1804_vm7, %v9262_v37, 0.0  ;;  %v2831_v14 = vsel %vm1804_vm7, %v9262_v37, -inf }
 0x536   : > { %v2809_v30 = vadd.f32 %v2808_v8, %v2807_v62 }
 0x538   : > { %v2811_v53 = vadd.f32 %v2810_v54, %v2809_v30 }
 0x53a   : > { %v2813_v60 = vadd.f32 %v2812_v43, %v2811_v53 }
 0x53f   : > { %v7530_v29 = vpop.f32.mrb[52].mxu0 }
 0x540   : > { %v9276_v42 = vadd.f32 %v7530_v29, %v6863_v59  ;;  %v2792_v57 = vpop.f32.mrb[53].mxu0 }
 0x541   : > { %v9280_v13 = vadd.f32 %v6863_v59, %v2792_v57  ;;  %v7531_v23 = vpop.f32.mrb[54].mxu0 }
 0x542   : > { %v2838_v11 = vsel %vm1804_vm7, %v9276_v42, -inf  ;;  %v9286_v63 = vadd.f32 %v7531_v23, %v6863_v59  ;;  %v2795_v36 = vpop.f32.mrb[55].mxu0  ;;  %v2818_v57 = vsel %vm1804_vm7, %v9276_v42, 0.0 }
 0x543   : > { %v2814_v20 = vsel %vm1804_vm7, %v9280_v13, 0.0  ;;  %v2834_v1 = vsel %vm1804_vm7, %v9280_v13, -inf  ;;  %v9294_v25 = vadd.f32 %v6863_v59, %v2795_v36  ;;  %v2839_v8 = vmax.f32 %v2832_v35, %v2838_v11 }
 0x544   : > { %v2815_v52 = vadd.f32 %v2814_v20, %v2813_v60  ;;  %v2840_v6 = vsel %vm1804_vm7, %v9286_v63, -inf  ;;  %v2835_v59 = vmax.f32 %v2830_v44, %v2834_v1  ;;  %v2820_v36 = vsel %vm1804_vm7, %v9286_v63, 0.0 }
 0x545   : > { %v2841_v62 = vmax.f32 %v2833_v12, %v2840_v6  ;;  %v2816_v30 = vsel %vm1804_vm7, %v9294_v25, 0.0  ;;  %v2836_v54 = vsel %vm1804_vm7, %v9294_v25, -inf }
 0x546   : > { %v2817_v53 = vadd.f32 %v2816_v30, %v2815_v52  ;;  %v2837_v29 = vmax.f32 %v2831_v14, %v2836_v54  ;;  %v10742_v54 = vmov 0.0  }
 0x547   : > { %v2843_v43 = vmax.f32 %v2839_v8, %v2841_v62 }
 0x548   : > { %v2819_v23 = vadd.f32 %v2818_v57, %v2817_v53  ;;  %v2842_v60 = vmax.f32 %v2835_v59, %v2837_v29 }
 0x54a   : > { %v2821_v35 = vadd.f32 %v2820_v36, %v2819_v23  ;;  %v2844_v11 = vmax.f32 %v2842_v60, %v2843_v43 }
 0x54c   : > { %v2822_v20 = vrot.slane %v2821_v35, 4  ;;  %v2845_v12 = vrot.slane %v2844_v11, 4 }
 0x54e   : > { %v2823_v6 = vadd.f32 %v2822_v20, %v2821_v35  ;;  %v2846_v4 = vmax.f32 %v2844_v11, %v2845_v12 }
 0x550   : > { %v2824_v7 = vrot.slane %v2823_v6, 2  ;;  %v2847_v44 = vrot.slane %v2846_v4, 2 }
 0x552   : > { %v2825_v17 = vadd.f32 %v2824_v7, %v2823_v6  ;;  %v2848_v52 = vmax.f32 %v2846_v4, %v2847_v44 }
 0x554   : > { %v2826_v1 = vrot.slane %v2825_v17, 1  ;;  %v2849_v62 = vrot.slane %v2848_v52, 1 }
 0x556   : > { %v2827_v14 = vadd.f32 %v2826_v1, %v2825_v17  ;;  %v2850_v59 = vmax.f32 %v2848_v52, %v2849_v62  ;;  %v2905_v17 = vld [vmem:[%s10741_s14] sm:$0x1]  ;;  %v3049_v62 = vlaneseq  ;;  %s10800_s14 = smov 88  }
 0x557   : > { %v2958_v7 = vsel %vm10676_vm2, %v2905_v17, 0  ;;  %vm10683_vm2 = vcmask 850944  }
 0x558   : > { %v2829_v30 = vmul.f32 0.015625, %v2827_v14  ;;  %v2906_v53 = vpack.c.bf16 %v2850_v59, %v2850_v59  ;;  %v9327_v59 = vshrl.u32 %v3049_v62, 7 }
 0x55a   : > { %v2851_v8 = vpack.c.bf16 %v2829_v30, %v2829_v30 }
 0x55c   : > { %7535 = vmatmul.mubr.msk.bf16.vlgmr.msra.gmra.mrb[56].mxu0 %vm1804_vm7, %v2851_v8 }
 0x55d   : > { %7539 = vmatpush3.bf16.msra.mxu0 %v9254_v18  ;;  %7540 = vmatprep.mubr.msk.bf16.mxu0 %vm10689_vm10, %v10742_v54 }
 0x55e   : > { %7544 = vmatprep.subr.bf16.mxu0 %v10742_v54 }
 0x564   : > { %7541 = vmatmul.mubr.msk.bf16.vlgmr.msra.gmra.mrb[60].mxu0 %vm1804_vm7, %v2906_v53  ;;  %v9330_v53 = vsub.s32 0, %v9327_v59 }
 0x565   : > { %7546 = vmatprep.mubr.msk.bf16.mxu0 %vm10689_vm10, %v10742_v54  ;;  %7545 = vmatpush3.bf16.msra.mxu0 %v2958_v7 }
 0x566   : > { %7550 = vmatprep.subr.bf16.mxu0 %v10742_v54 }
 0x62f   : > { %v2897_v4 = vpop.f32.mrb[56].mxu0 }
 0x630   : > { %v7536_v18 = vpop.f32.mrb[57].mxu0  ;;  %v2903_v20 = vmax.f32 %v2897_v4, 0.0 }
 0x631   : > { %v2900_v29 = vpop.f32.mrb[58].mxu0 }
 0x632   : > { %v7537_v57 = vpop.f32.mrb[59].mxu0  ;;  %v2904_v12 = vpack.c.bf16 %v2903_v20, %v2903_v20 }
 0x637   : > { %v2944_v43 = vpop.f32.mrb[60].mxu0 }
 0x638   : > { %v2950_v23 = vmax.f32 %v2944_v43, 0.0  ;;  %v7542_v60 = vpop.f32.mrb[61].mxu0 }
 0x639   : > { %v2947_v36 = vpop.f32.mrb[62].mxu0 }
 0x63a   : > { %v2951_v35 = vpack.c.bf16 %v2950_v23, %v2950_v23  ;;  %v7543_v11 = vpop.f32.mrb[63].mxu0 }
 0x63c   : > { %7547 = vmatmul.mubr.msk.bf16.vlgmr.msra.gmra.mrb[64].mxu0 %vm10646_vm11, %v2951_v35 }
 0x63d   : > { %7551 = vmatpush3.bf16.msra.mxu0 %v2958_v7  ;;  %7552 = vmatprep.mubr.msk.bf16.mxu0 %vm10689_vm10, %v10742_v54 }
 0x648   : > { %7553 = vmatmul.mubr.msk.bf16.vlgmr.msra.gmra.mrb[64].mxu0 %vm10646_vm11, %v2904_v12  ;;  %vm10647_vm11 = vcmask 1042434  }
 0x649   : > { %7584 = vmatprep.mubr.msk.f32.mxu0 %vm10689_vm10, %v10742_v54 }
 0x71b   : > { %v3037_v6 = vpop.f32.mrb[64].mxu0 }
 0x71c   : > { %v6874_v44 = vmul.f32 -1.442695, %v3037_v6  ;;  %v7554_v1 = vpop.f32.mrb[65].mxu0 }
 0x71d   : > { %v3040_v14 = vpop.f32.mrb[66].mxu0 }
 0x71e   : > { %8194 = vpow2.f32 %v6874_v44  ;;  %v7555_v52 = vpop.f32.mrb[67].mxu0 }
 0x728   : > { %v8195_v30 = vpop.eup %8194 }
 0x729   : > { %v3046_v8 = vadd.f32 1.0, %v8195_v30 }
 0x72b   : > { %8196 = vrcp.f32 %v3046_v8 }
 0x735   : > { %v8197_v17 = vpop.eup %8196 }
 0x736   : > { %v3052_v7 = vrot.slane %v8197_v17, %v9330_v53 }
 0x738   : > { %v9334_v4 = vmul.f32 %v3052_v7, %v9262_v37  ;;  %v9337_v18 = vmul.f32 %v3052_v7, %v9264_v19  ;;  %v9344_v43 = vmul.f32 %v3052_v7, %v9294_v25  ;;  %v9347_v23 = vmul.f32 %v3052_v7, %v9268_v31 }
 0x739   : > { %v9354_v60 = vmul.f32 %v3052_v7, %v9280_v13  ;;  %v9357_v36 = vmul.f32 %v3052_v7, %v9274_v47  ;;  %v9364_v35 = vmul.f32 %v3052_v7, %v9276_v42  ;;  %v9371_v11 = vmul.f32 %v3052_v7, %v9286_v63 }
 0x73a   : > { %v3064_v29 = vsel %vm1804_vm7, %v9334_v4, 0.0  ;;  %v3061_v57 = vsel %vm1804_vm7, %v9337_v18, 0.0  ;;  %10743 = vst [vmem:[#allocation33_spill] sm:$0xff] %v9344_v43  ;;  %v3076_v37 = vsel %vm1804_vm7, %v9344_v43, 0.0  ;;  %v3067_v19 = vsel %vm1804_vm7, %v9347_v23, 0.0 }
 0x73b   : > { %3065 = vadd.xlane.f32.xlu1 %v3064_v29  ;;  %3062 = vadd.xlane.f32.xlu0 %v3061_v57  ;;  %10744 = vst [vmem:[#allocation34_spill] sm:$0xff] %v9354_v60  ;;  %v3073_v31 = vsel %vm1804_vm7, %v9354_v60, 0.0  ;;  %v3070_v25 = vsel %vm1804_vm7, %v9357_v36, 0.0  ;;  %10745 = vst [vmem:[#allocation35_spill] sm:$0xff] %v9364_v35  ;;  %v3094_v13 = vsel %vm1804_vm7, %v9337_v18, -inf  ;;  %v3079_v47 = vsel %vm1804_vm7, %v9364_v35, 0.0 }
 0x73c   : > { %10746 = vst [vmem:[#allocation36_spill] sm:$0xff] %v9371_v11  ;;  %v3100_v20 = vsel %vm1804_vm7, %v9347_v23, -inf  ;;  %v3082_v42 = vsel %vm1804_vm7, %v9371_v11, 0.0  ;;  %v3109_v12 = vsel %vm1804_vm7, %v9344_v43, -inf  ;;  %v3097_v6 = vsel %vm1804_vm7, %v9334_v4, -inf }
 0x73d   : > { %v3106_v63 = vsel %vm1804_vm7, %v9354_v60, -inf  ;;  %v3103_v44 = vsel %vm1804_vm7, %v9357_v36, -inf  ;;  %v3112_v1 = vsel %vm1804_vm7, %v9364_v35, -inf  ;;  %v3115_v14 = vsel %vm1804_vm7, %v9371_v11, -inf }
 0x73f   : > { %3077 = vadd.xlane.f32.xlu1 %v3076_v37  ;;  %3068 = vadd.xlane.f32.xlu0 %v3067_v19  ;;  %v3127_v19 = vand.u32 127, %v3049_v62 }
 0x743   : > { %3074 = vadd.xlane.f32.xlu1 %v3073_v31  ;;  %3071 = vadd.xlane.f32.xlu0 %v3070_v25 }
 0x747   : > { %3095 = vmax.xlane.f32.xlu1 %v3094_v13  ;;  %3080 = vadd.xlane.f32.xlu0 %v3079_v47  ;;  %v3332_v13 = vld [vmem:[%s10727_s19] sm:$0xff]  ;;  %v3333_v47 = vld [vmem:[%s10727_s19 + $0x8] sm:$0xff] }
 0x74b   : > { %3101 = vmax.xlane.f32.xlu1 %v3100_v20  ;;  %3083 = vadd.xlane.f32.xlu0 %v3082_v42  ;;  %v7864_v20 = vpack.c.bf16 %v3333_v47, %v3332_v13  ;;  %v9392_v42 = vsub.s32 %v3127_v19, %v9327_v59 }
 0x74f   : > { %3110 = vmax.xlane.f32.xlu1 %v3109_v12  ;;  %3098 = vmax.xlane.f32.xlu0 %v3097_v6  ;;  %v10641_v12 = vmov 0.0|0.0  }
 0x750   : > { %7863 = vmatprep.subr.bf16.mxu0 %v10641_v12 }
 0x751   : > { %7865 = vmatpush3.bf16.msra.mxu0 %v7864_v20 }
 0x752   : > { %7866 = vmatprep.subr.bf16.mxu0 %v10641_v12 }
 0x753   : > { %3107 = vmax.xlane.f32.xlu1 %v3106_v63  ;;  %3104 = vmax.xlane.f32.xlu0 %v3103_v44 }
 0x757   : > { %3113 = vmax.xlane.f32.xlu0 %v3112_v1 }
 0x75b   : > { %3116 = vmax.xlane.f32.xlu0 %v3115_v14 }
 0x7c8   : > { %v3066_v52 = vpop.xlane.xlu1 %3065  ;;  %v3063_v30 = vpop.xlane.xlu0 %3062 }
 0x7c9   : > { %v3087_v62 = vmul.f32 0.0625, %v3066_v52  ;;  %v3086_v14 = vmul.f32 0.0625, %v3063_v30 }
 0x7cb   : > { %v3135_v30 = vrot.slane %v3087_v62, %v9392_v42 }
 0x7cc   : > { %v3078_v8 = vpop.xlane.xlu1 %3077  ;;  %v3069_v17 = vpop.xlane.xlu0 %3068 }
 0x7cd   : > { %v3088_v13 = vmul.f32 0.0625, %v3069_v17  ;;  %v3131_v17 = vrot.slane %v3086_v14, %v9392_v42  ;;  %v3091_v35 = vmul.f32 0.0625, %v3078_v8 }
 0x7d0   : > { %v3075_v7 = vpop.xlane.xlu1 %3074  ;;  %v3072_v29 = vpop.xlane.xlu0 %3071 }
 0x7d1   : > { %v3089_v47 = vmul.f32 0.0625, %v3072_v29  ;;  %v3335_v29 = vld [vmem:[%s10727_s19 + $0x18] sm:$0xff] }
 0x7d4   : > { %v3096_v57 = vpop.xlane.xlu1 %3095  ;;  %v3081_v37 = vpop.xlane.xlu0 %3080 }
 0x7d5   : > { %v3188_v44 = vrot.slane %v3096_v57, %v9392_v42  ;;  %v3092_v54 = vmul.f32 0.0625, %v3081_v37  ;;  %v3139_v37 = vrot.slane %v3088_v13, %v9392_v42  ;;  %v3151_v13 = vrot.slane %v3091_v35, %v9392_v42 }
 0x7d8   : > { %v3102_v31 = vpop.xlane.xlu1 %3101  ;;  %v3084_v25 = vpop.xlane.xlu0 %3083 }
 0x7d9   : > { %v3196_v20 = vrot.slane %v3102_v31, %v9392_v42  ;;  %v3090_v31 = vmul.f32 0.0625, %v3075_v7  ;;  %v3161_v7 = vsel %vm10675_vm12, %v3135_v30, %v3131_v17 }
 0x7dc   : > { %v3111_v6 = vpop.xlane.xlu1 %3110  ;;  %v3099_v63 = vpop.xlane.xlu0 %3098 }
 0x7dd   : > { %v3192_v1 = vrot.slane %v3099_v63, %v9392_v42  ;;  %v3093_v63 = vmul.f32 0.0625, %v3084_v25  ;;  %v3155_v25 = vrot.slane %v3092_v54, %v9392_v42  ;;  %v10747_v54 = vmov 0.0|0.0  }
 0x7de   : > { %v3208_v35 = vrot.slane %v3111_v6, %v9392_v42 }
 0x7df   : > { %v3217_v19 = vsel %vm10675_vm12, %v3192_v1, %v3188_v44  ;;  %v3334_v1 = vld [vmem:[%s10727_s19 + $0x10] sm:$0xff]  ;;  %v3159_v8 = vrot.slane %v3093_v63, %v9392_v42  ;;  %v3336_v63 = vld [vmem:[%s10727_s19 + $0x20] sm:$0xff]  ;;  %vm10688_vm12 = vcmask 785408  }
 0x7e0   : > { %v3108_v43 = vpop.xlane.xlu1 %3107  ;;  %v3105_v57 = vpop.xlane.xlu0 %3104  ;;  %v3218_v44 = vsel %vm10673_vm13, %v3196_v20, %v3217_v19  ;;  %v7867_v60 = vpack.c.bf16 %v3335_v29, %v3334_v1 }
 0x7e1   : > { %v3204_v12 = vrot.slane %v3108_v43, %v9392_v42  ;;  %v3200_v52 = vrot.slane %v3105_v57, %v9392_v42  ;;  %v3143_v43 = vrot.slane %v3089_v47, %v9392_v42  ;;  %v3169_v47 = vsel %vm10671_vm6, %v3155_v25, %v3151_v13 }
 0x7e2   : > { %7868 = vmatpush3.bf16.msra.mxu0 %v7867_v60  ;;  %v3171_v30 = vsel %vm10647_vm11, %v3159_v8, %v3169_v47 }
 0x7e3   : > { %v3219_v11 = vsel %vm10672_vm14, %v3200_v52, %v3218_v44  ;;  %7869 = vmatprep.subr.bf16.mxu0 %v10747_v54  ;;  %v3337_v52 = vld [vmem:[%s10727_s19 + $0x28] sm:$0xff]  ;;  %v9437_v6 = vsel %vm10670_vm3, %v3171_v30, 0.0 }
 0x7e4   : > { %v3220_v62 = vsel %vm10652_vm15, %v3204_v12, %v3219_v11  ;;  %v3114_v57 = vpop.xlane.xlu0 %3113  ;;  %v3163_v11 = vsel %vm10673_vm13, %v3139_v37, %v3161_v7  ;;  %v3147_v12 = vrot.slane %v3090_v31, %v9392_v42  ;;  %v7870_v44 = vpack.c.bf16 %v3337_v52, %v3336_v63  ;;  %v3338_v31 = vld [vmem:[%s10727_s19 + $0x30] sm:$0xff] }
 0x7e5   : > { %v9414_v14 = vsel %vm10670_vm3, 0.0, %v3220_v62  ;;  %v3212_v19 = vrot.slane %v3114_v57, %v9392_v42  ;;  %v3165_v60 = vsel %vm10672_vm14, %v3143_v43, %v3163_v11  ;;  %v3339_v43 = vld [vmem:[%s10727_s19 + $0x38] sm:$0xff]  ;;  %v3231_v47 = vrot.slane %v9437_v6, 1 }
 0x7e6   : > { %3270 = vrot.lane.b32.xlu0 %v9414_v14, %s10648_s1  ;;  %v3167_v29 = vsel %vm10652_vm15, %v3147_v12, %v3165_v60  ;;  %7871 = vmatpush3.bf16.msra.mxu0 %v7870_v44  ;;  %v7873_v62 = vpack.c.bf16 %v3339_v43, %v3338_v31  ;;  %v3280_v57 = vrot.slane %v9414_v14, 2  ;;  %v3274_v7 = vrot.slane %v9414_v14, 1  ;;  %s10655_s1 = smov 64   ;;  %v3343_v31 = vld [vmem:[%s10727_s19 + $0x58] sm:$0xff] }
 0x7e7   : > { %v3221_v1 = vsel %vm10671_vm6, %v3212_v19, %v3208_v35  ;;  %7872 = vmatprep.subr.bf16.mxu0 %v10747_v54  ;;  %v9448_v19 = vsel %vm10670_vm3, 0.0, %v3167_v29  ;;  %v3238_v60 = vrot.slane %v9437_v6, 2  ;;  %v3340_v35 = vld [vmem:[%s10727_s19 + $0x40] sm:$0xff]  ;;  %v3245_v29 = vrot.slane %v9437_v6, 3 }
 0x7e8   : > { %v3117_v20 = vpop.xlane.xlu0 %3116  ;;  %v3237_v52 = vrot.slane %v9448_v19, 2  ;;  %v3230_v30 = vrot.slane %v9448_v19, 1  ;;  %vm3243_vm15 = vcmask 1044480   ;;  %v3256_v43 = vrot.slane %v9448_v19, 5 }
 0x7e9   : > { %v3216_v17 = vrot.slane %v3117_v20, %v9392_v42  ;;  %v3341_v20 = vld [vmem:[%s10727_s19 + $0x48] sm:$0xff]  ;;  %vm10694_vm6 = vcmask 523264   ;;  %vm10693_vm14 = vcmask 588800   ;;  %vm10692_vm13 = vcmask 654336  }
 0x7ea   : > { %7874 = vmatpush3.bf16.msra.mxu0 %v7873_v62  ;;  %v7876_v63 = vpack.c.bf16 %v3341_v20, %v3340_v35  ;;  %v3232_v44 = vsel %vm10669_vm5, %v3230_v30, %v3231_v47  ;;  %v3244_v62 = vrot.slane %v9448_v19, 3  ;;  %v3292_v35 = vrot.slane %v9414_v14, 4 }
 0x7eb   : > { %v3222_v37 = vsel %vm10647_vm11, %v3216_v17, %v3221_v1  ;;  %vm10659_vm11 = vcmask 1045504   ;;  %7875 = vmatprep.subr.bf16.mxu0 %v10747_v54  ;;  %v3257_v1 = vrot.slane %v9437_v6, 5  ;;  %v3250_v20 = vrot.slane %v9448_v19, 4 }
 0x7ec   : > { %v9440_v25 = vsel %vm10670_vm3, %v3222_v37, 0.0  ;;  %v3239_v17 = vsel %vm10659_vm11, %v3237_v52, %v3238_v60  ;;  %v3342_v37 = vld [vmem:[%s10727_s19 + $0x50] sm:$0xff]  ;;  %v3345_v60 = vld [vmem:[%s10727_s19 + $0x68] sm:$0xff] }
 0x7ed   : > { %v3281_v8 = vrot.slane %v9440_v25, 2  ;;  %v3275_v13 = vrot.slane %v9440_v25, 1  ;;  %v3305_v30 = vrot.slane %v9440_v25, 6 }
 0x7ee   : > { %7877 = vmatpush3.bf16.msra.mxu0 %v7876_v63 }
 0x7ef   : > { %v3282_v11 = vsel %vm10659_vm11, %v3280_v57, %v3281_v8  ;;  %v3276_v12 = vsel %vm10669_vm5, %v3274_v7, %v3275_v13  ;;  %7878 = vmatprep.subr.bf16.mxu0 %v10747_v54  ;;  %v7879_v57 = vpack.c.bf16 %v3343_v31, %v3342_v37  ;;  %v3258_v8 = vsel %vm10670_vm3, %v3256_v43, %v3257_v1 }
 0x7f0   : > { %3283 = vrot.lane.b32.xlu0 %v3282_v11, %s10650_s7  ;;  %3277 = vrot.lane.b32.xlu1 %v3276_v12, %s10655_s1  ;;  %s10653_s7 = smov 8   ;;  %v3246_v7 = vsel %vm3243_vm15, %v3244_v62, %v3245_v29  ;;  %v3293_v13 = vrot.slane %v9440_v25, 4  ;;  %v3251_v11 = vrot.slane %v9437_v6, 4  ;;  %v3344_v12 = vld [vmem:[%s10727_s19 + $0x60] sm:$0xff]  ;;  %s10660_s1 = smov 24   ;;  %vm10668_vm11 = vcmask 1041408  }
 0x7f1   : > { %v7882_v47 = vpack.c.bf16 %v3345_v60, %v3344_v12  ;;  %v3263_v1 = vrot.slane %v9448_v19, 6  ;;  %v3287_v31 = vrot.slane %v9440_v25, 3  ;;  %v3299_v62 = vrot.slane %v9440_v25, 5  ;;  %s10804_s19 = smov 104  }
 0x7f2   : > { %7880 = vmatpush3.bf16.msra.mxu0 %v7879_v57  ;;  %v3294_v63 = vsel %vm1063_vm0, %v3292_v35, %v3293_v13  ;;  %v3252_v52 = vsel %vm1063_vm0, %v3250_v20, %v3251_v11  ;;  %vm10677_vm5 = vcmask 326656  }
 0x7f3   : > { %7881 = vmatprep.subr.bf16.mxu0 %v10747_v54 }
 0x7f4   : > { %3240 = vrot.lane.b32.xlu0 %v3239_v17, %s10662_s18  ;;  %3233 = vrot.lane.b32.xlu1 %v3232_v44, %s10653_s7  ;;  %s10657_s7 = smov 40   ;;  %v3264_v17 = vrot.slane %v9437_v6, 6  ;;  %v3304_v44 = vrot.slane %v9414_v14, 6  ;;  %s10686_s18 = smov 48   ;;  %v3286_v6 = vrot.slane %v9414_v14, 3 }
 0x7f6   : > { %7883 = vmatpush3.bf16.msra.mxu0 %v7882_v47  ;;  %v3306_v29 = vsel %vm10668_vm11, %v3304_v44, %v3305_v30  ;;  %v3265_v37 = vsel %vm10668_vm11, %v3263_v1, %v3264_v17  ;;  %v3288_v43 = vsel %vm3243_vm15, %v3286_v6, %v3287_v31  ;;  %vm10674_vm11 = vcmask 195584  }
 0x7f7   : > { %7885 = vmatprep.subr.bf16.mxu0 %v8602_v28  ;;  %v3298_v28 = vrot.slane %v9414_v14, 5 }
 0x7f8   : > { %3259 = vrot.lane.b32.xlu0 %v3258_v8, %s10657_s7  ;;  %3247 = vrot.lane.b32.xlu1 %v3246_v7, %s10660_s1  ;;  %s10664_s7 = smov 88   ;;  %s10678_s1 = smov 104  }
 0x7f9   : > { %v3300_v57 = vsel %vm10670_vm3, %v3298_v28, %v3299_v62  ;;  %vm3318_vm3 = vcmask 457728  }
 0x7fc   : > { %3295 = vrot.lane.b32.xlu0 %v3294_v63, %s10664_s7  ;;  %3253 = vrot.lane.b32.xlu1 %v3252_v52, %s10666_s10  ;;  %s10684_s7 = smov 80   ;;  %s10680_s10 = smov 96  }
 0x800   : > { %3307 = vrot.lane.b32.xlu0 %v3306_v29, %s10678_s1  ;;  %3266 = vrot.lane.b32.xlu1 %v3265_v37, %s10686_s18  ;;  %s10753_s1 = sld [smem:[#allocation17_spill]]  ;;  %s10762_s18 = sld [smem:[#allocation20_spill]] }
 0x804   : > { %3289 = vrot.lane.b32.xlu1 %v3288_v43, %s10684_s7  ;;  %s10760_s7 = smov 16  }
 0x808   : > { %3301 = vrot.lane.b32.xlu1 %v3300_v57, %s10680_s10  ;;  %s10755_s10 = sld [smem:[#allocation18_spill]] }
 0x858   : > { %v3271_v8 = vpop.permute.xlu0 %3270 }
 0x862   : > { %v3278_v7 = vpop.permute.xlu1 %3277  ;;  %v3284_v13 = vpop.permute.xlu0 %3283 }
 0x866   : > { %v3234_v11 = vpop.permute.xlu1 %3233  ;;  %v3241_v12 = vpop.permute.xlu0 %3240 }
 0x867   : > { %v3310_v60 = vsel %vm1014_vm1, %v9448_v19, %v3234_v11 }
 0x868   : > { %v3311_v25 = vsel %vm1804_vm7, %v3310_v60, %v3241_v12 }
 0x86a   : > { %v3248_v47 = vpop.permute.xlu1 %3247  ;;  %v3260_v20 = vpop.permute.xlu0 %3259 }
 0x86b   : > { %v3313_v35 = vsel %vm10674_vm11, %v3311_v25, %v3248_v47  ;;  %vm10691_vm11 = vcmask 719872  }
 0x86e   : > { %v3254_v14 = vpop.permute.xlu1 %3253  ;;  %v3296_v44 = vpop.permute.xlu0 %3295 }
 0x86f   : > { %v3314_v63 = vsel %vm1837_vm8, %v3313_v35, %v3254_v14 }
 0x870   : > { %v3316_v30 = vsel %vm10677_vm5, %v3314_v63, %v3260_v20  ;;  %vm10682_vm5 = vcmask 916480  }
 0x872   : > { %v3267_v52 = vpop.permute.xlu1 %3266  ;;  %v3308_v62 = vpop.permute.xlu0 %3307 }
 0x873   : > { %v3317_v17 = vsel %vm1926_vm9, %v3316_v30, %v3267_v52 }
 0x874   : > { %v3319_v19 = vsel %vm3318_vm3, %v3317_v17, %v3271_v8  ;;  %v8218_v8 = vld [vmem:[%s10728_s9 + $0x8] sm:$0xff]  ;;  %s10795_s9 = smov 24  }
 0x875   : > { %v3321_v1 = vsel %vm10694_vm6, %v3319_v19, %v3278_v7 }
 0x876   : > { %v3290_v29 = vpop.permute.xlu1 %3289  ;;  %v3323_v37 = vsel %vm10693_vm14, %v3321_v1, %v3284_v13 }
 0x877   : > { %v3325_v31 = vsel %vm10692_vm13, %v3323_v37, %v3290_v29  ;;  %vm10778_vm13 = vcmask 1042434  }
 0x878   : > { %v3327_v43 = vsel %vm10691_vm11, %v3325_v31, %v3296_v44  ;;  %vm10776_vm11 = vcmask 1041409  }
 0x87a   : > { %v3302_v6 = vpop.permute.xlu1 %3301 }
 0x87b   : > { %v3329_v28 = vsel %vm10688_vm12, %v3327_v43, %v3302_v6  ;;  %v8170_v6 = vld [vmem:[%s10749_s6] sm:$0xff]   ;;  %vm10769_vm12 = vcmask 15360   ;;  %s10791_s6 = smov 72  }
 0x87c   : > { %v3331_v57 = vsel %vm10683_vm2, %v3329_v28, %v3308_v62  ;;  %v6877_v28 = vld [vmem:[%s8401_s30] ss:$0 sm:$0xff] }
 0x87d   : > { %7585 = vmatmul.mubr.msk.f32.vlgmr.msra.gmra.mrb[68].mxu0 %vm10682_vm5, %v3331_v57  ;;  %vm3904_vm5 = vsmask.f32 4352 }
 0x87e   : > { %7887 = vmatpush3.bf16.msra.mxu0 %v8557_v5  ;;  %3554 = vmatprep.mubr.f32.mxu0 %v8218_v8  ;;  %v3599_v5 = vld [vmem:[%s10748_s24] sm:$0xf]  ;;  %vm9650_vm2 = vmand %vm3243_vm15, %vm3904_vm5  ;;  %vm10768_vm5 = vcmask 1040384   ;;  %s10816_s24 = sld [smem:[#allocation27_spill]] }
 0x87f   : > { %7889 = vmatprep.subr.bf16.mxu0 %v8612_v33  ;;  %8070 = vmatprep.subr.msk.bf16.mxu1 %vm1063_vm0, %v3599_v5 }
 0x882   : > { %7891 = vmatpush3.bf16.msra.mxu0 %v8562_v9  ;;  %v3620_v9 = vsel %vm1063_vm0, %v3599_v5, 0 }
 0x883   : > { %7893 = vmatprep.subr.bf16.mxu0 %v8614_v34  ;;  %7959 = vmatpush3.bf16.msra.mxu1 %v3620_v9 }
 0x884   : > { %7597 = vmatprep.subr.bf16.mxu1 %v8170_v6 }
 0x886   : > { %7895 = vmatpush3.bf16.msra.mxu0 %v8564_v10 }
 0x887   : > { %7897 = vmatprep.subr.bf16.mxu0 %v8624_v39 }
 0x88a   : > { %7899 = vmatpush3.bf16.msra.mxu0 %v8576_v15 }
 0x88b   : > { %7901 = vmatprep.subr.bf16.mxu0 %v8626_v40  ;;  %v9560_v40 = vsub.s32 3, %v9327_v59 }
 0x88e   : > { %7903 = vmatpush3.bf16.msra.mxu0 %v8578_v16 }
 0x88f   : > { %7905 = vmatprep.subr.bf16.mxu0 %v8636_v45  ;;  %v9563_v45 = vsub.s32 2, %v9327_v59 }
 0x892   : > { %7907 = vmatpush3.bf16.msra.mxu0 %v8588_v21 }
 0x893   : > { %7909 = vmatprep.subr.bf16.mxu0 %v8638_v46 }
 0x896   : > { %7911 = vmatpush3.bf16.msra.mxu0 %v8590_v22 }
 0x897   : > { %7913 = vmatprep.subr.bf16.mxu0 %v8646_v49 }
 0x89a   : > { %7915 = vmatpush3.bf16.msra.mxu0 %v8600_v27  ;;  %v9555_v27 = vsub.s32 1, %v9327_v59 }
 0x89b   : > { %8069 = vmatprep.subr.msk.bf16.mxu0 %vm1063_vm0, %v3599_v5 }
 0x89d   : > { %3555 = vmatmul.mubr.f32.vlgmr.msra.gmra.mrb[70].mxu0 %v9189_v58  ;;  %v9568_v58 = vsub.s32 5, %v9327_v59 }
 0x89e   : > { %3559 = vmatprep.mubr.f32.mxu0 %v9192_v2  ;;  %7588 = vmatpush3.bf16.msra.mxu0 %v3620_v9  ;;  %v9571_v2 = vsub.s32 4, %v9327_v59 }
 0x8a1   : > { %3560 = vmatmul.mubr.f32.gmra.mrb[72].mxu0 %v9197_v32 }
 0x8a2   : > { %3564 = vmatprep.mubr.f32.mxu0 %v9200_v55 }
 0x8a5   : > { %3565 = vmatmul.mubr.f32.gmra.mrb[74].mxu0 %v9205_v48 }
 0x8a6   : > { %3569 = vmatprep.mubr.f32.mxu0 %v9208_v56 }
 0x8a9   : > { %3570 = vmatmul.mubr.f32.gmra.mrb[76].mxu0 %v9213_v51 }
 0x8aa   : > { %3574 = vmatprep.mubr.f32.mxu0 %v9216_v50  ;;  %v9576_v50 = vsub.s32 7, %v9327_v59 }
 0x8ad   : > { %3575 = vmatmul.mubr.f32.gmra.mrb[78].mxu0 %v9221_v61  ;;  %v9579_v61 = vsub.s32 6, %v9327_v59 }
 0x8ae   : > { %3579 = vmatprep.mubr.f32.mxu0 %v9224_v26 }
 0x8b1   : > { %3580 = vmatmul.mubr.f32.gmra.mrb[80].mxu0 %v9229_v0 }
 0x8b2   : > { %3584 = vmatprep.mubr.f32.mxu0 %v9232_v24 }
 0x8b5   : > { %3585 = vmatmul.mubr.f32.gmra.mrb[82].mxu0 %v9237_v41 }
 0x8b6   : > { %3589 = vmatprep.mubr.f32.mxu0 %v9240_v3 }
 0x8b9   : > { %3590 = vmatmul.mubr.f32.gmra.mrb[84].mxu0 %v9245_v38 }
 0x950   : > { %v3416_v10 = vpop.f32.mrb[68].mxu0 }
 0x951   : > { %v6876_v15 = vmul.f32 -1.442695, %v3416_v10  ;;  %v7586_v16 = vpop.f32.mrb[69].mxu0 }
 0x953   : > { %8198 = vpow2.f32 %v6876_v15 }
 0x95d   : > { %v8199_v21 = vpop.eup %8198 }
 0x95e   : > { %v3423_v22 = vadd.f32 1.0, %v8199_v21 }
 0x960   : > { %8200 = vrcp.f32 %v3423_v22 }
 0x96a   : > { %v8201_v33 = vpop.eup %8200 }
 0x96b   : > { %v3436_v34 = vrot.slane %v8201_v33, %v9555_v27  ;;  %v3429_v39 = vrot.slane %v8201_v33, %v9330_v53  ;;  %v3450_v46 = vrot.slane %v8201_v33, %v9560_v40  ;;  %v3443_v49 = vrot.slane %v8201_v33, %v9563_v45 }
 0x96c   : > { %v3464_v56 = vrot.slane %v8201_v33, %v9568_v58  ;;  %v3457_v51 = vrot.slane %v8201_v33, %v9571_v2  ;;  %v3478_v41 = vrot.slane %v8201_v33, %v9576_v50  ;;  %v3471_v3 = vrot.slane %v8201_v33, %v9579_v61 }
 0x96d   : > { %3438 = vbcast.lane.b32.xlu0 %v3436_v34, 256  ;;  %3431 = vbcast.lane.b32.xlu1 %v3429_v39, 256 }
 0x970   : > { %v7237_v32 = vpop.f32.mrb[70].mxu0 }
 0x971   : > { %3452 = vbcast.lane.b32.xlu0 %v3450_v46, 256  ;;  %3445 = vbcast.lane.b32.xlu1 %v3443_v49, 256  ;;  %v7238_v55 = vpop.f32.mrb[71].mxu0 }
 0x972   : > { %v7239_v48 = vadd.f32 %v7238_v55, %v7237_v32 }
 0x974   : > { %v7240_v26 = vpop.f32.mrb[72].mxu0 }
 0x975   : > { %3466 = vbcast.lane.b32.xlu0 %v3464_v56, 256  ;;  %3459 = vbcast.lane.b32.xlu1 %v3457_v51, 256  ;;  %v7241_v0 = vpop.f32.mrb[73].mxu0 }
 0x976   : > { %v7242_v24 = vadd.f32 %v7241_v0, %v7240_v26 }
 0x978   : > { %v3595_v38 = vpack.c.bf16 %v7242_v24, %v7239_v48  ;;  %v7243_v7 = vpop.f32.mrb[74].mxu0 }
 0x979   : > { %3480 = vbcast.lane.b32.xlu0 %v3478_v41, 256  ;;  %3473 = vbcast.lane.b32.xlu1 %v3471_v3, 256  ;;  %v7244_v13 = vpop.f32.mrb[75].mxu0 }
 0x97a   : > { %v7245_v11 = vadd.f32 %v7244_v13, %v7243_v7  ;;  %7589 = vmatprep.mubr.msk.bf16.mxu0 %vm1014_vm1, %v3595_v38 }
 0x97c   : > { %v7246_v12 = vpop.f32.mrb[76].mxu0 }
 0x97d   : > { %v7247_v59 = vpop.f32.mrb[77].mxu0 }
 0x97e   : > { %v7248_v60 = vadd.f32 %v7247_v59, %v7246_v12 }
 0x980   : > { %v3596_v47 = vpack.c.bf16 %v7248_v60, %v7245_v11  ;;  %v7249_v25 = vpop.f32.mrb[78].mxu0  ;;  %v10750_v11 = vld [vmem:[#allocation34_spill] sm:$0xff] }
 0x981   : > { %v7250_v35 = vpop.f32.mrb[79].mxu0 }
 0x982   : > { %7590 = vmatmul.mubr.msk.bf16.vlgmr.msra.gmra.mrb[88].mxu0 %vm1014_vm1, %v3596_v47  ;;  %v7251_v14 = vadd.f32 %v7250_v35, %v7249_v25  ;;  %v10751_v47 = vld [vmem:[#allocation36_spill] sm:$0xff]  ;;  %v10752_v35 = vld [vmem:[#allocation35_spill] sm:$0xff] }
 0x984   : > { %v7252_v20 = vpop.f32.mrb[80].mxu0 }
 0x985   : > { %v7253_v63 = vpop.f32.mrb[81].mxu0 }
 0x986   : > { %v7254_v52 = vadd.f32 %v7253_v63, %v7252_v20 }
 0x988   : > { %v3597_v30 = vpack.c.bf16 %v7254_v52, %v7251_v14  ;;  %v7255_v17 = vpop.f32.mrb[82].mxu0  ;;  %v10754_v52 = vld [vmem:[#allocation33_spill] sm:$0xff] }
 0x989   : > { %v7256_v19 = vpop.f32.mrb[83].mxu0 }
 0x98a   : > { %v7257_v44 = vadd.f32 %v7256_v19, %v7255_v17  ;;  %7593 = vmatprep.mubr.msk.bf16.mxu1 %vm1014_vm1, %v3597_v30 }
 0x98c   : > { %v7258_v1 = vpop.f32.mrb[84].mxu0 }
 0x98d   : > { %v7259_v29 = vpop.f32.mrb[85].mxu0 }
 0x98e   : > { %v7260_v37 = vadd.f32 %v7259_v29, %v7258_v1 }
 0x990   : > { %v3598_v31 = vpack.c.bf16 %v7260_v37, %v7257_v44 }
 0x992   : > { %7594 = vmatmul.mubr.msk.bf16.vlgmr.msra.gmra.mrb[32].mxu1 %vm1014_vm1, %v3598_v31 }
 0x993   : > { %7598 = vmatpush3.bf16.msra.mxu1 %v8170_v6 }
 0x9df   : > { %v3439_v43 = vpop.permute.xlu0 %3438  ;;  %v3432_v62 = vpop.permute.xlu1 %3431 }
 0x9e0   : > { %v3482_v15 = vmul.f32 %v3432_v62, %v9337_v18  ;;  %v3483_v46 = vmul.f32 %v3439_v43, %v9334_v4 }
 0x9e3   : > { %v3453_v57 = vpop.permute.xlu0 %3452  ;;  %v3446_v8 = vpop.permute.xlu1 %3445 }
 0x9e4   : > { %v3485_v22 = vmul.f32 %v3453_v57, %v9357_v36  ;;  %v3484_v33 = vmul.f32 %v3446_v8, %v9347_v23  ;;  %v9642_v57 = vld [vmem:[%s10753_s1] ss:$0 sm:$0xff]  ;;  %s10759_s1 = smov 32  }
 0x9e7   : > { %v3467_v23 = vpop.permute.xlu0 %3466  ;;  %v3460_v0 = vpop.permute.xlu1 %3459 }
 0x9e8   : > { %v3486_v12 = vmul.f32 %v3460_v0, %v10750_v11  ;;  %v3487_v30 = vmul.f32 %v3467_v23, %v10754_v52 }
 0x9eb   : > { %v3481_v41 = vpop.permute.xlu0 %3480  ;;  %v3474_v3 = vpop.permute.xlu1 %3473 }
 0x9ec   : > { %v3489_v25 = vmul.f32 %v3481_v41, %v10751_v47  ;;  %v3488_v14 = vmul.f32 %v3474_v3, %v10752_v35 }
 0xa55   : > { %v7591_v5 = vpop.f32.mrb[88].mxu0 }
 0xa56   : > { %v3665_v9 = vadd.f32 %v7591_v5, %v6877_v28  ;;  %v3656_v10 = vpop.f32.mrb[89].mxu0 }
 0xa57   : > { %v3657_v16 = vadd.f32 %v6877_v28, %v3656_v10  ;;  %v7592_v21 = vpop.f32.mrb[90].mxu0 }
 0xa58   : > { %v3668_v34 = vadd.f32 %v7592_v21, %v6877_v28  ;;  %v3659_v39 = vpop.f32.mrb[91].mxu0  ;;  %v9595_v55 = vadd.f32 %v3665_v9, %v3484_v33 }
 0xa59   : > { %v9593_v49 = vadd.f32 %v3657_v16, %v3482_v15  ;;  %v3660_v32 = vadd.f32 %v6877_v28, %v3659_v39 }
 0xa5a   : > { %v9597_v48 = vadd.f32 %v3668_v34, %v3485_v22  ;;  %v3697_v26 = vmax.f32 %v9595_v55, 0.0 }
 0xa5b   : > { %v9599_v56 = vadd.f32 %v3660_v32, %v3483_v46  ;;  %v3695_v51 = vmax.f32 %v9593_v49, 0.0 }
 0xa5c   : > { %v3698_v18 = vmax.f32 %v9597_v48, 0.0 }
 0xa5d   : > { %v3696_v36 = vmax.f32 %v9599_v56, 0.0 }
 0xa5e   : > { %v3704_v24 = vpack.c.bf16 %v3698_v18, %v3697_v26 }
 0xa5f   : > { %v3703_v4 = vpack.c.bf16 %v3696_v36, %v3695_v51 }
 0xa61   : > { %7599 = vmatprep.mubr.msk.bf16.mxu1 %vm1804_vm7, %v3703_v4 }
 0xa62   : > { %7600 = vmatmul.mubr.msk.bf16.vlgmr.msra.gmra.mrb[36].mxu1 %vm1804_vm7, %v3704_v24 }
 0xa65   : > { %v7595_v38 = vpop.f32.mrb[32].mxu1 }
 0xa66   : > { %v3681_v7 = vadd.f32 %v7595_v38, %v6877_v28  ;;  %v3672_v13 = vpop.f32.mrb[33].mxu1 }
 0xa67   : > { %v3673_v59 = vadd.f32 %v6877_v28, %v3672_v13  ;;  %v7596_v60 = vpop.f32.mrb[34].mxu1  ;;  %v8171_v13 = vld [vmem:[%s10755_s10 + $0x18] sm:$0xff]  }
 0xa68   : > { %v3684_v20 = vadd.f32 %v7596_v60, %v6877_v28  ;;  %v3675_v63 = vpop.f32.mrb[35].mxu1  ;;  %v9621_v44 = vadd.f32 %v3681_v7, %v3488_v14  ;;  %7607 = vmatprep.subr.bf16.mxu0 %v8171_v13 }
 0xa69   : > { %v9619_v17 = vadd.f32 %v3673_v59, %v3486_v12  ;;  %v3676_v19 = vadd.f32 %v6877_v28, %v3675_v63  ;;  %7608 = vmatpush3.bf16.msra.mxu0 %v8171_v13 }
 0xa6a   : > { %v9623_v1 = vadd.f32 %v3684_v20, %v3489_v25  ;;  %v3701_v43 = vmax.f32 %v9621_v44, 0.0 }
 0xa6b   : > { %v9625_v29 = vadd.f32 %v3676_v19, %v3487_v30  ;;  %v3699_v31 = vmax.f32 %v9619_v17, 0.0 }
 0xa6c   : > { %v3702_v37 = vmax.f32 %v9623_v1, 0.0 }
 0xa6d   : > { %v3700_v6 = vmax.f32 %v9625_v29, 0.0 }
 0xa6e   : > { %v3706_v28 = vpack.c.bf16 %v3702_v37, %v3701_v43 }
 0xa6f   : > { %v3705_v62 = vpack.c.bf16 %v3700_v6, %v3699_v31 }
 0xa71   : > { %7603 = vmatprep.mubr.msk.bf16.mxu1 %vm1804_vm7, %v3705_v62 }
 0xa72   : > { %7604 = vmatmul.mubr.msk.bf16.gmra.mrb[40].mxu1 %vm1804_vm7, %v3706_v28 }
 0xb35   : > { %v7601_v8 = vpop.f32.mrb[36].mxu1 }
 0xb36   : > { %v3777_v5 = vadd.f32 %v7601_v8, %v9642_v57  ;;  %v3768_v9 = vpop.f32.mrb[37].mxu1 }
 0xb37   : > { %v3769_v10 = vadd.f32 %v9642_v57, %v3768_v9  ;;  %v7602_v15 = vpop.f32.mrb[38].mxu1 }
 0xb38   : > { %v3801_v16 = vmax.f32 %v3777_v5, 0.0  ;;  %v3780_v21 = vadd.f32 %v7602_v15, %v9642_v57  ;;  %v3771_v22 = vpop.f32.mrb[39].mxu1 }
 0xb39   : > { %v3799_v33 = vmax.f32 %v3769_v10, 0.0  ;;  %v3772_v34 = vadd.f32 %v9642_v57, %v3771_v22 }
 0xb3a   : > { %v7032_v39 = vpack.c.bf16 %v3801_v16, %v3801_v16  ;;  %v3802_v46 = vmax.f32 %v3780_v21, 0.0 }
 0xb3b   : > { %v7030_v32 = vpack.c.bf16 %v3799_v33, %v3799_v33  ;;  %v3800_v23 = vmax.f32 %v3772_v34, 0.0  ;;  %v8172_v33 = vld [vmem:[%s10755_s10 + $0x20] sm:$0xff]  }
 0xb3c   : > { %v3846_v0 = vshrl.u32 %v7032_v39, 16  ;;  %v7033_v4 = vpack.c.bf16 %v3802_v46, %v3802_v46  ;;  %v3849_v38 = vshll.u32 %v7032_v39, 16  ;;  %7609 = vmatprep.subr.bf16.mxu0 %v8172_v33 }
 0xb3d   : > { %v3832_v24 = vshrl.u32 %v7030_v32, 16  ;;  %v7031_v41 = vpack.c.bf16 %v3800_v23, %v3800_v23  ;;  %v3835_v12 = vshll.u32 %v7030_v32, 16  ;;  %7610 = vmatpush3.bf16.msra.mxu0 %v8172_v33 }
 0xb3e   : > { %v3848_v3 = vrot.slane %v3846_v0, 7  ;;  %v3853_v7 = vshrl.u32 %v7033_v4, 16  ;;  %v3856_v35 = vshll.u32 %v7033_v4, 16 }
 0xb3f   : > { %v3834_v11 = vrot.slane %v3832_v24, 7  ;;  %v3839_v59 = vshrl.u32 %v7031_v41, 16  ;;  %v3842_v63 = vshll.u32 %v7031_v41, 16 }
 0xb40   : > { %v3851_v47 = vor.u32 %v3849_v38, %v3848_v3  ;;  %v3855_v25 = vrot.slane %v3853_v7, 7 }
 0xb41   : > { %v3837_v14 = vor.u32 %v3835_v12, %v3834_v11  ;;  %v3841_v20 = vrot.slane %v3839_v59, 7 }
 0xb42   : > { %v3897_v30 = vsel %vm8662_vm4, 0, %v3851_v47  ;;  %v3858_v19 = vor.u32 %v3856_v35, %v3855_v25  ;;  %v8173_v47 = vld [vmem:[%s10755_s10 + $0x28] sm:$0xff]  }
 0xb43   : > { %v3895_v62 = vsel %vm8662_vm4, 0, %v3837_v14  ;;  %v3844_v28 = vor.u32 %v3842_v63, %v3841_v20  ;;  %v9660_v8 = vsel %vm9650_vm2, %v3897_v30, 0  ;;  %7611 = vmatprep.subr.bf16.mxu0 %v8173_v47 }
 0xb44   : > { %v3898_v5 = vsel %vm8662_vm4, 0, %v3858_v19  ;;  %v3998_v9 = vrot.slane %v9660_v8, 1  ;;  %v9667_v10 = vsel %vm9650_vm2, %v3895_v62, 0  ;;  %v3939_v22 = vshll.u32 %v9660_v8, 16  ;;  %7612 = vmatpush3.bf16.msra.mxu0 %v8173_v47 }
 0xb45   : > { %v3896_v15 = vsel %vm8662_vm4, 0, %v3844_v28  ;;  %v7605_v16 = vpop.f32.mrb[40].mxu1  ;;  %v9673_v21 = vsel %vm9650_vm2, %v3898_v5, 0  ;;  %v3996_v0 = vrot.slane %v9667_v10, 1  ;;  %v3925_v13 = vshll.u32 %v9667_v10, 16 }
 0xb46   : > { %v3793_v34 = vadd.f32 %v7605_v16, %v9642_v57  ;;  %4009 = vrot.lane.b32.xlu1 %v3998_v9, %s10759_s1  ;;  %v3784_v39 = vpop.f32.mrb[41].mxu1  ;;  %v3999_v46 = vrot.slane %v9673_v21, 1  ;;  %v9684_v4 = vsel %vm9650_vm2, %v3896_v15, 0  ;;  %v3946_v24 = vshll.u32 %v9673_v21, 16 }
 0xb47   : > { %v3785_v32 = vadd.f32 %v9642_v57, %v3784_v39  ;;  %v7606_v23 = vpop.f32.mrb[42].mxu1  ;;  %v3941_v7 = vrot.slane %v3939_v22, 1  ;;  %v3997_v14 = vrot.slane %v9684_v4, 1  ;;  %v3937_v20 = vshrl.u32 %v9660_v8, 16 }
 0xb48   : > { %v3805_v41 = vmax.f32 %v3793_v34, 0.0  ;;  %v3796_v3 = vadd.f32 %v7606_v23, %v9642_v57  ;;  %4011 = vrot.lane.b32.xlu0 %v3999_v46, %s10759_s1  ;;  %v3787_v38 = vpop.f32.mrb[43].mxu1  ;;  %v3948_v59 = vrot.slane %v3946_v24, 1  ;;  %v3944_v19 = vshrl.u32 %v9673_v21, 16 }
 0xb49   : > { %v3803_v11 = vmax.f32 %v3785_v32, 0.0  ;;  %v3788_v12 = vadd.f32 %v9642_v57, %v3787_v38  ;;  %v3932_v62 = vshll.u32 %v9684_v4, 16  ;;  %v3942_v57 = vor.u32 %v3941_v7, %v3937_v20 }
 0xb4a   : > { %v7036_v25 = vpack.c.bf16 %v3805_v41, %v3805_v41  ;;  %v3806_v35 = vmax.f32 %v3796_v3, 0.0  ;;  %4005 = vrot.lane.b32.xlu1 %v3996_v0, %s10759_s1  ;;  %v3927_v9 = vrot.slane %v3925_v13, 1  ;;  %v3949_v22 = vor.u32 %v3948_v59, %v3944_v19 }
 0xb4b   : > { %v7034_v63 = vpack.c.bf16 %v3803_v11, %v3803_v11  ;;  %v3804_v30 = vmax.f32 %v3788_v12, 0.0  ;;  %v3923_v33 = vshrl.u32 %v9667_v10, 16  ;;  %v3934_v32 = vrot.slane %v3932_v62, 1 }
 0xb4c   : > { %v3874_v28 = vshrl.u32 %v7036_v25, 16  ;;  %v7037_v5 = vpack.c.bf16 %v3806_v35, %v3806_v35  ;;  %4007 = vrot.lane.b32.xlu0 %v3997_v14, %s10759_s1  ;;  %v3877_v39 = vshll.u32 %v7036_v25, 16  ;;  %v3930_v41 = vshrl.u32 %v9684_v4, 16 }
 0xb4d   : > { %v3860_v15 = vshrl.u32 %v7034_v63, 16  ;;  %v7035_v16 = vpack.c.bf16 %v3804_v30, %v3804_v30  ;;  %v3863_v0 = vshll.u32 %v7034_v63, 16  ;;  %v3928_v13 = vor.u32 %v3927_v9, %v3923_v33 }
 0xb4e   : > { %v3876_v34 = vrot.slane %v3874_v28, 7  ;;  %v3881_v46 = vshrl.u32 %v7037_v5, 16  ;;  %3977 = vrot.lane.b32.xlu1 %v3942_v57, %s10760_s7  ;;  %v3884_v7 = vshll.u32 %v7037_v5, 16  ;;  %v3935_v35 = vor.u32 %v3934_v32, %v3930_v41  ;;  %v10761_v41 = vld [vmem:[#allocation32_spill] sm:$0xff] }
 0xb4f   : > { %v3862_v23 = vrot.slane %v3860_v15, 7  ;;  %v3867_v24 = vshrl.u32 %v7035_v16, 16  ;;  %v3870_v59 = vshll.u32 %v7035_v16, 16 }
 0xb50   : > { %v3879_v3 = vor.u32 %v3877_v39, %v3876_v34  ;;  %v3883_v38 = vrot.slane %v3881_v46, 7  ;;  %3979 = vrot.lane.b32.xlu0 %v3949_v22, %s10760_s7  ;;  %v8174_v39 = vld [vmem:[%s10755_s10] sm:$0xff]  }
 0xb51   : > { %v3865_v11 = vor.u32 %v3863_v0, %v3862_v23  ;;  %v3869_v12 = vrot.slane %v3867_v24, 7  ;;  %7621 = vmatprep.subr.bf16.mxu0 %v8174_v39 }
 0xb52   : > { %v3901_v47 = vsel %vm8662_vm4, 0, %v3879_v3  ;;  %v3886_v25 = vor.u32 %v3884_v7, %v3883_v38  ;;  %3973 = vrot.lane.b32.xlu1 %v3928_v13, %s10760_s7  ;;  %v9742_v3 = vsel %vm9650_vm2, %v10761_v41, 0 }
 0xb53   : > { %v9707_v14 = vsel %vm9650_vm2, %v3901_v47, 0  ;;  %v3899_v20 = vsel %vm8662_vm4, 0, %v3865_v11  ;;  %v3872_v63 = vor.u32 %v3870_v59, %v3869_v12  ;;  %v3918_v12 = vshll.u32 %v9742_v3, 16 }
 0xb54   : > { %v3902_v30 = vsel %vm8662_vm4, 0, %v3886_v25  ;;  %3975 = vrot.lane.b32.xlu0 %v3935_v35, %s10760_s7  ;;  %v9716_v19 = vsel %vm9650_vm2, %v3899_v20, 0  ;;  %v3967_v62 = vshll.u32 %v9707_v14, 16  ;;  %v3965_v23 = vshrl.u32 %v9707_v14, 16 }
 0xb55   : > { %v9721_v28 = vsel %vm9650_vm2, %v3902_v30, 0  ;;  %v3900_v5 = vsel %vm8662_vm4, 0, %v3872_v63  ;;  %v4000_v57 = vrot.slane %v9716_v19, 1  ;;  %v3953_v34 = vshll.u32 %v9716_v19, 16 }
 0xb56   : > { %v9728_v9 = vsel %vm9650_vm2, %v3900_v5, 0  ;;  %v4060_v15 = vshll.u32 %v9721_v28, 16  ;;  %v3969_v22 = vrot.slane %v3967_v62, 1  ;;  %v4058_v46 = vshrl.u32 %v9721_v28, 16 }
 0xb57   : > { %v4001_v16 = vrot.slane %v9728_v9, 1  ;;  %v3960_v33 = vshll.u32 %v9728_v9, 16  ;;  %v3955_v7 = vrot.slane %v3953_v34, 1  ;;  %v3958_v13 = vshrl.u32 %v9728_v9, 16 }
 0xb58   : > { %4013 = vrot.lane.b32.xlu0 %v4000_v57, %s10759_s1  ;;  %v4062_v32 = vrot.slane %v4060_v15, 1  ;;  %v3970_v38 = vor.u32 %v3969_v22, %v3965_v23  ;;  %v3951_v11 = vshrl.u32 %v9716_v19, 16  ;;  %v3916_v25 = vshrl.u32 %v9742_v3, 16 }
 0xb59   : > { %4015 = vrot.lane.b32.xlu1 %v4001_v16, %s10759_s1  ;;  %v3962_v24 = vrot.slane %v3960_v33, 1  ;;  %v3920_v35 = vrot.slane %v3918_v12, 1  ;;  %v4067_v20 = vrot.slane %v9721_v28, 1  ;;  %v4002_v63 = vrot.slane %v9707_v14, 1  ;;  %v8175_v12 = vld [vmem:[%s10755_s10 + $0x8] sm:$0xff]  }
 0xb5a   : > { %v4063_v0 = vor.u32 %v4062_v32, %v4058_v46  ;;  %v3956_v47 = vor.u32 %v3955_v7, %v3951_v11  ;;  %v3995_v30 = vrot.slane %v9742_v3, 1 }
 0xb5b   : > { %v3963_v59 = vor.u32 %v3962_v24, %v3958_v13  ;;  %v3921_v62 = vor.u32 %v3920_v35, %v3916_v25  ;;  %v8177_v35 = vld [vmem:[%s10755_s10 + $0x30] sm:$0xff]  }
 0xb5c   : > { %4064 = vrot.lane.b32.xlu0 %v4063_v0, %s10760_s7 }
 0xb5d   : > { %3985 = vrot.lane.b32.xlu1 %v3970_v38, %s10760_s7 }
 0xb60   : > { %3983 = vrot.lane.b32.xlu0 %v3963_v59, %s10760_s7 }
 0xb61   : > { %3981 = vrot.lane.b32.xlu1 %v3956_v47, %s10760_s7 }
 0xb64   : > { %4068 = vrot.lane.b32.xlu0 %v4067_v20, %s10759_s1 }
 0xb65   : > { %4017 = vrot.lane.b32.xlu1 %v4002_v63, %s10759_s1 }
 0xb68   : > { %4003 = vrot.lane.b32.xlu0 %v3995_v30, %s10759_s1 }
 0xb69   : > { %3971 = vrot.lane.b32.xlu1 %v3921_v62, %s10760_s7 }
 0xbb8   : > { %v4010_v5 = vpop.permute.xlu1 %4009 }
 0xbba   : > { %v4012_v57 = vpop.permute.xlu0 %4011 }
 0xbbc   : > { %v4006_v15 = vpop.permute.xlu1 %4005 }
 0xbbe   : > { %v4008_v16 = vpop.permute.xlu0 %4007 }
 0xbc0   : > { %v3978_v22 = vpop.permute.xlu1 %3977 }
 0xbc1   : > { %v4026_v23 = vsel %vm1804_vm7, %v9660_v8, %v3978_v22 }
 0xbc2   : > { %v3980_v33 = vpop.permute.xlu0 %3979 }
 0xbc3   : > { %v4028_v34 = vsel %vm1804_vm7, %v9673_v21, %v3980_v33  ;;  %v4042_v21 = vsel %vm1837_vm8, %v4026_v23, %v4010_v5 }
 0xbc4   : > { %v3974_v46 = vpop.permute.xlu1 %3973  ;;  %v4044_v24 = vsel %vm1837_vm8, %v4028_v34, %v4012_v57 }
 0xbc5   : > { %v4022_v32 = vsel %vm1804_vm7, %v9667_v10, %v3974_v46  ;;  %v6903_v11 = vcombine.low %v4042_v21, %v4044_v24 }
 0xbc6   : > { %v3976_v0 = vpop.permute.xlu0 %3975  ;;  %v4038_v38 = vsel %vm1837_vm8, %v4022_v32, %v4006_v15 }
 0xbc7   : > { %v4024_v41 = vsel %vm1804_vm7, %v9684_v4, %v3976_v0  ;;  %v8176_v4 = vld [vmem:[%s10755_s10 + $0x10] sm:$0xff]   ;;  %v8178_v0 = vld [vmem:[%s10755_s10 + $0x38] sm:$0xff]  }
 0xbc8   : > { %v4040_v7 = vsel %vm1837_vm8, %v4024_v41, %v4008_v16 }
 0xbc9   : > { %v6902_v13 = vcombine.low %v4038_v38, %v4040_v7  ;;  %v6914_v23 = vcombine.low %v4040_v7, %v4042_v21  ;;  %v8180_v7 = vld [vmem:[%s10762_s18] sm:$0xff]   ;;  %s10765_s18 = sld [smem:[#allocation22_spill]] }
 0xbca   : > { %v4014_v10 = vpop.permute.xlu0 %4013  ;;  %7649 = vmatprep.subr.bf16.mxu1 %v8180_v7  ;;  %v6938_v21 = vld [vmem:[%s10763_s3] ss:$0 sm:$0xff]  ;;  %s10766_s3 = sld [smem:[#allocation21_spill]] }
 0xbcb   : > { %7613 = vmatprep.mubr.msk.bf16.mxu0 %vm1926_vm9, %v6902_v13  ;;  %v4016_v8 = vpop.permute.xlu1 %4015  ;;  %v8179_v13 = vld [vmem:[%s10755_s10 + $0x40] sm:$0xff]   ;;  %7650 = vmatpush3.bf16.msra.mxu1 %v8180_v7  ;;  %s10798_s10 = smov 40  }
 0xbcc   : > { %7614 = vmatmul.mubr.msk.bf16.vlgmr.msra.gmra.mrb[92].mxu0 %vm1926_vm9, %v6903_v11 }
 0xbcd   : > { %7622 = vmatpush3.bf16.msra.mxu0 %v8174_v39 }
 0xbce   : > { %v4065_v59 = vpop.permute.xlu0 %4064  ;;  %7623 = vmatprep.subr.bf16.mxu0 %v8175_v12 }
 0xbcf   : > { %v3986_v47 = vpop.permute.xlu1 %3985  ;;  %v4071_v39 = vsel %vm1804_vm7, %v9721_v28, %v4065_v59 }
 0xbd0   : > { %v4034_v16 = vsel %vm1804_vm7, %v9707_v14, %v3986_v47 }
 0xbd1   : > { %7624 = vmatpush3.bf16.msra.mxu0 %v8175_v12 }
 0xbd2   : > { %v3984_v25 = vpop.permute.xlu0 %3983  ;;  %7625 = vmatprep.subr.bf16.mxu0 %v8176_v4 }
 0xbd3   : > { %v4032_v20 = vsel %vm1804_vm7, %v9728_v9, %v3984_v25  ;;  %v3982_v63 = vpop.permute.xlu1 %3981 }
 0xbd4   : > { %v4030_v30 = vsel %vm1804_vm7, %v9716_v19, %v3982_v63  ;;  %v4048_v62 = vsel %vm1837_vm8, %v4032_v20, %v4016_v8 }
 0xbd5   : > { %v4046_v5 = vsel %vm1837_vm8, %v4030_v30, %v4014_v10  ;;  %7626 = vmatpush3.bf16.msra.mxu0 %v8176_v4 }
 0xbd6   : > { %v4069_v57 = vpop.permute.xlu0 %4068  ;;  %v6904_v15 = vcombine.low %v4046_v5, %v4048_v62  ;;  %7635 = vmatprep.subr.bf16.mxu0 %v8177_v35  ;;  %v6915_v41 = vcombine.low %v4044_v24, %v4046_v5 }
 0xbd7   : > { %v4073_v9 = vsel %vm1837_vm8, %v4071_v39, %v4069_v57  ;;  %v4018_v22 = vpop.permute.xlu1 %4017 }
 0xbd8   : > { %v4050_v19 = vsel %vm1837_vm8, %v4034_v16, %v4018_v22  ;;  %7617 = vmatprep.mubr.msk.bf16.mxu0 %vm1926_vm9, %v6904_v15 }
 0xbd9   : > { %v6905_v33 = vcombine.low %v4050_v19, %v4073_v9 }
 0xbda   : > { %v4004_v34 = vpop.permute.xlu0 %4003 }
 0xbdb   : > { %7618 = vmatmul.mubr.msk.bf16.gmra.mrb[96].mxu0 %vm1926_vm9, %v6905_v33  ;;  %v3972_v28 = vpop.permute.xlu1 %3971 }
 0xbdc   : > { %v4020_v46 = vsel %vm1804_vm7, %v9742_v3, %v3972_v28  ;;  %v6916_v3 = vcombine.low %v4048_v62, %v4050_v19 }
 0xbdd   : > { %v9793_v32 = vsel %vm1837_vm8, %v4020_v46, %v4004_v34 }
 0xbde   : > { %v6913_v14 = vcombine.low %v9793_v32, %v4038_v38  ;;  %v6930_v24 = vcombine.low %v4073_v9, %v9793_v32  ;;  %v10764_v38 = vmov 0.0  }
 0xbdf   : > { %7659 = vmatprep.subr.bf16.mxu1 %v10764_v38 }
 0xbe0   : > { %7627 = vmatprep.mubr.msk.bf16.mxu0 %vm1926_vm9, %v6913_v14 }
 0xbe3   : > { %7628 = vmatmul.mubr.msk.bf16.vlgmr.msra.gmra.mrb[92].mxu0 %vm1926_vm9, %v6914_v23 }
 0xbe4   : > { %7631 = vmatprep.mubr.msk.bf16.mxu0 %vm1926_vm9, %v6915_v41  ;;  %7636 = vmatpush3.bf16.msra.mxu0 %v8177_v35 }
 0xbe5   : > { %7637 = vmatprep.subr.bf16.mxu0 %v8178_v0 }
 0xbe8   : > { %7638 = vmatpush3.bf16.msra.mxu0 %v8178_v0 }
 0xbe9   : > { %7639 = vmatprep.subr.bf16.mxu0 %v8179_v13 }
 0xbeb   : > { %7632 = vmatmul.mubr.msk.bf16.gmra.mrb[96].mxu0 %vm1926_vm9, %v6916_v3 }
 0xbec   : > { %7641 = vmatprep.mubr.msk.bf16.mxu0 %vm1926_vm9, %v6914_v23  ;;  %7640 = vmatpush3.bf16.msra.mxu0 %v8179_v13  ;;  %v6939_v13 = vld [vmem:[%s10766_s3] ss:$0 sm:$0xff]  ;;  %s10771_s3 = sld [smem:[#allocation24_spill]] }
 0xbed   : > { %7916 = vmatprep.subr.bf16.mxu0 %v10747_v54 }
 0xbf3   : > { %7642 = vmatmul.mubr.msk.bf16.vlgmr.msra.gmra.mrb[92].mxu0 %vm1926_vm9, %v6915_v41  ;;  %v9820_v41 = vld [vmem:[%s10765_s18] sm:$0xff]   ;;  %s10767_s18 = sld [smem:[#allocation23_spill]] }
 0xbf4   : > { %7645 = vmatprep.mubr.msk.bf16.mxu0 %vm1926_vm9, %v6916_v3 }
 0xbfb   : > { %7646 = vmatmul.mubr.msk.bf16.gmra.mrb[96].mxu0 %vm1926_vm9, %v6930_v24 }
 0xbfc   : > { %7711 = vmatprep.mubr.msk.f32.mxu0 %vm10689_vm10, %v10764_v38 }
 0xcc6   : > { %v7643_v11 = vpop.f32.mrb[92].mxu0 }
 0xcc7   : > { %v4408_v10 = vadd.f32 %v7643_v11, %v6938_v21  ;;  %v4360_v12 = vpop.f32.mrb[93].mxu0 }
 0xcc8   : > { %v4406_v8 = vadd.f32 %v6938_v21, %v4360_v12  ;;  %v7644_v59 = vpop.f32.mrb[94].mxu0 }
 0xcc9   : > { %v4409_v4 = vadd.f32 %v7644_v59, %v6938_v21  ;;  %v4363_v47 = vpop.f32.mrb[95].mxu0  ;;  %v4416_v35 = vmax.f32 %v4408_v10, 0.0 }
 0xcca   : > { %v4407_v25 = vadd.f32 %v6938_v21, %v4363_v47  ;;  %v4414_v63 = vmax.f32 %v4406_v8, 0.0 }
 0xccb   : > { %v4417_v20 = vmax.f32 %v4409_v4, 0.0 }
 0xccc   : > { %v4415_v30 = vmax.f32 %v4407_v25, 0.0 }
 0xccd   : > { %v4423_v62 = vpack.c.bf16 %v4417_v20, %v4416_v35 }
 0xcce   : > { %v4422_v5 = vpack.c.bf16 %v4415_v30, %v4414_v63  ;;  %v7647_v39 = vpop.f32.mrb[96].mxu0 }
 0xccf   : > { %v4412_v57 = vadd.f32 %v7647_v39, %v6938_v21  ;;  %v4376_v15 = vpop.f32.mrb[97].mxu0 }
 0xcd0   : > { %v4410_v16 = vadd.f32 %v6938_v21, %v4376_v15  ;;  %v7648_v9 = vpop.f32.mrb[98].mxu0  ;;  %7651 = vmatprep.mubr.msk.bf16.mxu1 %vm1804_vm7, %v4422_v5 }
 0xcd1   : > { %v4413_v22 = vadd.f32 %v7648_v9, %v6938_v21  ;;  %v4379_v19 = vpop.f32.mrb[99].mxu0  ;;  %7652 = vmatmul.mubr.msk.bf16.vlgmr.msra.gmra.mrb[44].mxu1 %vm1804_vm7, %v4423_v62  ;;  %v4420_v34 = vmax.f32 %v4412_v57, 0.0 }
 0xcd2   : > { %v4411_v33 = vadd.f32 %v6938_v21, %v4379_v19  ;;  %v4418_v46 = vmax.f32 %v4410_v16, 0.0  ;;  %7660 = vmatpush3.bf16.msra.mxu1 %v9820_v41 }
 0xcd3   : > { %v4421_v28 = vmax.f32 %v4413_v22, 0.0  ;;  %7665 = vmatprep.subr.bf16.mxu1 %v10764_v38 }
 0xcd4   : > { %v4419_v14 = vmax.f32 %v4411_v33, 0.0 }
 0xcd5   : > { %v4425_v23 = vpack.c.bf16 %v4421_v28, %v4420_v34 }
 0xcd6   : > { %v4424_v0 = vpack.c.bf16 %v4419_v14, %v4418_v46 }
 0xcd8   : > { %7655 = vmatprep.mubr.msk.bf16.mxu1 %vm1804_vm7, %v4424_v0 }
 0xcd9   : > { %7656 = vmatmul.mubr.msk.bf16.gmra.mrb[48].mxu1 %vm1804_vm7, %v4425_v23 }
 0xcda   : > { %7661 = vmatprep.mubr.msk.bf16.mxu1 %vm10689_vm10, %v10764_v38 }
 0xda4   : > { %v7653_v3 = vpop.f32.mrb[44].mxu1 }
 0xda5   : > { %v4487_v24 = vpop.f32.mrb[45].mxu1  ;;  %v9827_v10 = vadd.f32 %v7653_v3, %v6939_v13 }
 0xda6   : > { %v9825_v7 = vadd.f32 %v6939_v13, %v4487_v24  ;;  %v7654_v21 = vpop.f32.mrb[46].mxu1 }
 0xda7   : > { %v4490_v11 = vpop.f32.mrb[47].mxu1  ;;  %v9833_v59 = vadd.f32 %v7654_v21, %v6939_v13  ;;  %v4521_v25 = vsel %vm1804_vm7, %v9827_v10, 0.0  ;;  %v4542_v57 = vsel %vm1804_vm7, %v9827_v10, -inf }
 0xda8   : > { %v9829_v12 = vadd.f32 %v6939_v13, %v4490_v11  ;;  %v4518_v8 = vsel %vm1804_vm7, %v9825_v7, 0.0  ;;  %v4540_v19 = vsel %vm1804_vm7, %v9825_v7, -inf }
 0xda9   : > { %v4523_v62 = vsel %vm1804_vm7, %v9833_v59, 0.0  ;;  %v4543_v46 = vsel %vm1804_vm7, %v9833_v59, -inf }
 0xdaa   : > { %v4519_v4 = vsel %vm1804_vm7, %v9829_v12, 0.0  ;;  %v4541_v14 = vsel %vm1804_vm7, %v9829_v12, -inf }
 0xdab   : > { %v4520_v47 = vadd.f32 %v4519_v4, %v4518_v8 }
 0xdac   : > { %v7657_v35 = vpop.f32.mrb[48].mxu1 }
 0xdad   : > { %v4522_v20 = vadd.f32 %v4521_v25, %v4520_v47  ;;  %v9839_v63 = vadd.f32 %v7657_v35, %v6939_v13  ;;  %v4503_v30 = vpop.f32.mrb[49].mxu1 }
 0xdae   : > { %v9843_v5 = vadd.f32 %v6939_v13, %v4503_v30  ;;  %v7658_v39 = vpop.f32.mrb[50].mxu1 }
 0xdaf   : > { %v4548_v15 = vsel %vm1804_vm7, %v9839_v63, -inf  ;;  %v4524_v16 = vadd.f32 %v4523_v62, %v4522_v20  ;;  %v9849_v9 = vadd.f32 %v7658_v39, %v6939_v13  ;;  %v4506_v22 = vpop.f32.mrb[51].mxu1  ;;  %v4529_v47 = vsel %vm1804_vm7, %v9839_v63, 0.0 }
 0xdb0   : > { %v4525_v33 = vsel %vm1804_vm7, %v9843_v5, 0.0  ;;  %v4544_v34 = vsel %vm1804_vm7, %v9843_v5, -inf  ;;  %v9857_v28 = vadd.f32 %v6939_v13, %v4506_v22  ;;  %v4549_v3 = vmax.f32 %v4542_v57, %v4548_v15 }
 0xdb1   : > { %v4526_v23 = vadd.f32 %v4525_v33, %v4524_v16  ;;  %v4550_v0 = vsel %vm1804_vm7, %v9849_v9, -inf  ;;  %v4545_v13 = vmax.f32 %v4540_v19, %v4544_v34  ;;  %v4531_v30 = vsel %vm1804_vm7, %v9849_v9, 0.0 }
 0xdb2   : > { %v4551_v24 = vmax.f32 %v4543_v46, %v4550_v0  ;;  %v4527_v21 = vsel %vm1804_vm7, %v9857_v28, 0.0  ;;  %v4546_v11 = vsel %vm1804_vm7, %v9857_v28, -inf }
 0xdb3   : > { %v4528_v8 = vadd.f32 %v4527_v21, %v4526_v23  ;;  %v4547_v4 = vmax.f32 %v4541_v14, %v4546_v11 }
 0xdb4   : > { %v4553_v25 = vmax.f32 %v4549_v3, %v4551_v24 }
 0xdb5   : > { %v4530_v35 = vadd.f32 %v4529_v47, %v4528_v8  ;;  %v4552_v20 = vmax.f32 %v4545_v13, %v4547_v4  ;;  %v4615_v13 = vld [vmem:[%s10767_s18] sm:$0x1]  ;;  %s10787_s18 = smov 56  }
 0xdb6   : > { %v4666_v8 = vsel %vm10768_vm5, %v4615_v13, 0  ;;  %vm10770_vm5 = vmmov %vm10769_vm12 }
 0xdb7   : > { %v4532_v62 = vadd.f32 %v4531_v30, %v4530_v35  ;;  %v4554_v39 = vmax.f32 %v4552_v20, %v4553_v25 }
 0xdb9   : > { %v4533_v57 = vrot.slane %v4532_v62, 4  ;;  %v4555_v15 = vrot.slane %v4554_v39, 4 }
 0xdbb   : > { %v4534_v16 = vadd.f32 %v4533_v57, %v4532_v62  ;;  %v4556_v22 = vmax.f32 %v4554_v39, %v4555_v15 }
 0xdbd   : > { %v4535_v33 = vrot.slane %v4534_v16, 2  ;;  %v4557_v19 = vrot.slane %v4556_v22, 2 }
 0xdbf   : > { %v4536_v46 = vadd.f32 %v4535_v33, %v4534_v16  ;;  %v4558_v23 = vmax.f32 %v4556_v22, %v4557_v19 }
 0xdc1   : > { %v4537_v34 = vrot.slane %v4536_v46, 1  ;;  %v4559_v24 = vrot.slane %v4558_v23, 1 }
 0xdc3   : > { %v4538_v14 = vadd.f32 %v4537_v34, %v4536_v46  ;;  %v4560_v21 = vmax.f32 %v4558_v23, %v4559_v24 }
 0xdc5   : > { %v4539_v0 = vmul.f32 0.015625, %v4538_v14  ;;  %v4616_v11 = vpack.c.bf16 %v4560_v21, %v4560_v21 }
 0xdc7   : > { %v4561_v3 = vpack.c.bf16 %v4539_v0, %v4539_v0 }
 0xdc9   : > { %7662 = vmatmul.mubr.msk.bf16.vlgmr.msra.gmra.mrb[52].mxu1 %vm1804_vm7, %v4561_v3 }
 0xdca   : > { %7666 = vmatpush3.bf16.msra.mxu1 %v9820_v41  ;;  %7667 = vmatprep.mubr.msk.bf16.mxu1 %vm10689_vm10, %v10764_v38 }
 0xdcb   : > { %7671 = vmatprep.subr.bf16.mxu1 %v10764_v38 }
 0xdd1   : > { %7668 = vmatmul.mubr.msk.bf16.vlgmr.msra.gmra.mrb[56].mxu1 %vm1804_vm7, %v4616_v11 }
 0xdd2   : > { %7673 = vmatprep.mubr.msk.bf16.mxu1 %vm10689_vm10, %v10764_v38  ;;  %7672 = vmatpush3.bf16.msra.mxu1 %v4666_v8 }
 0xdd3   : > { %7677 = vmatprep.subr.bf16.mxu1 %v10764_v38 }
 0xe9c   : > { %v4607_v4 = vpop.f32.mrb[52].mxu1 }
 0xe9d   : > { %v7663_v41 = vpop.f32.mrb[53].mxu1  ;;  %v4613_v15 = vmax.f32 %v4607_v4, 0.0 }
 0xe9e   : > { %v4610_v47 = vpop.f32.mrb[54].mxu1 }
 0xe9f   : > { %v7664_v25 = vpop.f32.mrb[55].mxu1  ;;  %v4614_v16 = vpack.c.bf16 %v4613_v15, %v4613_v15 }
 0xea4   : > { %v4654_v35 = vpop.f32.mrb[56].mxu1 }
 0xea5   : > { %v4660_v20 = vmax.f32 %v4654_v35, 0.0  ;;  %v7669_v30 = vpop.f32.mrb[57].mxu1 }
 0xea6   : > { %v4657_v62 = vpop.f32.mrb[58].mxu1 }
 0xea7   : > { %v4661_v39 = vpack.c.bf16 %v4660_v20, %v4660_v20  ;;  %v7670_v57 = vpop.f32.mrb[59].mxu1 }
 0xea9   : > { %7674 = vmatmul.mubr.msk.bf16.vlgmr.msra.gmra.mrb[60].mxu1 %vm10769_vm12, %v4661_v39  ;;  %vm10772_vm12 = vcmask 1044484  }
 0xeaa   : > { %7678 = vmatpush3.bf16.msra.mxu1 %v4666_v8  ;;  %7679 = vmatprep.mubr.msk.bf16.mxu1 %vm10689_vm10, %v10764_v38 }
 0xeb5   : > { %7680 = vmatmul.mubr.msk.bf16.vlgmr.msra.gmra.mrb[60].mxu1 %vm10770_vm5, %v4614_v16  ;;  %v5017_v16 = vld [vmem:[%s10771_s3] sm:$0xff]  ;;  %vm10773_vm5 = vcmask 1045509  }
 0xeb6   : > { %vm10774_vm10 = vmmov %vm10773_vm5 }
 0xf88   : > { %v4745_v22 = vpop.f32.mrb[60].mxu1 }
 0xf89   : > { %v6950_v33 = vmul.f32 -1.442695, %v4745_v22  ;;  %v7681_v46 = vpop.f32.mrb[61].mxu1  ;;  %v5018_v22 = vld [vmem:[%s10771_s3 + $0x8] sm:$0xff] }
 0xf8a   : > { %v4748_v19 = vpop.f32.mrb[62].mxu1 }
 0xf8b   : > { %8202 = vpow2.f32 %v6950_v33  ;;  %v7682_v34 = vpop.f32.mrb[63].mxu1  ;;  %v7917_v33 = vpack.c.bf16 %v5018_v22, %v5017_v16 }
 0xf8d   : > { %7918 = vmatpush3.bf16.msra.mxu0 %v7917_v33  ;;  %v5019_v33 = vld [vmem:[%s10771_s3 + $0x10] sm:$0xff] }
 0xf8e   : > { %7919 = vmatprep.subr.bf16.mxu0 %v10747_v54 }
 0xf95   : > { %v8203_v14 = vpop.eup %8202 }
 0xf96   : > { %v4754_v23 = vadd.f32 1.0, %v8203_v14 }
 0xf98   : > { %8204 = vrcp.f32 %v4754_v23 }
 0xfa2   : > { %v8205_v0 = vpop.eup %8204 }
 0xfa3   : > { %v4760_v3 = vrot.slane %v8205_v0, %v9330_v53 }
 0xfa5   : > { %v9890_v24 = vmul.f32 %v4760_v3, %v9829_v12  ;;  %v9893_v21 = vmul.f32 %v4760_v3, %v9825_v7  ;;  %v9900_v8 = vmul.f32 %v4760_v3, %v9827_v10  ;;  %v9903_v4 = vmul.f32 %v4760_v3, %v9833_v59 }
 0xfa6   : > { %v9910_v41 = vmul.f32 %v4760_v3, %v9857_v28  ;;  %v9913_v47 = vmul.f32 %v4760_v3, %v9839_v63  ;;  %v9920_v25 = vmul.f32 %v4760_v3, %v9843_v5  ;;  %v9923_v35 = vmul.f32 %v4760_v3, %v9849_v9 }
 0xfa7   : > { %v4772_v11 = vsel %vm1804_vm7, %v9890_v24, 0.0  ;;  %v4769_v13 = vsel %vm1804_vm7, %v9893_v21, 0.0  ;;  %v4775_v12 = vsel %vm1804_vm7, %v9900_v8, 0.0  ;;  %v4778_v7 = vsel %vm1804_vm7, %v9903_v4, 0.0 }
 0xfa8   : > { %4773 = vadd.xlane.f32.xlu0 %v4772_v11  ;;  %4770 = vadd.xlane.f32.xlu1 %v4769_v13  ;;  %v4784_v10 = vsel %vm1804_vm7, %v9910_v41, 0.0  ;;  %v4787_v59 = vsel %vm1804_vm7, %v9913_v47, 0.0  ;;  %v4781_v63 = vsel %vm1804_vm7, %v9920_v25, 0.0  ;;  %v4790_v28 = vsel %vm1804_vm7, %v9923_v35, 0.0 }
 0xfa9   : > { %v4801_v20 = vsel %vm1804_vm7, %v9893_v21, -inf  ;;  %v4804_v5 = vsel %vm1804_vm7, %v9890_v24, -inf  ;;  %v4807_v9 = vsel %vm1804_vm7, %v9900_v8, -inf  ;;  %v4810_v30 = vsel %vm1804_vm7, %v9903_v4, -inf }
 0xfaa   : > { %v4816_v62 = vsel %vm1804_vm7, %v9910_v41, -inf  ;;  %v4819_v39 = vsel %vm1804_vm7, %v9913_v47, -inf  ;;  %v4813_v57 = vsel %vm1804_vm7, %v9920_v25, -inf  ;;  %v4822_v15 = vsel %vm1804_vm7, %v9923_v35, -inf }
 0xfac   : > { %4776 = vadd.xlane.f32.xlu0 %v4775_v12  ;;  %4779 = vadd.xlane.f32.xlu1 %v4778_v7 }
 0xfb0   : > { %4785 = vadd.xlane.f32.xlu0 %v4784_v10  ;;  %4788 = vadd.xlane.f32.xlu1 %v4787_v59 }
 0xfb4   : > { %4782 = vadd.xlane.f32.xlu0 %v4781_v63  ;;  %4791 = vadd.xlane.f32.xlu1 %v4790_v28 }
 0xfb8   : > { %4802 = vmax.xlane.f32.xlu0 %v4801_v20  ;;  %4805 = vmax.xlane.f32.xlu1 %v4804_v5 }
 0xfbc   : > { %4808 = vmax.xlane.f32.xlu0 %v4807_v9  ;;  %4811 = vmax.xlane.f32.xlu1 %v4810_v30 }
 0xfc0   : > { %4817 = vmax.xlane.f32.xlu0 %v4816_v62  ;;  %4820 = vmax.xlane.f32.xlu1 %v4819_v39 }
 0xfc4   : > { %4814 = vmax.xlane.f32.xlu0 %v4813_v57  ;;  %4823 = vmax.xlane.f32.xlu1 %v4822_v15 }
0x1035   : > { %v4774_v46 = vpop.xlane.xlu0 %4773  ;;  %v4771_v19 = vpop.xlane.xlu1 %4770 }
0x1036   : > { %v4794_v13 = vmul.f32 0.0625, %v4774_v46  ;;  %v4793_v12 = vmul.f32 0.0625, %v4771_v19  ;;  %v5020_v46 = vld [vmem:[%s10771_s3 + $0x18] sm:$0xff] }
0x1038   : > { %v4840_v63 = vrot.slane %v4794_v13, %v9392_v42  ;;  %v4836_v28 = vrot.slane %v4793_v12, %v9392_v42  ;;  %v5021_v13 = vld [vmem:[%s10771_s3 + $0x20] sm:$0xff]  ;;  %v5022_v12 = vld [vmem:[%s10771_s3 + $0x28] sm:$0xff] }
0x1039   : > { %v4777_v34 = vpop.xlane.xlu0 %4776  ;;  %v4780_v14 = vpop.xlane.xlu1 %4779 }
0x103a   : > { %v4795_v7 = vmul.f32 0.0625, %v4777_v34  ;;  %v4796_v5 = vmul.f32 0.0625, %v4780_v14  ;;  %v4865_v19 = vsel %vm10772_vm12, %v4840_v63, %v4836_v28 }
0x103c   : > { %v4844_v20 = vrot.slane %v4795_v7, %v9392_v42  ;;  %v4848_v14 = vrot.slane %v4796_v5, %v9392_v42  ;;  %v7920_v7 = vpack.c.bf16 %v5020_v46, %v5019_v33 }
0x103d   : > { %v4786_v23 = vpop.xlane.xlu0 %4785  ;;  %v4789_v0 = vpop.xlane.xlu1 %4788 }
0x103e   : > { %v4798_v9 = vmul.f32 0.0625, %v4786_v23  ;;  %v4799_v30 = vmul.f32 0.0625, %v4789_v0  ;;  %7921 = vmatpush3.bf16.msra.mxu0 %v7920_v7 }
0x103f   : > { %7922 = vmatprep.subr.bf16.mxu0 %v10747_v54 }
0x1040   : > { %v4856_v23 = vrot.slane %v4798_v9, %v9392_v42  ;;  %v4860_v0 = vrot.slane %v4799_v30, %v9392_v42  ;;  %v7923_v30 = vpack.c.bf16 %v5022_v12, %v5021_v13 }
0x1041   : > { %v4783_v3 = vpop.xlane.xlu0 %4782  ;;  %v4792_v11 = vpop.xlane.xlu1 %4791 }
0x1042   : > { %v4797_v57 = vmul.f32 0.0625, %v4783_v3  ;;  %v4800_v15 = vmul.f32 0.0625, %v4792_v11  ;;  %7924 = vmatpush3.bf16.msra.mxu0 %v7923_v30  ;;  %v5026_v30 = vld [vmem:[%s10771_s3 + $0x48] sm:$0xff] }
0x1043   : > { %7925 = vmatprep.subr.bf16.mxu0 %v10747_v54 }
0x1044   : > { %v4864_v63 = vrot.slane %v4800_v15, %v9392_v42 }
0x1045   : > { %v4803_v10 = vpop.xlane.xlu0 %4802  ;;  %v4806_v59 = vpop.xlane.xlu1 %4805 }
0x1046   : > { %v4886_v16 = vrot.slane %v4803_v10, %v9392_v42  ;;  %v4890_v22 = vrot.slane %v4806_v59, %v9392_v42  ;;  %v4866_v10 = vsel %vm10773_vm5, %v4844_v20, %v4865_v19  ;;  %v4852_v59 = vrot.slane %v4797_v57, %v9392_v42  ;;  %v5023_v19 = vld [vmem:[%s10771_s3 + $0x30] sm:$0xff] }
0x1047   : > { %vm10775_vm5 = vcmask 1046534   ;;  %v4869_v57 = vsel %vm10776_vm11, %v4860_v0, %v4856_v23 }
0x1048   : > { %v4915_v28 = vsel %vm10772_vm12, %v4890_v22, %v4886_v16  ;;  %v4867_v20 = vsel %vm10775_vm5, %v4848_v14, %v4866_v10  ;;  %v5024_v16 = vld [vmem:[%s10771_s3 + $0x38] sm:$0xff]  ;;  %vm10777_vm12 = vcmask 1047559   ;;  %v4870_v22 = vsel %vm10778_vm13, %v4864_v63, %v4869_v57  ;;  %vm10779_vm14 = vmmov %vm10775_vm5 }
0x1049   : > { %v4809_v62 = vpop.xlane.xlu0 %4808  ;;  %v4812_v39 = vpop.xlane.xlu1 %4811  ;;  %v7926_v14 = vpack.c.bf16 %v5024_v16, %v5023_v19  ;;  %vm10782_vm5 = vmmov %vm10778_vm13 }
0x104a   : > { %v4894_v34 = vrot.slane %v4809_v62, %v9392_v42  ;;  %v4898_v62 = vrot.slane %v4812_v39, %v9392_v42  ;;  %v4868_v39 = vsel %vm10777_vm12, %v4852_v59, %v4867_v20 }
0x104b   : > { %7927 = vmatpush3.bf16.msra.mxu0 %v7926_v14 }
0x104c   : > { %v4916_v33 = vsel %vm10774_vm10, %v4894_v34, %v4915_v28  ;;  %vm10780_vm10 = vmmov %vm10776_vm11  ;;  %7928 = vmatprep.subr.bf16.mxu0 %v10747_v54 }
0x104d   : > { %v4818_v3 = vpop.xlane.xlu0 %4817  ;;  %v4821_v11 = vpop.xlane.xlu1 %4820  ;;  %v4917_v34 = vsel %vm10779_vm14, %v4898_v62, %v4916_v33  ;;  %vm10781_vm11 = vmmov %vm10777_vm12  ;;  %vm10783_vm12 = vcmask 1042432  }
0x104e   : > { %v4906_v5 = vrot.slane %v4818_v3, %v9392_v42  ;;  %v4910_v9 = vrot.slane %v4821_v11, %v9392_v42  ;;  %v9985_v11 = vsel %vm10783_vm12, 0.0, %v4868_v39  ;;  %vm10784_vm13 = vmmov %vm10783_vm12  ;;  %v5027_v39 = vld [vmem:[%s10771_s3 + $0x50] sm:$0xff] }
0x104f   : > { %v4874_v7 = vsel %vm10784_vm13, %v4870_v22, 0.0  ;;  %vm10785_vm6 = vmmov %vm10783_vm12  ;;  %v4927_v57 = vrot.slane %v9985_v11, 1  ;;  %v5028_v22 = vld [vmem:[%s10771_s3 + $0x58] sm:$0xff]  ;;  %vm10796_vm12 = vcmask 1041408  }
0x1050   : > { %v4919_v12 = vsel %vm10780_vm10, %v4910_v9, %v4906_v5  ;;  %vm10786_vm14 = vmmov %vm10785_vm6  ;;  %v5025_v9 = vld [vmem:[%s10771_s3 + $0x40] sm:$0xff]  ;;  %vm10789_vm10 = vcmask 1045504   ;;  %v4934_v19 = vrot.slane %v4874_v7, 2 }
0x1051   : > { %v4815_v46 = vpop.xlane.xlu0 %4814  ;;  %v4824_v15 = vpop.xlane.xlu1 %4823  ;;  %v7929_v16 = vpack.c.bf16 %v5026_v30, %v5025_v9  ;;  %v4958_v9 = vrot.slane %v4874_v7, 6 }
0x1052   : > { %v4902_v3 = vrot.slane %v4815_v46, %v9392_v42  ;;  %v4914_v13 = vrot.slane %v4824_v15, %v9392_v42  ;;  %v4928_v46 = vrot.slane %v4874_v7, 1  ;;  %v4933_v15 = vrot.slane %v9985_v11, 2 }
0x1053   : > { %7930 = vmatpush3.bf16.msra.mxu0 %v7929_v16 }
0x1054   : > { %v4918_v23 = vsel %vm10781_vm11, %v4902_v3, %v4917_v34  ;;  %v4920_v0 = vsel %vm10782_vm5, %v4914_v13, %v4919_v12  ;;  %v4945_v13 = vrot.slane %v9985_v11, 4  ;;  %v4946_v34 = vrot.slane %v4874_v7, 4  ;;  %vm10794_vm5 = vmmov %vm10789_vm10  ;;  %7931 = vmatprep.subr.bf16.mxu0 %v10747_v54 }
0x1055   : > { %v9989_v10 = vsel %vm10785_vm6, 0.0, %v4918_v23  ;;  %v9992_v59 = vsel %vm10786_vm14, %v4920_v0, 0.0  ;;  %vm10788_vm6 = vcmask 1046528   ;;  %v7932_v12 = vpack.c.bf16 %v5028_v22, %v5027_v39  ;;  %vm10801_vm14 = vmmov %vm10784_vm13 }
0x1056   : > { %4964 = vrot.lane.b32.xlu1 %v9989_v10, %s10787_s18  ;;  %v4968_v63 = vrot.slane %v9989_v10, 1  ;;  %v4969_v28 = vrot.slane %v9992_v59, 1  ;;  %v4974_v62 = vrot.slane %v9989_v10, 2  ;;  %v4975_v5 = vrot.slane %v9992_v59, 2  ;;  %vm10792_vm11 = vmmov %vm10788_vm6 }
0x1057   : > { %v4929_v3 = vsel %vm10792_vm11, %v4927_v57, %v4928_v46  ;;  %v4935_v14 = vsel %vm10794_vm5, %v4933_v15, %v4934_v19  ;;  %v4939_v23 = vrot.slane %v9985_v11, 3  ;;  %v4940_v0 = vrot.slane %v4874_v7, 3  ;;  %7933 = vmatpush3.bf16.msra.mxu0 %v7932_v12 }
0x1058   : > { %v4970_v33 = vsel %vm10788_vm6, %v4968_v63, %v4969_v28  ;;  %v4976_v20 = vsel %vm10789_vm10, %v4974_v62, %v4975_v5  ;;  %v5029_v63 = vld [vmem:[%s10771_s3 + $0x60] sm:$0xff]  ;;  %v5030_v28 = vld [vmem:[%s10771_s3 + $0x68] sm:$0xff]  ;;  %v4947_v62 = vsel %vm1063_vm0, %v4945_v13, %v4946_v34  ;;  %v4957_v5 = vrot.slane %v9985_v11, 6  ;;  %7934 = vmatprep.subr.bf16.mxu0 %v10747_v54  ;;  %s10797_s3 = smov 48   ;;  %vm10803_vm6 = vmmov %vm10796_vm12 }
0x1059   : > { %4971 = vrot.lane.b32.xlu0 %v4970_v33, %s10790_s5  ;;  %v7935_v30 = vpack.c.bf16 %v5030_v28, %v5029_v63  ;;  %v4941_v33 = vsel %vm3243_vm15, %v4939_v23, %v4940_v0  ;;  %v4952_v57 = vrot.slane %v4874_v7, 5  ;;  %v4980_v15 = vrot.slane %v9989_v10, 3 }
0x105a   : > { %4977 = vrot.lane.b32.xlu1 %v4976_v20, %s10791_s6  ;;  %v4951_v20 = vrot.slane %v9985_v11, 5  ;;  %v4959_v46 = vsel %vm10796_vm12, %v4957_v5, %v4958_v9  ;;  %v4981_v19 = vrot.slane %v9992_v59, 3  ;;  %v4986_v39 = vrot.slane %v9989_v10, 4 }
0x105b   : > { %7936 = vmatpush3.bf16.msra.mxu0 %v7935_v30  ;;  %v4987_v22 = vrot.slane %v9992_v59, 4  ;;  %v4993_v13 = vrot.slane %v9992_v59, 5  ;;  %v4998_v12 = vrot.slane %v9989_v10, 6  ;;  %vm10805_vm10 = vcmask 195584  }
0x105c   : > { %v4953_v16 = vsel %vm10784_vm13, %v4951_v20, %v4952_v57  ;;  %v4982_v7 = vsel %vm3243_vm15, %v4980_v15, %v4981_v19  ;;  %vm10806_vm11 = vcmask 326656   ;;  %vm10807_vm5 = vcmask 523264  }
0x105d   : > { %4930 = vrot.lane.b32.xlu0 %v4929_v3, %s10793_s8  ;;  %v4992_v3 = vrot.slane %v9989_v10, 5  ;;  %v4988_v34 = vsel %vm1063_vm0, %v4986_v39, %v4987_v22  ;;  %vm10808_vm12 = vcmask 588800   ;;  %vm10809_vm13 = vcmask 654336  }
0x105e   : > { %4936 = vrot.lane.b32.xlu1 %v4935_v14, %s10760_s7  ;;  %v4999_v14 = vrot.slane %v9992_v59, 6 }
0x105f   : > { %v4994_v23 = vsel %vm10801_vm14, %v4992_v3, %v4993_v13  ;;  %vm10810_vm14 = vcmask 719872  }
0x1060   : > { %v5000_v0 = vsel %vm10803_vm6, %v4998_v12, %v4999_v14  ;;  %vm10812_vm6 = vcmask 785408  }
0x1061   : > { %4948 = vrot.lane.b32.xlu0 %v4947_v62, %s10759_s1 }
0x1062   : > { %4942 = vrot.lane.b32.xlu1 %v4941_v33, %s10795_s9 }
0x1065   : > { %4960 = vrot.lane.b32.xlu0 %v4959_v46, %s10797_s3 }
0x1066   : > { %4954 = vrot.lane.b32.xlu1 %v4953_v16, %s10798_s10 }
0x1069   : > { %4983 = vrot.lane.b32.xlu0 %v4982_v7, %s10799_s13 }
0x106a   : > { %4989 = vrot.lane.b32.xlu1 %v4988_v34, %s10800_s14 }
0x106d   : > { %4995 = vrot.lane.b32.xlu0 %v4994_v23, %s10802_s17 }
0x106e   : > { %5001 = vrot.lane.b32.xlu1 %v5000_v0, %s10804_s19 }
0x10c8   : > { %v4965_v63 = vpop.permute.xlu1 %4964 }
0x10cb   : > { %v4972_v28 = vpop.permute.xlu0 %4971 }
0x10cc   : > { %v4978_v62 = vpop.permute.xlu1 %4977 }
0x10cf   : > { %v4931_v5 = vpop.permute.xlu0 %4930 }
0x10d0   : > { %v4937_v9 = vpop.permute.xlu1 %4936  ;;  %v5004_v10 = vsel %vm1014_vm1, %v9985_v11, %v4931_v5 }
0x10d1   : > { %v5005_v59 = vsel %vm1804_vm7, %v5004_v10, %v4937_v9 }
0x10d3   : > { %v4949_v30 = vpop.permute.xlu0 %4948 }
0x10d4   : > { %v4943_v33 = vpop.permute.xlu1 %4942 }
0x10d5   : > { %v5006_v20 = vsel %vm10805_vm10, %v5005_v59, %v4943_v33  ;;  %vm10813_vm10 = vcmask 850944   ;;  %v8182_v33 = vld [vmem:[%s10811_s21] sm:$0xff]   ;;  %s10815_s21 = sld [smem:[#allocation26_spill]] }
0x10d6   : > { %v5007_v46 = vsel %vm1837_vm8, %v5006_v20, %v4949_v30  ;;  %7714 = vmatprep.subr.bf16.mxu1 %v8182_v33 }
0x10d7   : > { %v4961_v57 = vpop.permute.xlu0 %4960  ;;  %7715 = vmatpush3.bf16.msra.mxu1 %v8182_v33 }
0x10d8   : > { %v4955_v15 = vpop.permute.xlu1 %4954 }
0x10d9   : > { %v5008_v19 = vsel %vm10806_vm11, %v5007_v46, %v4955_v15  ;;  %vm10814_vm11 = vcmask 916480  }
0x10da   : > { %v5009_v16 = vsel %vm1926_vm9, %v5008_v19, %v4961_v57 }
0x10db   : > { %v5010_v39 = vsel %vm3318_vm3, %v5009_v16, %v4965_v63  ;;  %v4984_v22 = vpop.permute.xlu0 %4983  ;;  %v6953_v1 = vld [vmem:[%s10815_s21] ss:$0 sm:$0xff]  ;;  %s10817_s21 = sld [smem:[#allocation29_spill]] }
0x10dc   : > { %v5011_v7 = vsel %vm10807_vm5, %v5010_v39, %v4972_v28  ;;  %v4990_v11 = vpop.permute.xlu1 %4989  ;;  %vm10822_vm5 = vcmask 15360  }
0x10dd   : > { %v5012_v3 = vsel %vm10808_vm12, %v5011_v7, %v4978_v62  ;;  %vm10823_vm12 = vmmov %vm10822_vm5 }
0x10de   : > { %v5013_v13 = vsel %vm10809_vm13, %v5012_v3, %v4984_v22  ;;  %vm10824_vm13 = vcmask 1044484  }
0x10df   : > { %v5014_v34 = vsel %vm10810_vm14, %v5013_v13, %v4990_v11  ;;  %v4996_v12 = vpop.permute.xlu0 %4995  ;;  %vm10825_vm14 = vcmask 1045509  }
0x10e0   : > { %v5015_v14 = vsel %vm10812_vm6, %v5014_v34, %v4996_v12  ;;  %v5002_v23 = vpop.permute.xlu1 %5001  ;;  %vm10826_vm6 = vcmask 1046534  }
0x10e1   : > { %v5016_v0 = vsel %vm10813_vm10, %v5015_v14, %v5002_v23  ;;  %vm10827_vm10 = vcmask 1047559  }
0x10e2   : > { %7712 = vmatmul.mubr.msk.f32.vlgmr.msra.gmra.mrb[86].mxu0 %vm10814_vm11, %v5016_v0  ;;  %vm10828_vm11 = vcmask 1042432  }
0x11b5   : > { %v5100_v63 = vpop.f32.mrb[86].mxu0 }
0x11b6   : > { %v6952_v5 = vmul.f32 -1.442695, %v5100_v63  ;;  %v7713_v9 = vpop.f32.mrb[87].mxu0 }
0x11b8   : > { %8206 = vpow2.f32 %v6952_v5 }
0x11c2   : > { %v8207_v28 = vpop.eup %8206 }
0x11c3   : > { %v5107_v10 = vadd.f32 1.0, %v8207_v28 }
0x11c5   : > { %8208 = vrcp.f32 %v5107_v10 }
0x11cf   : > { %v8209_v62 = vpop.eup %8208 }
0x11d0   : > { %v5120_v30 = vrot.slane %v8209_v62, %v9555_v27  ;;  %v5113_v59 = vrot.slane %v8209_v62, %v9330_v53  ;;  %v5134_v20 = vrot.slane %v8209_v62, %v9560_v40  ;;  %v5127_v57 = vrot.slane %v8209_v62, %v9563_v45 }
0x11d1   : > { %v5148_v46 = vrot.slane %v8209_v62, %v9568_v58  ;;  %v5141_v15 = vrot.slane %v8209_v62, %v9571_v2  ;;  %v5162_v19 = vrot.slane %v8209_v62, %v9576_v50  ;;  %v5155_v16 = vrot.slane %v8209_v62, %v9579_v61 }
0x11d2   : > { %5122 = vbcast.lane.b32.xlu1 %v5120_v30, 256  ;;  %5115 = vbcast.lane.b32.xlu0 %v5113_v59, 256 }
0x11d6   : > { %5136 = vbcast.lane.b32.xlu1 %v5134_v20, 256  ;;  %5129 = vbcast.lane.b32.xlu0 %v5127_v57, 256 }
0x11da   : > { %5150 = vbcast.lane.b32.xlu1 %v5148_v46, 256  ;;  %5143 = vbcast.lane.b32.xlu0 %v5141_v15, 256 }
0x11de   : > { %5164 = vbcast.lane.b32.xlu1 %v5162_v19, 256  ;;  %5157 = vbcast.lane.b32.xlu0 %v5155_v16, 256 }
0x1244   : > { %v5123_v39 = vpop.permute.xlu1 %5122  ;;  %v5116_v22 = vpop.permute.xlu0 %5115 }
0x1245   : > { %v5167_v7 = vmul.f32 %v5123_v39, %v9890_v24  ;;  %v5166_v11 = vmul.f32 %v5116_v22, %v9893_v21 }
0x1247   : > { %v10075_v3 = vadd.f32 %v5167_v7, %v3696_v36  ;;  %v10079_v13 = vadd.f32 %v5166_v11, %v3695_v51 }
0x1248   : > { %v5137_v34 = vpop.permute.xlu1 %5136  ;;  %v5130_v12 = vpop.permute.xlu0 %5129 }
0x1249   : > { %v5183_v14 = vmax.f32 %v10075_v3, 0.0  ;;  %v5182_v23 = vmax.f32 %v10079_v13, 0.0  ;;  %v5169_v0 = vmul.f32 %v5137_v34, %v9903_v4  ;;  %v5168_v24 = vmul.f32 %v5130_v12, %v9900_v8 }
0x124b   : > { %v5190_v56 = vpack.c.bf16 %v5183_v14, %v5182_v23  ;;  %v10091_v49 = vadd.f32 %v5169_v0, %v3698_v18  ;;  %v10095_v51 = vadd.f32 %v5168_v24, %v3697_v26 }
0x124c   : > { %v5151_v36 = vpop.permute.xlu1 %5150  ;;  %v5144_v21 = vpop.permute.xlu0 %5143 }
0x124d   : > { %v5185_v63 = vmax.f32 %v10091_v49, 0.0  ;;  %v5184_v4 = vmax.f32 %v10095_v51, 0.0  ;;  %v5171_v8 = vmul.f32 %v5151_v36, %v9910_v41  ;;  %v5170_v5 = vmul.f32 %v5144_v21, %v9920_v25  ;;  %7716 = vmatprep.mubr.msk.bf16.mxu1 %vm1804_vm7, %v5190_v56 }
0x124f   : > { %v5191_v48 = vpack.c.bf16 %v5185_v63, %v5184_v4  ;;  %v10108_v55 = vadd.f32 %v5171_v8, %v3700_v6  ;;  %v10112_v18 = vadd.f32 %v5170_v5, %v3699_v31 }
0x1250   : > { %v5165_v26 = vpop.permute.xlu1 %5164  ;;  %v5158_v41 = vpop.permute.xlu0 %5157 }
0x1251   : > { %v5187_v25 = vmax.f32 %v10108_v55, 0.0  ;;  %v5186_v9 = vmax.f32 %v10112_v18, 0.0  ;;  %v5173_v28 = vmul.f32 %v5165_v26, %v9923_v35  ;;  %v5172_v10 = vmul.f32 %v5158_v41, %v9913_v47  ;;  %7717 = vmatmul.mubr.msk.bf16.vlgmr.msra.gmra.mrb[64].mxu1 %vm1804_vm7, %v5191_v48 }
0x1253   : > { %v5192_v17 = vpack.c.bf16 %v5187_v25, %v5186_v9  ;;  %v10125_v29 = vadd.f32 %v5173_v28, %v3702_v37  ;;  %v10129_v31 = vadd.f32 %v5172_v10, %v3701_v43 }
0x1255   : > { %v5189_v6 = vmax.f32 %v10125_v29, 0.0  ;;  %v5188_v35 = vmax.f32 %v10129_v31, 0.0  ;;  %7720 = vmatprep.mubr.msk.bf16.mxu1 %vm1804_vm7, %v5192_v17  ;;  %v8183_v17 = vld [vmem:[%s10816_s24 + $0x18] sm:$0xff]  }
0x1256   : > { %7724 = vmatprep.subr.bf16.mxu1 %v8183_v17 }
0x1257   : > { %v5193_v47 = vpack.c.bf16 %v5189_v6, %v5188_v35  ;;  %7725 = vmatpush3.bf16.msra.mxu1 %v8183_v17 }
0x1259   : > { %7721 = vmatmul.mubr.msk.bf16.gmra.mrb[68].mxu1 %vm1804_vm7, %v5193_v47 }
0x1324   : > { %v7718_v37 = vpop.f32.mrb[64].mxu1 }
0x1325   : > { %v5264_v62 = vadd.f32 %v7718_v37, %v6953_v1  ;;  %v5255_v30 = vpop.f32.mrb[65].mxu1 }
0x1326   : > { %v5256_v44 = vadd.f32 %v6953_v1, %v5255_v30  ;;  %v7719_v43 = vpop.f32.mrb[66].mxu1 }
0x1327   : > { %v5288_v59 = vmax.f32 %v5264_v62, 0.0  ;;  %v5267_v33 = vadd.f32 %v7719_v43, %v6953_v1  ;;  %v5258_v20 = vpop.f32.mrb[67].mxu1 }
0x1328   : > { %v5286_v57 = vmax.f32 %v5256_v44, 0.0  ;;  %v5259_v46 = vadd.f32 %v6953_v1, %v5258_v20 }
0x1329   : > { %v7040_v15 = vpack.c.bf16 %v5288_v59, %v5288_v59  ;;  %v5289_v19 = vmax.f32 %v5267_v33, 0.0 }
0x132a   : > { %v7038_v16 = vpack.c.bf16 %v5286_v57, %v5286_v57  ;;  %v5287_v39 = vmax.f32 %v5259_v46, 0.0 }
0x132b   : > { %v5333_v22 = vshrl.u32 %v7040_v15, 16  ;;  %v7041_v7 = vpack.c.bf16 %v5289_v19, %v5289_v19  ;;  %v5336_v11 = vshll.u32 %v7040_v15, 16 }
0x132c   : > { %v5319_v34 = vshrl.u32 %v7038_v16, 16  ;;  %v5322_v12 = vshll.u32 %v7038_v16, 16  ;;  %v7039_v0 = vpack.c.bf16 %v5287_v39, %v5287_v39  ;;  %v7722_v24 = vpop.f32.mrb[68].mxu1 }
0x132d   : > { %v5335_v56 = vrot.slane %v5333_v22, 7  ;;  %v5340_v36 = vshrl.u32 %v7041_v7, 16  ;;  %v5343_v21 = vshll.u32 %v7041_v7, 16  ;;  %v5280_v8 = vadd.f32 %v7722_v24, %v6953_v1  ;;  %v5271_v5 = vpop.f32.mrb[69].mxu1 }
0x132e   : > { %v5321_v48 = vrot.slane %v5319_v34, 7  ;;  %v5326_v26 = vshrl.u32 %v7039_v0, 16  ;;  %v5329_v41 = vshll.u32 %v7039_v0, 16  ;;  %v5272_v28 = vadd.f32 %v6953_v1, %v5271_v5  ;;  %v7723_v10 = vpop.f32.mrb[70].mxu1 }
0x132f   : > { %v5338_v47 = vor.u32 %v5336_v11, %v5335_v56  ;;  %v5342_v37 = vrot.slane %v5340_v36, 7  ;;  %v5292_v62 = vmax.f32 %v5280_v8, 0.0  ;;  %v5283_v30 = vadd.f32 %v7723_v10, %v6953_v1  ;;  %v5274_v44 = vpop.f32.mrb[71].mxu1 }
0x1330   : > { %v5324_v43 = vor.u32 %v5322_v12, %v5321_v48  ;;  %v5328_v59 = vrot.slane %v5326_v26, 7  ;;  %v5290_v33 = vmax.f32 %v5272_v28, 0.0  ;;  %v5275_v20 = vadd.f32 %v6953_v1, %v5274_v44  ;;  %v8184_v26 = vld [vmem:[%s10816_s24 + $0x20] sm:$0xff]  }
0x1331   : > { %v5384_v57 = vsel %vm8662_vm4, 0, %v5338_v47  ;;  %v5345_v46 = vor.u32 %v5343_v21, %v5342_v37  ;;  %v7044_v15 = vpack.c.bf16 %v5292_v62, %v5292_v62  ;;  %v5293_v19 = vmax.f32 %v5283_v30, 0.0  ;;  %7726 = vmatprep.subr.bf16.mxu1 %v8184_v26 }
0x1332   : > { %v5331_v16 = vor.u32 %v5329_v41, %v5328_v59  ;;  %v7042_v39 = vpack.c.bf16 %v5290_v33, %v5290_v33  ;;  %v10145_v22 = vsel %vm9650_vm2, %v5384_v57, 0  ;;  %v5382_v1 = vsel %vm8662_vm4, 0, %v5324_v43  ;;  %7727 = vmatpush3.bf16.msra.mxu1 %v8184_v26 }
0x1333   : > { %v5385_v7 = vsel %vm8662_vm4, 0, %v5345_v46  ;;  %v5361_v11 = vshrl.u32 %v7044_v15, 16  ;;  %v7045_v56 = vpack.c.bf16 %v5293_v19, %v5293_v19  ;;  %v5291_v36 = vmax.f32 %v5275_v20, 0.0  ;;  %v8185_v46 = vld [vmem:[%s10816_s24 + $0x28] sm:$0xff]  }
0x1334   : > { %v10153_v34 = vsel %vm9650_vm2, %v5385_v7, 0  ;;  %v5383_v12 = vsel %vm8662_vm4, 0, %v5331_v16  ;;  %v5347_v0 = vshrl.u32 %v7042_v39, 16  ;;  %v5364_v21 = vshll.u32 %v7044_v15, 16  ;;  %7728 = vmatprep.subr.bf16.mxu1 %v8185_v46 }
0x1335   : > { %v5363_v24 = vrot.slane %v5361_v11, 7  ;;  %v5470_v5 = vrot.slane %v10145_v22, 1  ;;  %v5471_v48 = vrot.slane %v10153_v34, 1  ;;  %v10162_v41 = vsel %vm9650_vm2, %v5382_v1, 0 }
0x1336   : > { %v5349_v8 = vrot.slane %v5347_v0, 7  ;;  %v10166_v28 = vsel %vm9650_vm2, %v5383_v12, 0  ;;  %v5368_v10 = vshrl.u32 %v7045_v56, 16  ;;  %v7043_v17 = vpack.c.bf16 %v5291_v36, %v5291_v36  ;;  %7729 = vmatpush3.bf16.msra.mxu1 %v8185_v46 }
0x1337   : > { %v5366_v47 = vor.u32 %v5364_v21, %v5363_v24  ;;  %v5350_v37 = vshll.u32 %v7042_v39, 16  ;;  %5479 = vrot.lane.b32.xlu0 %v5470_v5, %s10759_s1  ;;  %5481 = vrot.lane.b32.xlu1 %v5471_v48, %s10759_s1  ;;  %v5415_v62 = vshll.u32 %v10145_v22, 16  ;;  %v5371_v44 = vshll.u32 %v7045_v56, 16 }
0x1338   : > { %v5370_v30 = vrot.slane %v5368_v10, 7  ;;  %v5354_v43 = vshrl.u32 %v7043_v17, 16  ;;  %v5468_v33 = vrot.slane %v10162_v41, 1  ;;  %v5469_v20 = vrot.slane %v10166_v28, 1 }
0x1339   : > { %v5352_v59 = vor.u32 %v5350_v37, %v5349_v8  ;;  %v5417_v57 = vrot.slane %v5415_v62, 1  ;;  %v5357_v16 = vshll.u32 %v7043_v17, 16  ;;  %v5422_v39 = vshll.u32 %v10153_v34, 16 }
0x133a   : > { %v5373_v15 = vor.u32 %v5371_v44, %v5370_v30  ;;  %v5356_v19 = vrot.slane %v5354_v43, 7  ;;  %v5388_v7 = vsel %vm8662_vm4, 0, %v5366_v47  ;;  %v5413_v11 = vshrl.u32 %v10145_v22, 16 }
0x133b   : > { %5475 = vrot.lane.b32.xlu0 %v5468_v33, %s10759_s1  ;;  %5477 = vrot.lane.b32.xlu1 %v5469_v20, %s10759_s1  ;;  %v5420_v1 = vshrl.u32 %v10153_v34, 16  ;;  %v5401_v12 = vshll.u32 %v10162_v41, 16  ;;  %v5424_v56 = vrot.slane %v5422_v39, 1  ;;  %v5408_v36 = vshll.u32 %v10166_v28, 16  ;;  %v8186_v39 = vld [vmem:[%s10816_s24] sm:$0xff]  }
0x133c   : > { %v5389_v0 = vsel %vm8662_vm4, 0, %v5373_v15  ;;  %v5359_v24 = vor.u32 %v5357_v16, %v5356_v19  ;;  %v5418_v21 = vor.u32 %v5417_v57, %v5413_v11  ;;  %v10187_v5 = vsel %vm9650_vm2, %v5388_v7, 0  ;;  %7738 = vmatprep.subr.bf16.mxu1 %v8186_v39 }
0x133d   : > { %v5403_v8 = vrot.slane %v5401_v12, 1  ;;  %v5425_v48 = vor.u32 %v5424_v56, %v5420_v1  ;;  %v5410_v26 = vrot.slane %v5408_v36, 1  ;;  %v5386_v10 = vsel %vm8662_vm4, 0, %v5352_v59 }
0x133e   : > { %v10193_v17 = vsel %vm9650_vm2, %v5389_v0, 0  ;;  %v5387_v47 = vsel %vm8662_vm4, 0, %v5359_v24  ;;  %v5399_v37 = vshrl.u32 %v10162_v41, 16  ;;  %v5406_v62 = vshrl.u32 %v10166_v28, 16 }
0x133f   : > { %5451 = vrot.lane.b32.xlu0 %v5418_v21, %s10760_s7  ;;  %5453 = vrot.lane.b32.xlu1 %v5425_v48, %s10760_s7  ;;  %v5443_v44 = vshll.u32 %v10187_v5, 16  ;;  %v10204_v43 = vsel %vm9650_vm2, %v5386_v10, 0  ;;  %v10208_v52 = vsel %vm9650_vm2, %v5387_v47, 0  ;;  %v5526_v33 = vshll.u32 %v10193_v17, 16 }
0x1340   : > { %v5404_v30 = vor.u32 %v5403_v8, %v5399_v37  ;;  %v5411_v59 = vor.u32 %v5410_v26, %v5406_v62  ;;  %v5473_v20 = vrot.slane %v10208_v52, 1  ;;  %v5429_v46 = vshll.u32 %v10204_v43, 16 }
0x1341   : > { %v5445_v57 = vrot.slane %v5443_v44, 1  ;;  %v5472_v15 = vrot.slane %v10204_v43, 1  ;;  %v5528_v19 = vrot.slane %v5526_v33, 1  ;;  %v5436_v16 = vshll.u32 %v10208_v52, 16 }
0x1342   : > { %v5441_v60 = vshrl.u32 %v10187_v5, 16  ;;  %v5524_v7 = vshrl.u32 %v10193_v17, 16  ;;  %v5431_v1 = vrot.slane %v5429_v46, 1  ;;  %v5427_v24 = vshrl.u32 %v10204_v43, 16 }
0x1343   : > { %5447 = vrot.lane.b32.xlu0 %v5404_v30, %s10760_s7  ;;  %5449 = vrot.lane.b32.xlu1 %v5411_v59, %s10760_s7  ;;  %v5438_v0 = vrot.slane %v5436_v16, 1  ;;  %v5434_v56 = vshrl.u32 %v10208_v52, 16  ;;  %v5474_v8 = vrot.slane %v10187_v5, 1  ;;  %v5533_v48 = vrot.slane %v10193_v17, 1 }
0x1344   : > { %v5446_v11 = vor.u32 %v5445_v57, %v5441_v60  ;;  %v5529_v12 = vor.u32 %v5528_v19, %v5524_v7  ;;  %v5432_v36 = vor.u32 %v5431_v1, %v5427_v24  ;;  %v8187_v1 = vld [vmem:[%s10816_s24 + $0x8] sm:$0xff]   ;;  %vm10819_vm2 = vmmov 0  }
0x1345   : > { %v5439_v21 = vor.u32 %v5438_v0, %v5434_v56  ;;  %vm10821_vm4 = vcmask 1040384  }
0x1347   : > { %5485 = vrot.lane.b32.xlu0 %v5473_v20, %s10759_s1  ;;  %5483 = vrot.lane.b32.xlu1 %v5472_v15, %s10759_s1 }
0x134b   : > { %5459 = vrot.lane.b32.xlu0 %v5446_v11, %s10760_s7  ;;  %5530 = vrot.lane.b32.xlu1 %v5529_v12, %s10760_s7 }
0x134f   : > { %5455 = vrot.lane.b32.xlu0 %v5432_v36, %s10760_s7  ;;  %5457 = vrot.lane.b32.xlu1 %v5439_v21, %s10760_s7  ;;  %v8189_v36 = vld [vmem:[%s10816_s24 + $0x30] sm:$0xff]  }
0x1353   : > { %5487 = vrot.lane.b32.xlu0 %v5474_v8, %s10759_s1  ;;  %5534 = vrot.lane.b32.xlu1 %v5533_v48, %s10759_s1 }
0x13a9   : > { %v5480_v26 = vpop.permute.xlu0 %5479  ;;  %v5482_v10 = vpop.permute.xlu1 %5481 }
0x13ad   : > { %v5476_v47 = vpop.permute.xlu0 %5475  ;;  %v5478_v37 = vpop.permute.xlu1 %5477 }
0x13b1   : > { %v5452_v62 = vpop.permute.xlu0 %5451  ;;  %v5454_v30 = vpop.permute.xlu1 %5453 }
0x13b2   : > { %v5496_v44 = vsel %vm1804_vm7, %v10153_v34, %v5454_v30  ;;  %v5494_v33 = vsel %vm1804_vm7, %v10145_v22, %v5452_v62 }
0x13b3   : > { %v5510_v46 = vsel %vm1837_vm8, %v5496_v44, %v5482_v10  ;;  %v5508_v34 = vsel %vm1837_vm8, %v5494_v33, %v5480_v26  ;;  %v8190_v44 = vld [vmem:[%s10816_s24 + $0x38] sm:$0xff]  }
0x13b4   : > { %v6974_v22 = vcombine.low %v5508_v34, %v5510_v46 }
0x13b5   : > { %v5448_v59 = vpop.permute.xlu0 %5447  ;;  %v5450_v57 = vpop.permute.xlu1 %5449 }
0x13b6   : > { %v5490_v20 = vsel %vm1804_vm7, %v10162_v41, %v5448_v59  ;;  %v5492_v15 = vsel %vm1804_vm7, %v10166_v28, %v5450_v57  ;;  %v8188_v28 = vld [vmem:[%s10816_s24 + $0x10] sm:$0xff]   ;;  %v8192_v57 = vld [vmem:[%s10817_s21] sm:$0xff]  }
0x13b7   : > { %v5504_v19 = vsel %vm1837_vm8, %v5490_v20, %v5476_v47  ;;  %v5506_v16 = vsel %vm1837_vm8, %v5492_v15, %v5478_v37  ;;  %7766 = vmatprep.subr.bf16.mxu0 %v8192_v57 }
0x13b8   : > { %v6973_v60 = vcombine.low %v5504_v19, %v5506_v16  ;;  %v6984_v30 = vcombine.low %v9793_v32, %v5504_v19  ;;  %7767 = vmatpush3.bf16.msra.mxu0 %v8192_v57 }
0x13b9   : > { %v5486_v7 = vpop.permute.xlu0 %5485  ;;  %v5484_v11 = vpop.permute.xlu1 %5483  ;;  %7776 = vmatprep.subr.bf16.mxu0 %v10764_v38 }
0x13ba   : > { %7730 = vmatprep.mubr.msk.bf16.mxu1 %vm1926_vm9, %v6973_v60 }
0x13bb   : > { %7731 = vmatmul.mubr.msk.bf16.vlgmr.msra.gmra.mrb[72].mxu1 %vm1926_vm9, %v6974_v22 }
0x13bc   : > { %7739 = vmatpush3.bf16.msra.mxu1 %v8186_v39 }
0x13bd   : > { %v5460_v41 = vpop.permute.xlu0 %5459  ;;  %v5531_v12 = vpop.permute.xlu1 %5530  ;;  %7740 = vmatprep.subr.bf16.mxu1 %v8187_v1 }
0x13be   : > { %v5502_v10 = vsel %vm1804_vm7, %v10187_v5, %v5460_v41  ;;  %v6985_v5 = vcombine.low %v5506_v16, %v5508_v34 }
0x13c0   : > { %7741 = vmatpush3.bf16.msra.mxu1 %v8187_v1 }
0x13c1   : > { %v5456_v0 = vpop.permute.xlu0 %5455  ;;  %v5458_v56 = vpop.permute.xlu1 %5457  ;;  %7742 = vmatprep.subr.bf16.mxu1 %v8188_v28 }
0x13c2   : > { %v5498_v24 = vsel %vm1804_vm7, %v10204_v43, %v5456_v0  ;;  %v5500_v21 = vsel %vm1804_vm7, %v10208_v52, %v5458_v56  ;;  %v5537_v43 = vsel %vm1804_vm7, %v10193_v17, %v5531_v12  ;;  %v8191_v17 = vld [vmem:[%s10816_s24 + $0x40] sm:$0xff]  }
0x13c3   : > { %v5512_v8 = vsel %vm1837_vm8, %v5498_v24, %v5484_v11  ;;  %v5514_v48 = vsel %vm1837_vm8, %v5500_v21, %v5486_v7 }
0x13c4   : > { %v6975_v39 = vcombine.low %v5512_v8, %v5514_v48  ;;  %7743 = vmatpush3.bf16.msra.mxu1 %v8188_v28  ;;  %v6986_v59 = vcombine.low %v5510_v46, %v5512_v8  ;;  %v7009_v46 = vld [vmem:[%s10818_s25] ss:$0 sm:$0xff]  ;;  %s10820_s25 = sld [smem:[#allocation30_spill]] }
0x13c5   : > { %v5488_v26 = vpop.permute.xlu0 %5487  ;;  %v5535_v47 = vpop.permute.xlu1 %5534  ;;  %7752 = vmatprep.subr.bf16.mxu1 %v8189_v36 }
0x13c6   : > { %v5516_v37 = vsel %vm1837_vm8, %v5502_v10, %v5488_v26  ;;  %v5539_v52 = vsel %vm1837_vm8, %v5537_v43, %v5535_v47  ;;  %7734 = vmatprep.mubr.msk.bf16.mxu1 %vm1926_vm9, %v6975_v39 }
0x13c7   : > { %v6976_v62 = vcombine.low %v5516_v37, %v5539_v52  ;;  %v6987_v33 = vcombine.low %v5514_v48, %v5516_v37  ;;  %v7001_v20 = vcombine.low %v5539_v52, %v9793_v32 }
0x13c9   : > { %7735 = vmatmul.mubr.msk.bf16.gmra.mrb[76].mxu1 %vm1926_vm9, %v6976_v62 }
0x13ca   : > { %7744 = vmatprep.mubr.msk.bf16.mxu1 %vm1926_vm9, %v6984_v30  ;;  %v10288_v30 = vld [vmem:[%s8481_s27] sm:$0xff]  }
0x13d1   : > { %7745 = vmatmul.mubr.msk.bf16.vlgmr.msra.gmra.mrb[72].mxu1 %vm1926_vm9, %v6985_v5 }
0x13d2   : > { %7748 = vmatprep.mubr.msk.bf16.mxu1 %vm1926_vm9, %v6986_v59  ;;  %7753 = vmatpush3.bf16.msra.mxu1 %v8189_v36 }
0x13d3   : > { %7754 = vmatprep.subr.bf16.mxu1 %v8190_v44 }
0x13d6   : > { %7755 = vmatpush3.bf16.msra.mxu1 %v8190_v44 }
0x13d7   : > { %7756 = vmatprep.subr.bf16.mxu1 %v8191_v17 }
0x13d9   : > { %7749 = vmatmul.mubr.msk.bf16.gmra.mrb[76].mxu1 %vm1926_vm9, %v6987_v33 }
0x13da   : > { %7758 = vmatprep.mubr.msk.bf16.mxu1 %vm1926_vm9, %v6985_v5  ;;  %7757 = vmatpush3.bf16.msra.mxu1 %v8191_v17  ;;  %v7010_v5 = vld [vmem:[%s10820_s25] ss:$0 sm:$0xff] }
0x13db   : > { %7937 = vmatprep.subr.bf16.mxu1 %v10747_v54 }
0x13e1   : > { %7759 = vmatmul.mubr.msk.bf16.vlgmr.msra.gmra.mrb[72].mxu1 %vm1926_vm9, %v6986_v59 }
0x13e2   : > { %7762 = vmatprep.mubr.msk.bf16.mxu1 %vm1926_vm9, %v6987_v33 }
0x13e9   : > { %7763 = vmatmul.mubr.msk.bf16.gmra.mrb[76].mxu1 %vm1926_vm9, %v7001_v20 }
0x13ea   : > { %7828 = vmatprep.mubr.msk.f32.mxu1 %vm10819_vm2, %v10764_v38 }
0x14b4   : > { %v7760_v15 = vpop.f32.mrb[72].mxu1 }
0x14b5   : > { %v5872_v19 = vadd.f32 %v7760_v15, %v7009_v46  ;;  %v5824_v16 = vpop.f32.mrb[73].mxu1 }
0x14b6   : > { %v5870_v34 = vadd.f32 %v7009_v46, %v5824_v16  ;;  %v7761_v60 = vpop.f32.mrb[74].mxu1 }
0x14b7   : > { %v5873_v7 = vadd.f32 %v7761_v60, %v7009_v46  ;;  %v5827_v22 = vpop.f32.mrb[75].mxu1  ;;  %v5880_v32 = vmax.f32 %v5872_v19, 0.0 }
0x14b8   : > { %v5871_v11 = vadd.f32 %v7009_v46, %v5827_v22  ;;  %v5878_v41 = vmax.f32 %v5870_v34, 0.0 }
0x14b9   : > { %v5881_v1 = vmax.f32 %v5873_v7, 0.0 }
0x14ba   : > { %v5879_v12 = vmax.f32 %v5871_v11, 0.0 }
0x14bb   : > { %v5887_v28 = vpack.c.bf16 %v5881_v1, %v5880_v32 }
0x14bc   : > { %v5886_v0 = vpack.c.bf16 %v5879_v12, %v5878_v41  ;;  %v7764_v24 = vpop.f32.mrb[76].mxu1 }
0x14bd   : > { %v5876_v56 = vadd.f32 %v7764_v24, %v7009_v46  ;;  %v5840_v36 = vpop.f32.mrb[77].mxu1 }
0x14be   : > { %v5874_v21 = vadd.f32 %v7009_v46, %v5840_v36  ;;  %v7765_v8 = vpop.f32.mrb[78].mxu1  ;;  %7768 = vmatprep.mubr.msk.bf16.mxu0 %vm1804_vm7, %v5886_v0 }
0x14bf   : > { %v5877_v48 = vadd.f32 %v7765_v8, %v7009_v46  ;;  %v5843_v39 = vpop.f32.mrb[79].mxu1  ;;  %7769 = vmatmul.mubr.msk.bf16.vlgmr.msra.gmra.mrb[100].mxu0 %vm1804_vm7, %v5887_v28  ;;  %v5884_v10 = vmax.f32 %v5876_v56, 0.0 }
0x14c0   : > { %v5875_v26 = vadd.f32 %v7009_v46, %v5843_v39  ;;  %v5882_v47 = vmax.f32 %v5874_v21, 0.0  ;;  %7777 = vmatpush3.bf16.msra.mxu0 %v10288_v30 }
0x14c1   : > { %v5885_v43 = vmax.f32 %v5877_v48, 0.0  ;;  %7782 = vmatprep.subr.bf16.mxu0 %v10764_v38 }
0x14c2   : > { %v5883_v37 = vmax.f32 %v5875_v26, 0.0 }
0x14c3   : > { %v5889_v52 = vpack.c.bf16 %v5885_v43, %v5884_v10 }
0x14c4   : > { %v5888_v62 = vpack.c.bf16 %v5883_v37, %v5882_v47 }
0x14c6   : > { %7772 = vmatprep.mubr.msk.bf16.mxu0 %vm1804_vm7, %v5888_v62 }
0x14c7   : > { %7773 = vmatmul.mubr.msk.bf16.gmra.mrb[104].mxu0 %vm1804_vm7, %v5889_v52 }
0x14c8   : > { %7778 = vmatprep.mubr.msk.bf16.mxu0 %vm10819_vm2, %v10764_v38 }
0x1592   : > { %v7770_v44 = vpop.f32.mrb[100].mxu0 }
0x1593   : > { %v5951_v59 = vpop.f32.mrb[101].mxu0  ;;  %v10295_v57 = vadd.f32 %v7770_v44, %v7010_v5 }
0x1594   : > { %v10293_v17 = vadd.f32 %v7010_v5, %v5951_v59  ;;  %v7771_v33 = vpop.f32.mrb[102].mxu0 }
0x1595   : > { %v5954_v20 = vpop.f32.mrb[103].mxu0  ;;  %v10301_v19 = vadd.f32 %v7771_v33, %v7010_v5  ;;  %v5985_v60 = vsel %vm1804_vm7, %v10295_v57, 0.0  ;;  %v6006_v28 = vsel %vm1804_vm7, %v10295_v57, -inf }
0x1596   : > { %v10297_v46 = vadd.f32 %v7010_v5, %v5954_v20  ;;  %v5982_v15 = vsel %vm1804_vm7, %v10293_v17, 0.0  ;;  %v6004_v21 = vsel %vm1804_vm7, %v10293_v17, -inf }
0x1597   : > { %v5987_v1 = vsel %vm1804_vm7, %v10301_v19, 0.0  ;;  %v6007_v26 = vsel %vm1804_vm7, %v10301_v19, -inf }
0x1598   : > { %v5983_v16 = vsel %vm1804_vm7, %v10297_v46, 0.0  ;;  %v6005_v10 = vsel %vm1804_vm7, %v10297_v46, -inf }
0x1599   : > { %v5984_v34 = vadd.f32 %v5983_v16, %v5982_v15 }
0x159a   : > { %v7774_v7 = vpop.f32.mrb[104].mxu0 }
0x159b   : > { %v5986_v22 = vadd.f32 %v5985_v60, %v5984_v34  ;;  %v10307_v11 = vadd.f32 %v7774_v7, %v7010_v5  ;;  %v5967_v32 = vpop.f32.mrb[105].mxu0 }
0x159c   : > { %v10311_v41 = vadd.f32 %v7010_v5, %v5967_v32  ;;  %v7775_v12 = vpop.f32.mrb[106].mxu0 }
0x159d   : > { %v6012_v0 = vsel %vm1804_vm7, %v10307_v11, -inf  ;;  %v5988_v24 = vadd.f32 %v5987_v1, %v5986_v22  ;;  %v10317_v56 = vadd.f32 %v7775_v12, %v7010_v5  ;;  %v5970_v36 = vpop.f32.mrb[107].mxu0  ;;  %v5993_v20 = vsel %vm1804_vm7, %v10307_v11, 0.0 }
0x159e   : > { %v5989_v8 = vsel %vm1804_vm7, %v10311_v41, 0.0  ;;  %v6008_v48 = vsel %vm1804_vm7, %v10311_v41, -inf  ;;  %v10325_v39 = vadd.f32 %v7010_v5, %v5970_v36  ;;  %v6013_v37 = vmax.f32 %v6006_v28, %v6012_v0 }
0x159f   : > { %v5990_v43 = vadd.f32 %v5989_v8, %v5988_v24  ;;  %v6014_v47 = vsel %vm1804_vm7, %v10317_v56, -inf  ;;  %v6009_v5 = vmax.f32 %v6004_v21, %v6008_v48  ;;  %v5995_v60 = vsel %vm1804_vm7, %v10317_v56, 0.0 }
0x15a0   : > { %v6015_v52 = vmax.f32 %v6007_v26, %v6014_v47  ;;  %v5991_v62 = vsel %vm1804_vm7, %v10325_v39, 0.0  ;;  %v6010_v44 = vsel %vm1804_vm7, %v10325_v39, -inf }
0x15a1   : > { %v5992_v59 = vadd.f32 %v5991_v62, %v5990_v43  ;;  %v6011_v33 = vmax.f32 %v6005_v10, %v6010_v44 }
0x15a2   : > { %v6017_v15 = vmax.f32 %v6013_v37, %v6015_v52  ;;  %v6079_v52 = vld [vmem:[%s8486_s4] sm:$0x1] }
0x15a3   : > { %v5994_v16 = vadd.f32 %v5993_v20, %v5992_v59  ;;  %v6016_v34 = vmax.f32 %v6009_v5, %v6011_v33  ;;  %v6130_v62 = vsel %vm10821_vm4, %v6079_v52, 0  ;;  %vm10830_vm4 = vmmov %vm10825_vm14 }
0x15a5   : > { %v5996_v7 = vadd.f32 %v5995_v60, %v5994_v16  ;;  %v6018_v22 = vmax.f32 %v6016_v34, %v6017_v15 }
0x15a7   : > { %v5997_v32 = vrot.slane %v5996_v7, 4  ;;  %v6019_v1 = vrot.slane %v6018_v22, 4 }
0x15a9   : > { %v5998_v12 = vadd.f32 %v5997_v32, %v5996_v7  ;;  %v6020_v28 = vmax.f32 %v6018_v22, %v6019_v1 }
0x15ab   : > { %v5999_v0 = vrot.slane %v5998_v12, 2  ;;  %v6021_v36 = vrot.slane %v6020_v28, 2 }
0x15ad   : > { %v6000_v24 = vadd.f32 %v5999_v0, %v5998_v12  ;;  %v6022_v48 = vmax.f32 %v6020_v28, %v6021_v36 }
0x15af   : > { %v6001_v21 = vrot.slane %v6000_v24, 1  ;;  %v6023_v43 = vrot.slane %v6022_v48, 1 }
0x15b1   : > { %v6002_v8 = vadd.f32 %v6001_v21, %v6000_v24  ;;  %v6024_v47 = vmax.f32 %v6022_v48, %v6023_v43 }
0x15b3   : > { %v6003_v26 = vmul.f32 0.015625, %v6002_v8  ;;  %v6080_v37 = vpack.c.bf16 %v6024_v47, %v6024_v47 }
0x15b5   : > { %v6025_v10 = vpack.c.bf16 %v6003_v26, %v6003_v26 }
0x15b7   : > { %7779 = vmatmul.mubr.msk.bf16.vlgmr.msra.gmra.mrb[108].mxu0 %vm1804_vm7, %v6025_v10 }
0x15b8   : > { %7783 = vmatpush3.bf16.msra.mxu0 %v10288_v30  ;;  %7784 = vmatprep.mubr.msk.bf16.mxu0 %vm10819_vm2, %v10764_v38 }
0x15b9   : > { %7788 = vmatprep.subr.bf16.mxu0 %v10764_v38 }
0x15bf   : > { %7785 = vmatmul.mubr.msk.bf16.vlgmr.msra.gmra.mrb[112].mxu0 %vm1804_vm7, %v6080_v37 }
0x15c0   : > { %7790 = vmatprep.mubr.msk.bf16.mxu0 %vm10819_vm2, %v10764_v38  ;;  %7789 = vmatpush3.bf16.msra.mxu0 %v6130_v62 }
0x15c1   : > { %7794 = vmatprep.subr.bf16.mxu0 %v10764_v38 }
0x168a   : > { %v6071_v44 = vpop.f32.mrb[108].mxu0 }
0x168b   : > { %v7780_v30 = vpop.f32.mrb[109].mxu0  ;;  %v6077_v7 = vmax.f32 %v6071_v44, 0.0 }
0x168c   : > { %v6074_v5 = vpop.f32.mrb[110].mxu0 }
0x168d   : > { %v7781_v59 = vpop.f32.mrb[111].mxu0  ;;  %v6078_v22 = vpack.c.bf16 %v6077_v7, %v6077_v7 }
0x1692   : > { %v6118_v33 = vpop.f32.mrb[112].mxu0 }
0x1693   : > { %v6124_v20 = vmax.f32 %v6118_v33, 0.0  ;;  %v7786_v15 = vpop.f32.mrb[113].mxu0 }
0x1694   : > { %v6121_v16 = vpop.f32.mrb[114].mxu0 }
0x1695   : > { %v6125_v34 = vpack.c.bf16 %v6124_v20, %v6124_v20  ;;  %v7787_v60 = vpop.f32.mrb[115].mxu0 }
0x1697   : > { %7791 = vmatmul.mubr.msk.bf16.vlgmr.msra.gmra.mrb[116].mxu0 %vm10822_vm5, %v6125_v34  ;;  %vm10831_vm5 = vmmov %vm10826_vm6 }
0x1698   : > { %7795 = vmatpush3.bf16.msra.mxu0 %v6130_v62  ;;  %7796 = vmatprep.mubr.msk.bf16.mxu0 %vm10819_vm2, %v10764_v38  ;;  %vm10829_vm2 = vmmov %vm10824_vm13 }
0x16a3   : > { %7797 = vmatmul.mubr.msk.bf16.vlgmr.msra.gmra.mrb[116].mxu0 %vm10823_vm12, %v6078_v22  ;;  %vm10832_vm12 = vcmask 1041409  }
0x1776   : > { %v6209_v32 = vpop.f32.mrb[116].mxu0 }
0x1777   : > { %v7021_v1 = vmul.f32 -1.442695, %v6209_v32  ;;  %v7798_v12 = vpop.f32.mrb[117].mxu0 }
0x1778   : > { %v6212_v28 = vpop.f32.mrb[118].mxu0 }
0x1779   : > { %8210 = vpow2.f32 %v7021_v1  ;;  %v7799_v0 = vpop.f32.mrb[119].mxu0 }
0x1783   : > { %v8211_v24 = vpop.eup %8210 }
0x1784   : > { %v6218_v36 = vadd.f32 1.0, %v8211_v24  ;;  %v6481_v24 = vld [vmem:[%s8491_s12] sm:$0xff] }
0x1786   : > { %8212 = vrcp.f32 %v6218_v36  ;;  %v6482_v36 = vld [vmem:[%s8491_s12 + $0x8] sm:$0xff] }
0x1790   : > { %v8213_v21 = vpop.eup %8212 }
0x1791   : > { %v6224_v8 = vrot.slane %v8213_v21, %v9330_v53  ;;  %v7938_v21 = vpack.c.bf16 %v6482_v36, %v6481_v24  ;;  %v6484_v24 = vld [vmem:[%s8491_s12 + $0x18] sm:$0xff] }
0x1793   : > { %v10358_v48 = vmul.f32 %v6224_v8, %v10297_v46  ;;  %v10361_v38 = vmul.f32 %v6224_v8, %v10293_v17  ;;  %v10368_v43 = vmul.f32 %v6224_v8, %v10325_v39  ;;  %v10371_v47 = vmul.f32 %v6224_v8, %v10295_v57  ;;  %7939 = vmatpush3.bf16.msra.mxu1 %v7938_v21 }
0x1794   : > { %v10378_v37 = vmul.f32 %v6224_v8, %v10311_v41  ;;  %v10381_v52 = vmul.f32 %v6224_v8, %v10301_v19  ;;  %v10388_v62 = vmul.f32 %v6224_v8, %v10307_v11  ;;  %v10395_v44 = vmul.f32 %v6224_v8, %v10317_v56  ;;  %7940 = vmatprep.subr.bf16.mxu1 %v10747_v54 }
0x1795   : > { %v6236_v26 = vsel %vm1804_vm7, %v10358_v48, 0.0  ;;  %v6233_v10 = vsel %vm1804_vm7, %v10361_v38, 0.0  ;;  %v6248_v46 = vsel %vm1804_vm7, %v10368_v43, 0.0  ;;  %v6239_v17 = vsel %vm1804_vm7, %v10371_v47, 0.0 }
0x1796   : > { %6237 = vadd.xlane.f32.xlu1 %v6236_v26  ;;  %6234 = vadd.xlane.f32.xlu0 %v6233_v10  ;;  %v6245_v57 = vsel %vm1804_vm7, %v10378_v37, 0.0  ;;  %v6242_v39 = vsel %vm1804_vm7, %v10381_v52, 0.0  ;;  %v6265_v41 = vsel %vm1804_vm7, %v10361_v38, -inf  ;;  %v6251_v19 = vsel %vm1804_vm7, %v10388_v62, 0.0 }
0x1797   : > { %v6271_v30 = vsel %vm1804_vm7, %v10371_v47, -inf  ;;  %v6254_v11 = vsel %vm1804_vm7, %v10395_v44, 0.0  ;;  %v6280_v5 = vsel %vm1804_vm7, %v10368_v43, -inf  ;;  %v6268_v59 = vsel %vm1804_vm7, %v10358_v48, -inf }
0x1798   : > { %v6277_v56 = vsel %vm1804_vm7, %v10378_v37, -inf  ;;  %v6274_v33 = vsel %vm1804_vm7, %v10381_v52, -inf  ;;  %v6283_v20 = vsel %vm1804_vm7, %v10388_v62, -inf  ;;  %v6286_v15 = vsel %vm1804_vm7, %v10395_v44, -inf }
0x179a   : > { %6249 = vadd.xlane.f32.xlu1 %v6248_v46  ;;  %6240 = vadd.xlane.f32.xlu0 %v6239_v17 }
0x179e   : > { %6246 = vadd.xlane.f32.xlu1 %v6245_v57  ;;  %6243 = vadd.xlane.f32.xlu0 %v6242_v39 }
0x17a2   : > { %6266 = vmax.xlane.f32.xlu1 %v6265_v41  ;;  %6252 = vadd.xlane.f32.xlu0 %v6251_v19 }
0x17a6   : > { %6272 = vmax.xlane.f32.xlu1 %v6271_v30  ;;  %6255 = vadd.xlane.f32.xlu0 %v6254_v11 }
0x17aa   : > { %6281 = vmax.xlane.f32.xlu1 %v6280_v5  ;;  %6269 = vmax.xlane.f32.xlu0 %v6268_v59 }
0x17ae   : > { %6278 = vmax.xlane.f32.xlu1 %v6277_v56  ;;  %6275 = vmax.xlane.f32.xlu0 %v6274_v33 }
0x17b2   : > { %6284 = vmax.xlane.f32.xlu0 %v6283_v20 }
0x17b6   : > { %6287 = vmax.xlane.f32.xlu0 %v6286_v15 }
0x1823   : > { %v6238_v16 = vpop.xlane.xlu1 %6237  ;;  %v6235_v34 = vpop.xlane.xlu0 %6234 }
0x1824   : > { %v6258_v17 = vmul.f32 0.0625, %v6238_v16  ;;  %v6257_v57 = vmul.f32 0.0625, %v6235_v34 }
0x1826   : > { %v6304_v15 = vrot.slane %v6258_v17, %v9392_v42  ;;  %v6300_v16 = vrot.slane %v6257_v57, %v9392_v42 }
0x1827   : > { %v6250_v60 = vpop.xlane.xlu1 %6249  ;;  %v6241_v7 = vpop.xlane.xlu0 %6240 }
0x1828   : > { %v6259_v39 = vmul.f32 0.0625, %v6241_v7  ;;  %v6262_v34 = vmul.f32 0.0625, %v6250_v60 }
0x182a   : > { %v6320_v17 = vrot.slane %v6262_v34, %v9392_v42 }
0x182b   : > { %v6247_v22 = vpop.xlane.xlu1 %6246  ;;  %v6244_v32 = vpop.xlane.xlu0 %6243 }
0x182c   : > { %v6260_v19 = vmul.f32 0.0625, %v6244_v32  ;;  %v6308_v32 = vrot.slane %v6259_v39, %v9392_v42 }
0x182f   : > { %v6267_v1 = vpop.xlane.xlu1 %6266  ;;  %v6253_v12 = vpop.xlane.xlu0 %6252 }
0x1830   : > { %v6350_v10 = vrot.slane %v6267_v1, %v9392_v42  ;;  %v6263_v30 = vmul.f32 0.0625, %v6253_v12  ;;  %v6483_v1 = vld [vmem:[%s8491_s12 + $0x10] sm:$0xff]  ;;  %v6261_v12 = vmul.f32 0.0625, %v6247_v22  ;;  %v6329_v22 = vsel %vm10829_vm2, %v6304_v15, %v6300_v16  ;;  %vm10837_vm2 = vmmov %vm10828_vm11 }
0x1831   : > { %v7941_v36 = vpack.c.bf16 %v6484_v24, %v6483_v1  ;;  %v6330_v39 = vsel %vm10830_vm4, %v6308_v32, %v6329_v22  ;;  %v6487_v1 = vld [vmem:[%s8491_s12 + $0x30] sm:$0xff]  ;;  %v6488_v24 = vld [vmem:[%s8491_s12 + $0x38] sm:$0xff]  ;;  %vm10838_vm4 = vmmov %vm10837_vm2 }
0x1832   : > { %v6324_v21 = vrot.slane %v6263_v30, %v9392_v42 }
0x1833   : > { %v6273_v28 = vpop.xlane.xlu1 %6272  ;;  %v6256_v0 = vpop.xlane.xlu0 %6255  ;;  %7942 = vmatpush3.bf16.msra.mxu1 %v7941_v36 }
0x1834   : > { %v6358_v11 = vrot.slane %v6273_v28, %v9392_v42  ;;  %v6264_v56 = vmul.f32 0.0625, %v6256_v0  ;;  %v6312_v0 = vrot.slane %v6260_v19, %v9392_v42  ;;  %7943 = vmatprep.subr.bf16.mxu1 %v10747_v54  ;;  %v6333_v30 = vsel %vm10832_vm12, %v6324_v21, %v6320_v17  ;;  %v6489_v17 = vld [vmem:[%s8491_s12 + $0x40] sm:$0xff] }
0x1836   : > { %v6328_v60 = vrot.slane %v6264_v56, %v9392_v42  ;;  %v6331_v19 = vsel %vm10831_vm5, %v6312_v0, %v6330_v39  ;;  %v6486_v56 = vld [vmem:[%s8491_s12 + $0x28] sm:$0xff]  ;;  %vm10839_vm5 = vcmask 1045504  }
0x1837   : > { %v6282_v8 = vpop.xlane.xlu1 %6281  ;;  %v6270_v26 = vpop.xlane.xlu0 %6269 }
0x1838   : > { %v6354_v46 = vrot.slane %v6270_v26, %v9392_v42 }
0x183a   : > { %v6379_v41 = vsel %vm10824_vm13, %v6354_v46, %v6350_v10  ;;  %vm10833_vm13 = vcmask 1042434  }
0x183b   : > { %v6279_v5 = vpop.xlane.xlu1 %6278  ;;  %v6276_v59 = vpop.xlane.xlu0 %6275  ;;  %v6380_v7 = vsel %vm10825_vm14, %v6358_v11, %v6379_v41  ;;  %v6316_v41 = vrot.slane %v6261_v12, %v9392_v42  ;;  %v6370_v11 = vrot.slane %v6282_v8, %v9392_v42  ;;  %vm10834_vm14 = vmmov %vm10832_vm12  ;;  %vm10840_vm12 = vcmask 1046528  }
0x183c   : > { %v6366_v33 = vrot.slane %v6279_v5, %v9392_v42  ;;  %v6362_v20 = vrot.slane %v6276_v59, %v9392_v42  ;;  %v6485_v59 = vld [vmem:[%s8491_s12 + $0x20] sm:$0xff] }
0x183d   : > { %v7944_v15 = vpack.c.bf16 %v6486_v56, %v6485_v59  ;;  %v6491_v56 = vld [vmem:[%s8491_s12 + $0x50] sm:$0xff] }
0x183e   : > { %v6381_v28 = vsel %vm10826_vm6, %v6362_v20, %v6380_v7  ;;  %vm10835_vm6 = vmmov %vm10827_vm10 }
0x183f   : > { %v6382_v26 = vsel %vm10827_vm10, %v6366_v33, %v6381_v28  ;;  %v6285_v10 = vpop.xlane.xlu0 %6284  ;;  %v6334_v33 = vsel %vm10833_vm13, %v6328_v60, %v6333_v30  ;;  %v6332_v34 = vsel %vm10835_vm6, %v6316_v41, %v6331_v19  ;;  %vm10836_vm10 = vmmov %vm10833_vm13  ;;  %7945 = vmatpush3.bf16.msra.mxu1 %v7944_v15 }
0x1840   : > { %v10434_v46 = vsel %vm10828_vm11, 0.0, %v6382_v26  ;;  %v6374_v57 = vrot.slane %v6285_v10, %v9392_v42  ;;  %v6338_v8 = vsel %vm10828_vm11, %v6334_v33, 0.0  ;;  %7946 = vmatprep.subr.bf16.mxu1 %v10747_v54  ;;  %v10466_v21 = vsel %vm10838_vm4, 0.0, %v6332_v34  ;;  %vm10841_vm13 = vmmov %vm10839_vm5  ;;  %v6492_v33 = vld [vmem:[%s8491_s12 + $0x58] sm:$0xff] }
0x1841   : > { %6428 = vrot.lane.b32.xlu0 %v10434_v46, %s10787_s18  ;;  %v6438_v12 = vrot.slane %v10434_v46, 2  ;;  %v6432_v36 = vrot.slane %v10434_v46, 1  ;;  %v6398_v60 = vrot.slane %v6338_v8, 2  ;;  %v6392_v22 = vrot.slane %v6338_v8, 1  ;;  %vm10843_vm6 = vmmov %vm10837_vm2 }
0x1842   : > { %v6383_v16 = vsel %vm10834_vm14, %v6374_v57, %v6370_v11  ;;  %v6490_v57 = vld [vmem:[%s8491_s12 + $0x48] sm:$0xff]  ;;  %v6397_v41 = vrot.slane %v10466_v21, 2  ;;  %v6391_v19 = vrot.slane %v10466_v21, 1  ;;  %vm10842_vm14 = vmmov %vm10840_vm12  ;;  %v6404_v59 = vrot.slane %v6338_v8, 3 }
0x1843   : > { %v6288_v5 = vpop.xlane.xlu0 %6287  ;;  %v7950_v39 = vpack.c.bf16 %v6490_v57, %v6489_v17  ;;  %v6403_v15 = vrot.slane %v10466_v21, 3  ;;  %v6462_v17 = vrot.slane %v10434_v46, 6  ;;  %v6421_v57 = vrot.slane %v10466_v21, 6 }
0x1844   : > { %v6378_v20 = vrot.slane %v6288_v5, %v9392_v42  ;;  %v7947_v42 = vpack.c.bf16 %v6488_v24, %v6487_v1  ;;  %v6399_v30 = vsel %vm10841_vm13, %v6397_v41, %v6398_v60  ;;  %v6393_v11 = vsel %vm10842_vm14, %v6391_v19, %v6392_v22 }
0x1845   : > { %v6416_v5 = vrot.slane %v6338_v8, 5  ;;  %v6410_v24 = vrot.slane %v6338_v8, 4  ;;  %v6422_v22 = vrot.slane %v6338_v8, 6  ;;  %v6444_v8 = vrot.slane %v10434_v46, 3 }
0x1846   : > { %v6384_v7 = vsel %vm10836_vm10, %v6378_v20, %v6383_v16  ;;  %7948 = vmatpush3.bf16.msra.mxu1 %v7947_v42  ;;  %v6415_v20 = vrot.slane %v10466_v21, 5  ;;  %v7953_v16 = vpack.c.bf16 %v6492_v33, %v6491_v56  ;;  %v6493_v42 = vld [vmem:[%s8491_s12 + $0x60] sm:$0xff]  ;;  %vm10844_vm10 = vcmask 1041408  }
0x1847   : > { %v10458_v32 = vsel %vm10837_vm2, %v6384_v7, 0.0  ;;  %7949 = vmatprep.subr.bf16.mxu1 %v10747_v54  ;;  %v6405_v7 = vsel %vm3243_vm15, %v6403_v15, %v6404_v59  ;;  %vm10845_vm11 = vmmov %vm10844_vm10  ;;  %vm10849_vm4 = vcmask 523264   ;;  %vm10854_vm13 = vcmask 850944  }
0x1848   : > { %v6439_v28 = vrot.slane %v10458_v32, 2  ;;  %v6433_v0 = vrot.slane %v10458_v32, 1  ;;  %v6417_v34 = vsel %vm10843_vm6, %v6415_v20, %v6416_v5  ;;  %v6451_v1 = vrot.slane %v10458_v32, 4 }
0x1849   : > { %v6463_v60 = vrot.slane %v10458_v32, 6  ;;  %v6445_v41 = vrot.slane %v10458_v32, 3  ;;  %vm10855_vm14 = vcmask 916480  }
0x184a   : > { %v6440_v26 = vsel %vm10839_vm5, %v6438_v12, %v6439_v28  ;;  %v6434_v10 = vsel %vm10840_vm12, %v6432_v36, %v6433_v0  ;;  %7951 = vmatpush3.bf16.msra.mxu1 %v7950_v39  ;;  %v6494_v12 = vld [vmem:[%s8491_s12 + $0x68] sm:$0xff]  ;;  %v6450_v36 = vrot.slane %v10434_v46, 4  ;;  %v6409_v0 = vrot.slane %v10466_v21, 4 }
0x184b   : > { %6441 = vrot.lane.b32.xlu0 %v6440_v26, %s10791_s6  ;;  %6435 = vrot.lane.b32.xlu1 %v6434_v10, %s10790_s5  ;;  %v7956_v28 = vpack.c.bf16 %v6494_v12, %v6493_v42  ;;  %v6464_v39 = vsel %vm10844_vm10, %v6462_v17, %v6463_v60  ;;  %v6446_v19 = vsel %vm3243_vm15, %v6444_v8, %v6445_v41  ;;  %vm10847_vm15 = vcmask 195584   ;;  %s949_s5 = sand.u32 1, %s8273_s23  }
0x184c   : > { %7952 = vmatprep.subr.bf16.mxu1 %v10747_v54  ;;  %v6452_v26 = vsel %vm1063_vm0, %v6450_v36, %v6451_v1  ;;  %v6411_v10 = vsel %vm1063_vm0, %v6409_v0, %v6410_v24  ;;  %vm10846_vm0 = vmmov %vm10837_vm2  ;;  %vm10848_vm2 = vcmask 326656   ;;  %vm10851_vm5 = vcmask 654336   ;;  %s10592_s6 = scalar_lea.sflag [#allocation3], %s949_s5 }
0x184d   : > { %vm10852_vm12 = vcmask 719872  }
0x184e   : > { %7954 = vmatpush3.bf16.msra.mxu1 %v7953_v16 }
0x184f   : > { %6400 = vrot.lane.b32.xlu0 %v6399_v30, %s10760_s7  ;;  %6394 = vrot.lane.b32.xlu1 %v6393_v11, %s10793_s8  ;;  %v6457_v30 = vrot.slane %v10458_v32, 5  ;;  %v6456_v11 = vrot.slane %v10434_v46, 5 }
0x1850   : > { %7955 = vmatprep.subr.bf16.mxu1 %v10747_v54  ;;  %v6423_v54 = vsel %vm10845_vm11, %v6421_v57, %v6422_v22 }
0x1851   : > { %v6458_v5 = vsel %vm10846_vm0, %v6456_v11, %v6457_v30 }
0x1852   : > { %7957 = vmatpush3.bf16.msra.mxu1 %v7956_v28 }
0x1853   : > { %6418 = vrot.lane.b32.xlu0 %v6417_v34, %s10798_s10  ;;  %6406 = vrot.lane.b32.xlu1 %v6405_v7, %s10795_s9  ;;  %s6773_s9 = sshll.u32 %s949_s5, 6  ;;  %s8331_s10 = smov [#allocation2]  }
0x1854   : > { %s8223_s7 = sshll.u32 %s8331_s10, 4  ;;  %s8224_s7 = int_to_ptr.vmem [resolvable:$false] %s8223_s7 }
0x1857   : > { %6453 = vrot.lane.b32.xlu0 %v6452_v26, %s10800_s14  ;;  %6412 = vrot.lane.b32.xlu1 %v6411_v10, %s10759_s1  ;;  %s8225_s1 = scalar_lea.vmem %s8224_s7, 2048 }
0x185b   : > { %6465 = vrot.lane.b32.xlu0 %v6464_v39, %s10804_s19  ;;  %6424 = vrot.lane.b32.xlu1 %v6423_v54, %s10797_s3 }
0x185f   : > { %6447 = vrot.lane.b32.xlu1 %v6446_v19, %s10799_s13  ;;  %s10549_s13 = scalar_lea.vmem [#allocation2], %s6773_s9 }
0x1860   : > { %s6676_s14 = sshll.u32 %s10549_s13, 4  ;;  %s10584_s14 = int_to_ptr.vmem [resolvable:$true] %s6676_s14 }
0x1861   : > { %p8226_p0 = scmp.lt.s32.totalorder %s10584_s14, %s8224_s7 }
0x1863   : > { %6459 = vrot.lane.b32.xlu1 %v6458_v5, %s10802_s17  ;;  %s7046_s17 = sshll.u32 %s8519_s0, 10  ;;  %s8219_s0 = scalar_lea.vmem %s10584_s14, 1024 }
0x1864   : > { %s10582_s19 = scalar_lea.hbm %s8496_s20, %s7046_s17  ;;  %p8220_p11 = scmp.ne.s32.totalorder %s10584_s14, %s8219_s0 }
0x1865   : > { %p8227_p1 = scmp.lt.s32.totalorder %s8225_s1, %s8219_s0 }
0x1866   : > { %p8221_p12 = pnand %p8220_p11, %p8536_p5 }
0x1867   : > { %p8228_p2 = por %p8227_p1, %p8226_p0 }
0x1868   : > { %p8222_p13 = pneg %p8221_p12 }
0x186a   : > { %p8229_p3 = pnand %p8228_p2, %p8222_p13 }
0x18b3   : > { %v6429_v59 = vpop.permute.xlu0 %6428 }
0x18bd   : > { %v6436_v56 = vpop.permute.xlu1 %6435  ;;  %v6442_v33 = vpop.permute.xlu0 %6441 }
0x18c1   : > { %v6395_v20 = vpop.permute.xlu1 %6394  ;;  %v6401_v15 = vpop.permute.xlu0 %6400 }
0x18c2   : > { %v6468_v16 = vsel %vm1014_vm1, %v10466_v21, %v6395_v20  ;;  %vm10850_vm1 = vcmask 588800  }
0x18c3   : > { %v6469_v7 = vsel %vm1804_vm7, %v6468_v16, %v6401_v15 }
0x18c5   : > { %v6407_v34 = vpop.permute.xlu1 %6406  ;;  %v6419_v24 = vpop.permute.xlu0 %6418 }
0x18c6   : > { %v6470_v32 = vsel %vm10847_vm15, %v6469_v7, %v6407_v34 }
0x18c9   : > { %v6413_v1 = vpop.permute.xlu1 %6412  ;;  %v6454_v0 = vpop.permute.xlu0 %6453 }
0x18ca   : > { %v6471_v46 = vsel %vm1837_vm8, %v6470_v32, %v6413_v1  ;;  %vm10853_vm8 = vcmask 785408  }
0x18cb   : > { %v6472_v12 = vsel %vm10848_vm2, %v6471_v46, %v6419_v24 }
0x18cd   : > { %v6425_v42 = vpop.permute.xlu1 %6424  ;;  %v6466_v57 = vpop.permute.xlu0 %6465 }
0x18ce   : > { %v6473_v28 = vsel %vm1926_vm9, %v6472_v12, %v6425_v42 }
0x18cf   : > { %v6474_v36 = vsel %vm3318_vm3, %v6473_v28, %v6429_v59 }
0x18d0   : > { %v6475_v26 = vsel %vm10849_vm4, %v6474_v36, %v6436_v56 }
0x18d1   : > { %v6448_v21 = vpop.permute.xlu1 %6447  ;;  %v6476_v10 = vsel %vm10850_vm1, %v6475_v26, %v6442_v33 }
0x18d2   : > { %v6477_v60 = vsel %vm10851_vm5, %v6476_v10, %v6448_v21 }
0x18d3   : > { %v6478_v17 = vsel %vm10852_vm12, %v6477_v60, %v6454_v0 }
0x18d5   : > { %v6460_v22 = vpop.permute.xlu1 %6459 }
0x18d6   : > { %v6479_v39 = vsel %vm10853_vm8, %v6478_v17, %v6460_v22 }
0x18d7   : > { %v6480_v54 = vsel %vm10854_vm13, %v6479_v39, %v6466_v57 }
0x18d8   : > { %7829 = vmatmul.mubr.msk.f32.vlgmr.msra.gmra.mrb[80].mxu1 %vm10855_vm14, %v6480_v54 }
0x19ab   : > { %v6564_v41 = vpop.f32.mrb[80].mxu1 }
0x19ac   : > { %v7023_v8 = vmul.f32 -1.442695, %v6564_v41  ;;  %v7830_v19 = vpop.f32.mrb[81].mxu1 }
0x19ae   : > { %8214 = vpow2.f32 %v7023_v8 }
0x19b8   : > { %v8215_v30 = vpop.eup %8214 }
0x19b9   : > { %v6571_v11 = vadd.f32 1.0, %v8215_v30 }
0x19bb   : > { %8216 = vrcp.f32 %v6571_v11 }
0x19c5   : > { %v8217_v5 = vpop.eup %8216 }
0x19c6   : > { %v6584_v59 = vrot.slane %v8217_v5, %v9555_v27  ;;  %v6577_v56 = vrot.slane %v8217_v5, %v9330_v53  ;;  %v6598_v33 = vrot.slane %v8217_v5, %v9560_v40  ;;  %v6591_v20 = vrot.slane %v8217_v5, %v9563_v45 }
0x19c7   : > { %v6612_v15 = vrot.slane %v8217_v5, %v9568_v58  ;;  %v6605_v16 = vrot.slane %v8217_v5, %v9571_v2  ;;  %v6626_v27 = vrot.slane %v8217_v5, %v9576_v50  ;;  %v6619_v34 = vrot.slane %v8217_v5, %v9579_v61 }
0x19c8   : > { %6586 = vbcast.lane.b32.xlu0 %v6584_v59, 256  ;;  %6579 = vbcast.lane.b32.xlu1 %v6577_v56, 256 }
0x19cc   : > { %6600 = vbcast.lane.b32.xlu0 %v6598_v33, 256  ;;  %6593 = vbcast.lane.b32.xlu1 %v6591_v20, 256 }
0x19d0   : > { %6614 = vbcast.lane.b32.xlu0 %v6612_v15, 256  ;;  %6607 = vbcast.lane.b32.xlu1 %v6605_v16, 256 }
0x19d4   : > { %6628 = vbcast.lane.b32.xlu0 %v6626_v27, 256  ;;  %6621 = vbcast.lane.b32.xlu1 %v6619_v34, 256 }
0x1a3a   : > { %v6587_v53 = vpop.permute.xlu0 %6586  ;;  %v6580_v7 = vpop.permute.xlu1 %6579 }
0x1a3b   : > { %v6631_v40 = vmul.f32 %v6587_v53, %v10358_v48  ;;  %v6630_v45 = vmul.f32 %v6580_v7, %v10361_v38 }
0x1a3d   : > { %v6639_v58 = vadd.f32 %v6631_v40, %v5183_v14  ;;  %v6638_v2 = vadd.f32 %v6630_v45, %v5182_v23 }
0x1a3e   : > { %v6601_v50 = vpop.permute.xlu0 %6600  ;;  %v6594_v32 = vpop.permute.xlu1 %6593 }
0x1a3f   : > { %v6647_v61 = vmax.f32 %v6639_v58, 0.0  ;;  %v6646_v1 = vmax.f32 %v6638_v2, 0.0  ;;  %v6633_v24 = vmul.f32 %v6601_v50, %v10381_v52  ;;  %v6632_v46 = vmul.f32 %v6594_v32, %v10371_v47 }
0x1a41   : > { %6655 = vst.msk [vmem:[%s10549_s13 + $0x8] sm:$0xff] %vm1804_vm7, %v6647_v61  ;;  %6654 = vst.msk [vmem:[%s10549_s13] sm:$0xff] %vm1804_vm7, %v6646_v1  ;;  %v6641_v3 = vadd.f32 %v6633_v24, %v5185_v63  ;;  %v6640_v13 = vadd.f32 %v6632_v46, %v5184_v4 }
0x1a42   : > { %v6615_v14 = vpop.permute.xlu0 %6614  ;;  %v6608_v23 = vpop.permute.xlu1 %6607 }
0x1a43   : > { %v6649_v48 = vmax.f32 %v6641_v3, 0.0  ;;  %v6648_v38 = vmax.f32 %v6640_v13, 0.0  ;;  %v6635_v47 = vmul.f32 %v6615_v14, %v10368_v43  ;;  %v6634_v52 = vmul.f32 %v6608_v23, %v10378_v37 }
0x1a45   : > { %6657 = vst.msk [vmem:[%s10549_s13 + $0x18] sm:$0xff] %vm1804_vm7, %v6649_v48  ;;  %6656 = vst.msk [vmem:[%s10549_s13 + $0x10] sm:$0xff] %vm1804_vm7, %v6648_v38  ;;  %v6643_v49 = vadd.f32 %v6635_v47, %v5187_v25  ;;  %v6642_v51 = vadd.f32 %v6634_v52, %v5186_v9 }
0x1a46   : > { %v6629_v63 = vpop.permute.xlu0 %6628  ;;  %v6622_v4 = vpop.permute.xlu1 %6621 }
0x1a47   : > { %v6651_v42 = vmax.f32 %v6643_v49, 0.0  ;;  %v6650_v43 = vmax.f32 %v6642_v51, 0.0  ;;  %v6637_v37 = vmul.f32 %v6629_v63, %v10395_v44  ;;  %v6636_v12 = vmul.f32 %v6622_v4, %v10388_v62 }
0x1a49   : > { %6659 = vst.msk [vmem:[%s10549_s13 + $0x28] sm:$0xff] %vm1804_vm7, %v6651_v42  ;;  %6658 = vst.msk [vmem:[%s10549_s13 + $0x20] sm:$0xff] %vm1804_vm7, %v6650_v43  ;;  %v6645_v55 = vadd.f32 %v6637_v37, %v5189_v6  ;;  %v6644_v18 = vadd.f32 %v6636_v12, %v5188_v35 }
0x1a4b   : > { %v6653_v25 = vmax.f32 %v6645_v55, 0.0  ;;  %v6652_v9 = vmax.f32 %v6644_v18, 0.0 }
0x1a4d   : > { %6661 = vst.msk [vmem:[%s10549_s13 + $0x38] sm:$0xff] %vm1804_vm7, %v6653_v25  ;;  %6660 = vst.msk [vmem:[%s10549_s13 + $0x30] sm:$0xff] %vm1804_vm7, %v6652_v9 }
0x1a4e   : > { %8232 = shalt.err (!%p8229_p3)
}
0x1a4f   : > { %s8233_s3 = scalar_lea.hbm %s10582_s19, 1024  ;;  %s8237_s18 = scalar_lea.hbm %s8496_s20, 2048 }
0x1a50   : > { %p8234_p4 = scmp.ne.s32.totalorder %s10582_s19, %s8233_s3  ;;  %p8238_p9 = scmp.lt.u32.totalorder %s10582_s19, %s8496_s20 }
0x1a51   : > { %p8239_p10 = scmp.lt.u32.totalorder %s8237_s18, %s8233_s3  ;;  %p8241_p12 = scmp.lt.u32.totalorder %s8233_s3, %s10582_s19 }
0x1a52   : > { %p8235_p7 = pnand %p8234_p4, %p8536_p5 }
0x1a53   : > { %p8240_p11 = por %p8239_p10, %p8238_p9 }
0x1a54   : > { %p8236_p8 = pneg %p8235_p7 }
0x1a55   : > { %p8242_p0 = por %p8241_p12, %p8240_p11 }
0x1a57   : > { %p8243_p13 = pnand %p8242_p0, %p8236_p8 }
0x1a59   : > { %8246 = shalt.err (!%p8243_p13)
}
0x1a5a   : > { %s8332_s21 = smov 128  }
0x1a5b   : > { %8071 = dma.vmem_to_hbm [thread:$0]  (%p8536_p5), %s10584_s14, 1024, %s10582_s19, %s10592_s6, %s8332_s21, %s8332_s21, %s10793_s8  }
0x1a5c PF: > { %p8077_p1 = scmp.ge.s32.totalorder %s8281_s28, 2  ;;  %s6691_s25 = sand.u32 1, %s8269_s22  }
0x1a5d   : > { %s6692_s5 = scalar_lea.sflag [#allocation3], %s6691_s25 }
0x1a5e   : > { %p8074_p2 = pnand %p8077_p1, %p8540_p6 }
0x1a60   : > { %8264 = dma.done.wait (!%p8074_p2), %s6692_s5, 1024  }
0x1a61   : > { %8266 = vsyncadd (!%p8074_p2), %s6692_s5, 4294966272  ;;  %p73_p3 = scmp.ge.s32.totalorder %s8523_s2, 4   ;;  %s10856_s22 = smov %s8273_s23 }
0x1a62   : > { %s10857_s23 = smov %s8277_s26  ;;  %s10858_s26 = smov %s8534_s11 }
0x1a63   : > { %s10859_s28 = smov %s8523_s2  ;;  %75 = sbr.rel (!%p73_p3) target bundleno = 69 (0x45), region = 216 }
0x1a6a   :  { %6697 = vsyncpa [#allocation3], 1 }
0x1a6b   :  { %6699 = vsyncpa [#allocation3 + $0x1], 1 }

</bundles_post_ra>
